<compile_context>
chip_gen: v7x
topology: tpu7x:2x2x1
jax: 0.10.0
libtpu: 0.0.40
codegen_flags: <defaults>
</compile_context>

<pallas_src>
import functools

import jax
import jax.numpy as jnp
from jax.experimental import pallas as pl
from jax.experimental.pallas import tpu as pltpu


# ---------------------------------------------------------------------------
# small helpers
# ---------------------------------------------------------------------------
def _vmem_limit_bytes(working_bytes):
    """VMEM limit from the estimated working set, capped at 3/4 of physical."""
    try:
        cap = pltpu.get_tpu_info().vmem_capacity_bytes
    except Exception:  # fall back conservatively if the query is unavailable
        cap = 128 * 1024 * 1024
    limit = max(2 * int(working_bytes), 32 * 1024 * 1024)
    return int(min(limit, (3 * cap) // 4))


def _pick_bt(B, T):
    """Largest divisor of B such that the flattened row count Bt*T <= 512."""
    best = 1
    for c in range(1, B + 1):
        if B % c == 0 and c * T <= 512:
            best = c
    return best


# ---------------------------------------------------------------------------
# in-kernel helpers (traced inside Pallas kernels)
# ---------------------------------------------------------------------------
def _layernorm(x, g, b):
    mu = jnp.mean(x, axis=-1, keepdims=True)
    var = jnp.mean((x - mu) ** 2, axis=-1, keepdims=True)
    return (x - mu) * jax.lax.rsqrt(var + 1e-5) * g + b


def _sdpa_heads(q_bf, k_bf, v_bf, *, nhead):
    """Scaled-dot-product attention for one batch element, all heads.

    q_bf: (Tq, D) bf16 (already scaled), k_bf/v_bf: (Tk, D) bf16.
    Returns concat_h(softmax(q_h k_h^T) v_h) as (Tq, D) f32 (heads written
    into contiguous lane slices; the output projection is done by the caller
    as one full-K matmul).
    """
    _, D = q_bf.shape
    hd = D // nhead
    outs = []
    for h in range(nhead):  # static unroll; nhead is small
        sl = slice(h * hd, (h + 1) * hd)
        # scores: contract last dims (q @ k^T) without an explicit transpose
        s = jax.lax.dot_general(
            q_bf[:, sl], k_bf[:, sl],
            dimension_numbers=(((1,), (1,)), ((), ())),
            preferred_element_type=jnp.float32)                      # (Tq, Tk)
        s = s - jnp.max(s, axis=-1, keepdims=True)
        p = jnp.exp(s)
        p = p * pl.reciprocal(jnp.sum(p, axis=-1, keepdims=True), approx=True)
        outs.append(jnp.dot(p.astype(jnp.bfloat16), v_bf[:, sl],
                            preferred_element_type=jnp.float32))     # (Tq, hd)
    return outs[0] if nhead == 1 else jnp.concatenate(outs, axis=-1)


# ---------------------------------------------------------------------------
# kernel 1: cross-attention K/V projection of `memory` for ALL layers
#   k_l = (memory + pos) @ Wk_l + bk_l ; v_l = memory @ Wv_l + bv_l  (bf16)
# grid = (B, S tiles, L); the (mem+pos)/mem activation block index is constant
# across the innermost layer axis, so it is DMA'd from HBM exactly once.
# ---------------------------------------------------------------------------
def memory_kv_kernel(kin_ref, vin_ref, wk_ref, bk_ref, wv_ref, bv_ref,
                     k_ref, v_ref):
    k = jnp.dot(kin_ref[0], wk_ref[0],
                preferred_element_type=jnp.float32) + bk_ref[0]
    v = jnp.dot(vin_ref[0], wv_ref[0],
                preferred_element_type=jnp.float32) + bv_ref[0]
    k_ref[0, 0] = k.astype(k_ref.dtype)
    v_ref[0, 0] = v.astype(v_ref.dtype)


def memory_kv_forward(k_in, v_in, wk, bk, wv, bv):
    """k_in, v_in: (B, S, D) bf16 ; wk/wv: (L, D, D) bf16 ; bk/bv: (L, 1, D).

    Returns (mem_k, mem_v): (L, B, S, D) bf16.
    """
    B, S, D = k_in.shape
    L = wk.shape[0]
    TS = S if S <= 512 else 512                 # cdiv tiling, masked edge block
    grid = (B, pl.cdiv(S, TS), L)

    act = pl.BlockSpec((1, TS, D), lambda b, s, l: (b, s, 0))
    w = pl.BlockSpec((1, D, D), lambda b, s, l: (l, 0, 0))
    bias = pl.BlockSpec((1, 1, D), lambda b, s, l: (l, 0, 0))
    out = pl.BlockSpec((1, 1, TS, D), lambda b, s, l: (l, b, s, 0))

    flops = 4 * L * B * S * D * D
    bytes_accessed = (2 * B * S * D * 2                 # activations (read once)
                      + 2 * L * D * D * 2 + 2 * L * D * 4
                      + 2 * L * B * S * D * 2)          # outputs
    working = (2 * 2 * TS * D * 2 + 2 * 2 * D * D * 2   # double-buffered blocks
               + 2 * 2 * TS * D * 2 + 4 * TS * D * 4)   # + f32 temporaries

    return pl.pallas_call(
        memory_kv_kernel,
        out_shape=(jax.ShapeDtypeStruct((L, B, S, D), jnp.bfloat16),
                   jax.ShapeDtypeStruct((L, B, S, D), jnp.bfloat16)),
        grid=grid,
        in_specs=[act, act, w, bias, w, bias],
        out_specs=(out, out),
        compiler_params=pltpu.CompilerParams(
            dimension_semantics=("parallel", "parallel", "arbitrary"),
            vmem_limit_bytes=_vmem_limit_bytes(working)),
        cost_estimate=pl.CostEstimate(
            flops=flops, transcendentals=0, bytes_accessed=bytes_accessed),
    )(k_in, v_in, wk, bk, wv, bv)


# ---------------------------------------------------------------------------
# kernel 2: the whole decoder stack
# grid = (batch blocks, L); residual stream carried across layers in VMEM
# scratch; each layer's output is also written to HBM (for intermediates).
# ---------------------------------------------------------------------------
def decoder_stack_kernel(x_ref, qpos_ref, memk_ref, memv_ref,
                         wqk_s_ref, bqk_s_ref, wv_s_ref, bv_s_ref,
                         wo_s_ref, bo_s_ref,
                         wq_c_ref, bq_c_ref, wo_c_ref, bo_c_ref,
                         w1_ref, bl1_ref, w2_ref, bl2_ref,
                         ln_ref,
                         out_ref, carry_ref, *, nhead, bt, t):
    layer = pl.program_id(1)

    @pl.when(layer == 0)
    def _():
        carry_ref[...] = x_ref[0].astype(jnp.float32)

    x = carry_ref[...]                          # (Bt*T, D) f32 residual stream
    qpos = qpos_ref[0].astype(jnp.float32)      # (Bt*T, D)
    D = x.shape[-1]
    hd = D // nhead
    scale = 1.0 / float(hd) ** 0.5

    ln = ln_ref[0].astype(jnp.float32)          # (6, D): g1,b1,g2,b2,g3,b3
    g1, b1 = ln[0:1, :], ln[1:2, :]
    g2, b2 = ln[2:3, :], ln[3:4, :]
    g3, b3 = ln[4:5, :], ln[5:6, :]

    # ---- self-attention: q = k = x + query_pos, v = x (fused Q/K proj) ----
    qk_in = (x + qpos).astype(jnp.bfloat16)
    qk = jnp.dot(qk_in, wqk_s_ref[0],
                 preferred_element_type=jnp.float32) + bqk_s_ref[0]  # (M, 2D)
    q_s = (qk[:, :D] * scale).astype(jnp.bfloat16)
    k_s = qk[:, D:].astype(jnp.bfloat16)
    v_s = (jnp.dot(x.astype(jnp.bfloat16), wv_s_ref[0],
                   preferred_element_type=jnp.float32)
           + bv_s_ref[0]).astype(jnp.bfloat16)

    sa_parts = []
    for b in range(bt):                         # static unroll over batch block
        sl = slice(b * t, (b + 1) * t)
        sa_parts.append(_sdpa_heads(q_s[sl], k_s[sl], v_s[sl], nhead=nhead))
    sa_cat = sa_parts[0] if bt == 1 else jnp.concatenate(sa_parts, axis=0)
    # single full-K output projection over all batch rows
    sa = jnp.dot(sa_cat.astype(jnp.bfloat16), wo_s_ref[0],
                 preferred_element_type=jnp.float32) + bo_s_ref[0]
    y = _layernorm(x + sa, g1, b1)

    # ---- cross-attention: q = y + query_pos, K/V precomputed from memory ---
    q_c = jnp.dot((y + qpos).astype(jnp.bfloat16), wq_c_ref[0],
                  preferred_element_type=jnp.float32) + bq_c_ref[0]
    q_c = (q_c * scale).astype(jnp.bfloat16)
    memk = memk_ref[0]                          # (Bt, S, D) bf16
    memv = memv_ref[0]
    ca_parts = []
    for b in range(bt):
        sl = slice(b * t, (b + 1) * t)
        ca_parts.append(_sdpa_heads(q_c[sl], memk[b], memv[b], nhead=nhead))
    ca_cat = ca_parts[0] if bt == 1 else jnp.concatenate(ca_parts, axis=0)
    ca = jnp.dot(ca_cat.astype(jnp.bfloat16), wo_c_ref[0],
                 preferred_element_type=jnp.float32) + bo_c_ref[0]
    z = _layernorm(y + ca, g2, b2)

    # ---- FFN: Linear1 -> ReLU -> Linear2 ----
    h1 = jnp.maximum(
        jnp.dot(z.astype(jnp.bfloat16), w1_ref[0],
                preferred_element_type=jnp.float32) + bl1_ref[0], 0.0)
    h2 = jnp.dot(h1.astype(jnp.bfloat16), w2_ref[0],
                 preferred_element_type=jnp.float32) + bl2_ref[0]
    new_x = _layernorm(z + h2, g3, b3)

    carry_ref[...] = new_x
    out_ref[0, 0] = new_x.astype(out_ref.dtype)


def decoder_stack_forward(x, qpos, mem_k, mem_v, p, *, nhead):
    """x, qpos: (B, T, D) f32 ; mem_k/mem_v: (L, B, S, D) bf16.

    Returns all per-layer outputs as (L, B, T, D) f32.
    """
    B, T, D = x.shape
    L, _, S, _ = mem_k.shape
    FF = p["w1"].shape[-1]

    bt = _pick_bt(B, T)
    gb = B // bt
    M = bt * T
    # free row-major merge of adjacent dims; keeps the kernel lane-dense
    x2 = x.reshape(gb, M, D)
    qpos2 = qpos.reshape(gb, M, D)

    act = pl.BlockSpec((1, M, D), lambda g, l: (g, 0, 0))
    mem = pl.BlockSpec((1, bt, S, D), lambda g, l: (l, g, 0, 0))
    out = pl.BlockSpec((1, 1, M, D), lambda g, l: (l, g, 0, 0))

    def wspec(shape):
        n = len(shape)
        return pl.BlockSpec((1,) + shape, lambda g, l, n=n: (l,) + (0,) * n)

    in_specs = [
        act, act, mem, mem,
        wspec((D, 2 * D)), wspec((1, 2 * D)),
        wspec((D, D)), wspec((1, D)),
        wspec((D, D)), wspec((1, D)),
        wspec((D, D)), wspec((1, D)),
        wspec((D, D)), wspec((1, D)),
        wspec((D, FF)), wspec((1, FF)),
        wspec((FF, D)), wspec((1, D)),
        wspec((6, D)),
    ]

    flops = L * (2 * B * T * D * 3 * D          # self-attn q/k/v projections
                 + 4 * B * T * T * D            # self-attn scores + PV
                 + 2 * B * T * D * D            # self-attn output projection
                 + 2 * B * T * D * D            # cross-attn q projection
                 + 4 * B * T * S * D            # cross-attn scores + PV
                 + 2 * B * T * D * D            # cross-attn output projection
                 + 4 * B * T * D * FF)          # FFN
    w_bytes = L * ((6 * D * D + 2 * D * FF) * 2 + (14 * D + FF) * 4)
    bytes_accessed = (2 * B * T * D * 4                 # x, qpos
                      + 2 * L * B * S * D * 2           # memory K/V
                      + w_bytes
                      + L * B * T * D * 4)              # per-layer outputs
    working = (2 * M * D * 4                            # x, qpos blocks
               + 2 * 2 * bt * S * D * 2                 # mem K/V, double buf
               + 2 * (6 * D * D + 2 * D * FF) * 2       # weights, double buf
               + M * D * 4                              # carry scratch
               + 4 * M * max(D, FF) * 4                 # f32 temporaries
               + 2 * bt * nhead * T * max(T, S) * 4)    # attention scores

    kernel = functools.partial(decoder_stack_kernel, nhead=nhead, bt=bt, t=T)
    out_all = pl.pallas_call(
        kernel,
        out_shape=jax.ShapeDtypeStruct((L, gb, M, D), jnp.float32),
        grid=(gb, L),
        in_specs=in_specs,
        out_specs=out,
        scratch_shapes=[pltpu.VMEM((M, D), jnp.float32)],
        compiler_params=pltpu.CompilerParams(
            dimension_semantics=("parallel", "arbitrary"),
            vmem_limit_bytes=_vmem_limit_bytes(working)),
        cost_estimate=pl.CostEstimate(
            flops=flops,
            transcendentals=L * B * nhead * T * (T + S),
            bytes_accessed=bytes_accessed),
    )(x2, qpos2, mem_k, mem_v,
      p["wqk_s"], p["bqk_s"], p["wv_s"], p["bv_s"], p["wo_s"], p["bo_s"],
      p["wq_c"], p["bq_c"], p["wo_c"], p["bo_c"],
      p["w1"], p["bl1"], p["w2"], p["bl2"],
      p["ln"])
    return out_all.reshape(L, B, T, D)


# ---------------------------------------------------------------------------
# optional final LayerNorm (TransformerDecoder.norm)
# ---------------------------------------------------------------------------
def final_norm_kernel(x_ref, g_ref, b_ref, o_ref):
    o_ref[0] = _layernorm(x_ref[0].astype(jnp.float32),
                          g_ref[...], b_ref[...]).astype(o_ref.dtype)


def final_layernorm(x, g, b):
    """LayerNorm over the last dim of x (..., T, D) via a small Pallas kernel."""
    shape = x.shape
    D = shape[-1]
    x3 = x.reshape(-1, shape[-2], D)
    N, T, _ = x3.shape
    act = pl.BlockSpec((1, T, D), lambda n: (n, 0, 0))
    wspec = pl.BlockSpec((1, D), lambda n: (0, 0))
    out = pl.pallas_call(
        final_norm_kernel,
        out_shape=jax.ShapeDtypeStruct((N, T, D), jnp.float32),
        grid=(N,),
        in_specs=[act, wspec, wspec],
        out_specs=act,
        compiler_params=pltpu.CompilerParams(dimension_semantics=("parallel",)),
    )(x3, g.reshape(1, D), b.reshape(1, D))
    return out.reshape(shape)


# ---------------------------------------------------------------------------
# TransformerDecoder forward
# ---------------------------------------------------------------------------
def transformer_decoder(tgt, memory, params, *, nhead,
                        pos=None, query_pos=None, norm_params=None,
                        return_intermediate=False):
    """tgt: (T, B, D), memory: (S, B, D) like the PyTorch module.

    Returns (1, T, B, D) (output.unsqueeze(0)) or, with return_intermediate,
    (num_layers, T, B, D).
    """
    x = jnp.transpose(tgt, (1, 0, 2))           # (B, T, D) kernel layout
    mem = jnp.transpose(memory, (1, 0, 2))      # (B, S, D)
    p = jnp.zeros_like(mem) if pos is None else jnp.transpose(pos, (1, 0, 2))
    qp = (jnp.zeros_like(x) if query_pos is None
          else jnp.transpose(query_pos, (1, 0, 2)))

    # Cross-attention K/V of `memory` for ALL layers in one pass. The f32
    # (mem + pos) add happens once here; the kernel reads bf16 activations.
    k_in = (mem + p).astype(jnp.bfloat16)
    v_in = mem.astype(jnp.bfloat16)
    mem_k, mem_v = memory_kv_forward(k_in, v_in,
                                     params["wk_c"], params["bk_c"],
                                     params["wv_c"], params["bv_c"])

    # Whole layer stack in a single pallas_call.
    outs = decoder_stack_forward(x, qp, mem_k, mem_v, params, nhead=nhead)

    if return_intermediate:
        inter = outs
        if norm_params is not None:
            inter = final_layernorm(inter, norm_params["g"], norm_params["b"])
        return jnp.transpose(inter, (0, 2, 1, 3))       # (L, T, B, D)

    out = outs[-1]
    if norm_params is not None:
        out = final_layernorm(out, norm_params["g"], norm_params["b"])
    return jnp.transpose(out, (1, 0, 2))[None]          # unsqueeze(0)


# ---------------------------------------------------------------------------
# parameter construction
# ---------------------------------------------------------------------------
def init_layer_params(key, d_model, dim_feedforward):
    """Weights stored (in, out), i.e. pre-transposed vs. PyTorch Linear.weight."""
    ks = jax.random.split(key, 10)
    s = 0.02
    D, FF = d_model, dim_feedforward
    n = lambda k, shape: s * jax.random.normal(k, shape, jnp.float32)
    z = lambda m: jnp.zeros((m,), jnp.float32)
    o = lambda m: jnp.ones((m,), jnp.float32)
    return {
        # self-attention
        "wq_s": n(ks[0], (D, D)), "wk_s": n(ks[1], (D, D)), "wv_s": n(ks[2], (D, D)),
        "bq_s": z(D), "bk_s": z(D), "bv_s": z(D),
        "wo_s": n(ks[3], (D, D)), "bo_s": z(D),
        "g1": o(D), "b1": z(D),
        # cross-attention
        "wq_c": n(ks[4], (D, D)), "wk_c": n(ks[5], (D, D)), "wv_c": n(ks[6], (D, D)),
        "bq_c": z(D), "bk_c": z(D), "bv_c": z(D),
        "wo_c": n(ks[7], (D, D)), "bo_c": z(D),
        "g2": o(D), "b2": z(D),
        # FFN
        "w1": n(ks[8], (D, FF)), "bl1": z(FF),
        "w2": n(ks[9], (FF, D)), "bl2": z(D),
        "g3": o(D), "b3": z(D),
    }


def prepare_params(layer_params):
    """Stack per-layer params along a leading L axis, fuse self-attn Q/K into
    one (D, 2D) weight, cast matmul weights to bf16, pack the three LayerNorms
    into a (L, 6, D) slab, and reshape biases to (L, 1, n)."""
    bf = lambda w: w.astype(jnp.bfloat16)
    r2 = lambda b: b.reshape(1, -1)

    def stk(fn):
        return jnp.stack([fn(p) for p in layer_params], axis=0)

    return {
        # self-attention
        "wqk_s": stk(lambda p: bf(jnp.concatenate([p["wq_s"], p["wk_s"]], axis=1))),
        "bqk_s": stk(lambda p: r2(jnp.concatenate([p["bq_s"], p["bk_s"]]))),
        "wv_s": stk(lambda p: bf(p["wv_s"])), "bv_s": stk(lambda p: r2(p["bv_s"])),
        "wo_s": stk(lambda p: bf(p["wo_s"])), "bo_s": stk(lambda p: r2(p["bo_s"])),
        # cross-attention
        "wq_c": stk(lambda p: bf(p["wq_c"])), "bq_c": stk(lambda p: r2(p["bq_c"])),
        "wk_c": stk(lambda p: bf(p["wk_c"])), "bk_c": stk(lambda p: r2(p["bk_c"])),
        "wv_c": stk(lambda p: bf(p["wv_c"])), "bv_c": stk(lambda p: r2(p["bv_c"])),
        "wo_c": stk(lambda p: bf(p["wo_c"])), "bo_c": stk(lambda p: r2(p["bo_c"])),
        # FFN
        "w1": stk(lambda p: bf(p["w1"])), "bl1": stk(lambda p: r2(p["bl1"])),
        "w2": stk(lambda p: bf(p["w2"])), "bl2": stk(lambda p: r2(p["bl2"])),
        # LayerNorms packed as rows [g1, b1, g2, b2, g3, b3]
        "ln": stk(lambda p: jnp.stack([p["g1"], p["b1"], p["g2"], p["b2"],
                                       p["g3"], p["b3"]], axis=0)),
    }


if __name__ == "__main__":
    T, S, B, D, NHEAD, FF, NUM_LAYERS = 8, 16, 2, 32, 4, 64, 2
    assert D % NHEAD == 0

    key = jax.random.PRNGKey(0)
    k_tgt, k_mem, k_pos, k_qpos, *k_layers = jax.random.split(key, 4 + NUM_LAYERS)

    # PyTorch-style (seq, batch, d_model) inputs
    tgt = jax.random.normal(k_tgt, (T, B, D), jnp.float32)
    memory = jax.random.normal(k_mem, (S, B, D), jnp.float32)
    pos = jax.random.normal(k_pos, (S, B, D), jnp.float32)
    query_pos = jax.random.normal(k_qpos, (T, B, D), jnp.float32)

    params = prepare_params([init_layer_params(k, D, FF) for k in k_layers])

    fwd = jax.jit(functools.partial(transformer_decoder, nhead=NHEAD,
                                    return_intermediate=False))
    out = fwd(tgt, memory, params, pos=pos, query_pos=query_pos)
    out = jax.block_until_ready(out)
    assert out.shape == (1, T, B, D), out.shape
    print("KERNEL_OK")
</pallas_src>

<mosaic_0001>
module attributes {stable_mosaic.version = 11 : i64} {
  func.func @memory_kv_kernel(%arg0: i32, %arg1: i32, %arg2: i32, %arg3: memref<1x16x32xbf16, #tpu.memory_space<vmem>>, %arg4: memref<1x16x32xbf16, #tpu.memory_space<vmem>>, %arg5: memref<1x32x32xbf16, #tpu.memory_space<vmem>>, %arg6: memref<1x1x32xf32, #tpu.memory_space<vmem>>, %arg7: memref<1x32x32xbf16, #tpu.memory_space<vmem>>, %arg8: memref<1x1x32xf32, #tpu.memory_space<vmem>>, %arg9: memref<1x1x16x32xbf16, #tpu.memory_space<vmem>>, %arg10: memref<1x1x16x32xbf16, #tpu.memory_space<vmem>>) attributes {dimension_semantics = [#tpu.dimension_semantics<parallel>, #tpu.dimension_semantics<parallel>, #tpu.dimension_semantics<arbitrary>], iteration_bounds = array<i64: 2, 1, 2>, scalar_prefetch = 0 : i64, scratch_operands = 0 : i64, tpu.core_type = #tpu.core_type<tc>, window_params = [{transform_indices = @transform_0, window_bounds = array<i64: 1, 16, 32>}, {transform_indices = @transform_1, window_bounds = array<i64: 1, 16, 32>}, {transform_indices = @transform_2, window_bounds = array<i64: 1, 32, 32>}, {transform_indices = @transform_3, window_bounds = array<i64: 1, 1, 32>}, {transform_indices = @transform_4, window_bounds = array<i64: 1, 32, 32>}, {transform_indices = @transform_5, window_bounds = array<i64: 1, 1, 32>}, {transform_indices = @transform_6, window_bounds = array<i64: 1, 1, 16, 32>}, {transform_indices = @transform_7, window_bounds = array<i64: 1, 1, 16, 32>}]} {
    %c0 = arith.constant 0 : index
    %c0_0 = arith.constant 0 : index
    %c0_1 = arith.constant 0 : index
    %0 = vector.load %arg3[%c0, %c0_0, %c0_1] : memref<1x16x32xbf16, #tpu.memory_space<vmem>>, vector<1x16x32xbf16>
    %1 = vector.shape_cast %0 : vector<1x16x32xbf16> to vector<16x32xbf16>
    %c0_2 = arith.constant 0 : index
    %c0_3 = arith.constant 0 : index
    %c0_4 = arith.constant 0 : index
    %2 = vector.load %arg5[%c0_2, %c0_3, %c0_4] : memref<1x32x32xbf16, #tpu.memory_space<vmem>>, vector<1x32x32xbf16>
    %3 = vector.shape_cast %2 : vector<1x32x32xbf16> to vector<32x32xbf16>
    %cst = arith.constant dense<0.000000e+00> : vector<16x32xf32>
    %4 = tpu.matmul %1, %3, %cst {dimension_numbers = #tpu.dot_dimension_numbers<[1], [0], [0], [1], [0, 0, 1, 1], [], []>} : vector<16x32xbf16>, vector<32x32xbf16>, vector<16x32xf32> -> vector<16x32xf32>
    %c0_5 = arith.constant 0 : index
    %c0_6 = arith.constant 0 : index
    %c0_7 = arith.constant 0 : index
    %5 = vector.load %arg6[%c0_5, %c0_6, %c0_7] : memref<1x1x32xf32, #tpu.memory_space<vmem>>, vector<1x1x32xf32>
    %6 = vector.shape_cast %5 : vector<1x1x32xf32> to vector<1x32xf32>
    %7 = vector.broadcast %6 : vector<1x32xf32> to vector<16x32xf32>
    %8 = arith.addf %4, %7 : vector<16x32xf32>
    %c0_8 = arith.constant 0 : index
    %c0_9 = arith.constant 0 : index
    %c0_10 = arith.constant 0 : index
    %9 = vector.load %arg4[%c0_8, %c0_9, %c0_10] : memref<1x16x32xbf16, #tpu.memory_space<vmem>>, vector<1x16x32xbf16>
    %10 = vector.shape_cast %9 : vector<1x16x32xbf16> to vector<16x32xbf16>
    %c0_11 = arith.constant 0 : index
    %c0_12 = arith.constant 0 : index
    %c0_13 = arith.constant 0 : index
    %11 = vector.load %arg7[%c0_11, %c0_12, %c0_13] : memref<1x32x32xbf16, #tpu.memory_space<vmem>>, vector<1x32x32xbf16>
    %12 = vector.shape_cast %11 : vector<1x32x32xbf16> to vector<32x32xbf16>
    %cst_14 = arith.constant dense<0.000000e+00> : vector<16x32xf32>
    %13 = tpu.matmul %10, %12, %cst_14 {dimension_numbers = #tpu.dot_dimension_numbers<[1], [0], [0], [1], [0, 0, 1, 1], [], []>} : vector<16x32xbf16>, vector<32x32xbf16>, vector<16x32xf32> -> vector<16x32xf32>
    %c0_15 = arith.constant 0 : index
    %c0_16 = arith.constant 0 : index
    %c0_17 = arith.constant 0 : index
    %14 = vector.load %arg8[%c0_15, %c0_16, %c0_17] : memref<1x1x32xf32, #tpu.memory_space<vmem>>, vector<1x1x32xf32>
    %15 = vector.shape_cast %14 : vector<1x1x32xf32> to vector<1x32xf32>
    %16 = vector.broadcast %15 : vector<1x32xf32> to vector<16x32xf32>
    %17 = arith.addf %13, %16 : vector<16x32xf32>
    %18 = arith.truncf %8 : vector<16x32xf32> to vector<16x32xbf16>
    %c0_18 = arith.constant 0 : index
    %c0_19 = arith.constant 0 : index
    %c0_20 = arith.constant 0 : index
    %c0_21 = arith.constant 0 : index
    %19 = vector.load %arg9[%c0_18, %c0_19, %c0_20, %c0_21] : memref<1x1x16x32xbf16, #tpu.memory_space<vmem>>, vector<1x1x16x32xbf16>
    %20 = vector.shape_cast %19 : vector<1x1x16x32xbf16> to vector<16x32xbf16>
    %21 = vector.shape_cast %18 : vector<16x32xbf16> to vector<1x1x16x32xbf16>
    tpu.vector_store %arg9[%c0_18, %c0_19, %c0_20, %c0_21], %21 {strides = array<i32>} : memref<1x1x16x32xbf16, #tpu.memory_space<vmem>>, vector<1x1x16x32xbf16>,
    %22 = arith.truncf %17 : vector<16x32xf32> to vector<16x32xbf16>
    %c0_22 = arith.constant 0 : index
    %c0_23 = arith.constant 0 : index
    %c0_24 = arith.constant 0 : index
    %c0_25 = arith.constant 0 : index
    %23 = vector.load %arg10[%c0_22, %c0_23, %c0_24, %c0_25] : memref<1x1x16x32xbf16, #tpu.memory_space<vmem>>, vector<1x1x16x32xbf16>
    %24 = vector.shape_cast %23 : vector<1x1x16x32xbf16> to vector<16x32xbf16>
    %25 = vector.shape_cast %22 : vector<16x32xbf16> to vector<1x1x16x32xbf16>
    tpu.vector_store %arg10[%c0_22, %c0_23, %c0_24, %c0_25], %25 {strides = array<i32>} : memref<1x1x16x32xbf16, #tpu.memory_space<vmem>>, vector<1x1x16x32xbf16>,
    return
  }
  func.func @transform_0(%arg0: i32, %arg1: i32, %arg2: i32) -> (i32, i32, i32) {
    %c0_i32 = arith.constant 0 : i32
    %c0_i32_0 = arith.constant 0 : i32
    return %arg0, %arg1, %c0_i32 : i32, i32, i32
  }
  func.func @transform_1(%arg0: i32, %arg1: i32, %arg2: i32) -> (i32, i32, i32) {
    %c0_i32 = arith.constant 0 : i32
    %c0_i32_0 = arith.constant 0 : i32
    return %arg0, %arg1, %c0_i32 : i32, i32, i32
  }
  func.func @transform_2(%arg0: i32, %arg1: i32, %arg2: i32) -> (i32, i32, i32) {
    %c0_i32 = arith.constant 0 : i32
    %c0_i32_0 = arith.constant 0 : i32
    %c0_i32_1 = arith.constant 0 : i32
    return %arg2, %c0_i32, %c0_i32_0 : i32, i32, i32
  }
  func.func @transform_3(%arg0: i32, %arg1: i32, %arg2: i32) -> (i32, i32, i32) {
    %c0_i32 = arith.constant 0 : i32
    %c0_i32_0 = arith.constant 0 : i32
    %c0_i32_1 = arith.constant 0 : i32
    return %arg2, %c0_i32, %c0_i32_0 : i32, i32, i32
  }
  func.func @transform_4(%arg0: i32, %arg1: i32, %arg2: i32) -> (i32, i32, i32) {
    %c0_i32 = arith.constant 0 : i32
    %c0_i32_0 = arith.constant 0 : i32
    %c0_i32_1 = arith.constant 0 : i32
    return %arg2, %c0_i32, %c0_i32_0 : i32, i32, i32
  }
  func.func @transform_5(%arg0: i32, %arg1: i32, %arg2: i32) -> (i32, i32, i32) {
    %c0_i32 = arith.constant 0 : i32
    %c0_i32_0 = arith.constant 0 : i32
    %c0_i32_1 = arith.constant 0 : i32
    return %arg2, %c0_i32, %c0_i32_0 : i32, i32, i32
  }
  func.func @transform_6(%arg0: i32, %arg1: i32, %arg2: i32) -> (i32, i32, i32, i32) {
    %c0_i32 = arith.constant 0 : i32
    %c0_i32_0 = arith.constant 0 : i32
    return %arg2, %arg0, %arg1, %c0_i32 : i32, i32, i32, i32
  }
  func.func @transform_7(%arg0: i32, %arg1: i32, %arg2: i32) -> (i32, i32, i32, i32) {
    %c0_i32 = arith.constant 0 : i32
    %c0_i32_0 = arith.constant 0 : i32
    return %arg2, %arg0, %arg1, %c0_i32 : i32, i32, i32, i32
  }
}

module attributes {stable_mosaic.version = 11 : i64} {
  func.func @decoder_stack_kernel(%arg0: i32, %arg1: i32, %arg2: memref<1x16x32xf32, #tpu.memory_space<vmem>>, %arg3: memref<1x16x32xf32, #tpu.memory_space<vmem>>, %arg4: memref<1x2x16x32xbf16, #tpu.memory_space<vmem>>, %arg5: memref<1x2x16x32xbf16, #tpu.memory_space<vmem>>, %arg6: memref<1x32x64xbf16, #tpu.memory_space<vmem>>, %arg7: memref<1x1x64xf32, #tpu.memory_space<vmem>>, %arg8: memref<1x32x32xbf16, #tpu.memory_space<vmem>>, %arg9: memref<1x1x32xf32, #tpu.memory_space<vmem>>, %arg10: memref<1x32x32xbf16, #tpu.memory_space<vmem>>, %arg11: memref<1x1x32xf32, #tpu.memory_space<vmem>>, %arg12: memref<1x32x32xbf16, #tpu.memory_space<vmem>>, %arg13: memref<1x1x32xf32, #tpu.memory_space<vmem>>, %arg14: memref<1x32x32xbf16, #tpu.memory_space<vmem>>, %arg15: memref<1x1x32xf32, #tpu.memory_space<vmem>>, %arg16: memref<1x32x64xbf16, #tpu.memory_space<vmem>>, %arg17: memref<1x1x64xf32, #tpu.memory_space<vmem>>, %arg18: memref<1x64x32xbf16, #tpu.memory_space<vmem>>, %arg19: memref<1x1x32xf32, #tpu.memory_space<vmem>>, %arg20: memref<1x6x32xf32, #tpu.memory_space<vmem>>, %arg21: memref<1x1x16x32xf32, #tpu.memory_space<vmem>>, %arg22: memref<16x32xf32, #tpu.memory_space<vmem>>) attributes {dimension_semantics = [#tpu.dimension_semantics<parallel>, #tpu.dimension_semantics<arbitrary>], iteration_bounds = array<i64: 1, 2>, scalar_prefetch = 0 : i64, scratch_operands = 1 : i64, tpu.core_type = #tpu.core_type<tc>, window_params = [{transform_indices = @transform_0, window_bounds = array<i64: 1, 16, 32>}, {transform_indices = @transform_1, window_bounds = array<i64: 1, 16, 32>}, {transform_indices = @transform_2, window_bounds = array<i64: 1, 2, 16, 32>}, {transform_indices = @transform_3, window_bounds = array<i64: 1, 2, 16, 32>}, {transform_indices = @transform_4, window_bounds = array<i64: 1, 32, 64>}, {transform_indices = @transform_5, window_bounds = array<i64: 1, 1, 64>}, {transform_indices = @transform_6, window_bounds = array<i64: 1, 32, 32>}, {transform_indices = @transform_7, window_bounds = array<i64: 1, 1, 32>}, {transform_indices = @transform_8, window_bounds = array<i64: 1, 32, 32>}, {transform_indices = @transform_9, window_bounds = array<i64: 1, 1, 32>}, {transform_indices = @transform_10, window_bounds = array<i64: 1, 32, 32>}, {transform_indices = @transform_11, window_bounds = array<i64: 1, 1, 32>}, {transform_indices = @transform_12, window_bounds = array<i64: 1, 32, 32>}, {transform_indices = @transform_13, window_bounds = array<i64: 1, 1, 32>}, {transform_indices = @transform_14, window_bounds = array<i64: 1, 32, 64>}, {transform_indices = @transform_15, window_bounds = array<i64: 1, 1, 64>}, {transform_indices = @transform_16, window_bounds = array<i64: 1, 64, 32>}, {transform_indices = @transform_17, window_bounds = array<i64: 1, 1, 32>}, {transform_indices = @transform_18, window_bounds = array<i64: 1, 6, 32>}, {transform_indices = @transform_19, window_bounds = array<i64: 1, 1, 16, 32>}]} {
    %c0_i32 = arith.constant 0 : i32
    %0 = arith.cmpi eq, %arg1, %c0_i32 : i32
    %1 = arith.extui %0 : i1 to i32
    %c0_i32_0 = arith.constant 0 : i32
    %2 = arith.cmpi ne, %1, %c0_i32_0 : i32
    scf.if %2 {
      %c0_152 = arith.constant 0 : index
      %c0_153 = arith.constant 0 : index
      %c0_154 = arith.constant 0 : index
      %439 = vector.load %arg2[%c0_152, %c0_153, %c0_154] : memref<1x16x32xf32, #tpu.memory_space<vmem>>, vector<1x16x32xf32>
      %440 = vector.shape_cast %439 : vector<1x16x32xf32> to vector<16x32xf32>
      %c0_155 = arith.constant 0 : index
      %c0_156 = arith.constant 0 : index
      %441 = vector.load %arg22[%c0_155, %c0_156] : memref<16x32xf32, #tpu.memory_space<vmem>>, vector<16x32xf32>
      tpu.vector_store %arg22[%c0_155, %c0_156], %440 {strides = array<i32>} : memref<16x32xf32, #tpu.memory_space<vmem>>, vector<16x32xf32>,
    } else {
    }
    %c0 = arith.constant 0 : index
    %c0_1 = arith.constant 0 : index
    %3 = vector.load %arg22[%c0, %c0_1] : memref<16x32xf32, #tpu.memory_space<vmem>>, vector<16x32xf32>
    %c0_2 = arith.constant 0 : index
    %c0_3 = arith.constant 0 : index
    %c0_4 = arith.constant 0 : index
    %4 = vector.load %arg3[%c0_2, %c0_3, %c0_4] : memref<1x16x32xf32, #tpu.memory_space<vmem>>, vector<1x16x32xf32>
    %5 = vector.shape_cast %4 : vector<1x16x32xf32> to vector<16x32xf32>
    %c0_5 = arith.constant 0 : index
    %c0_6 = arith.constant 0 : index
    %c0_7 = arith.constant 0 : index
    %6 = vector.load %arg20[%c0_5, %c0_6, %c0_7] : memref<1x6x32xf32, #tpu.memory_space<vmem>>, vector<1x6x32xf32>
    %7 = vector.shape_cast %6 : vector<1x6x32xf32> to vector<6x32xf32>
    %8 = vector.extract_strided_slice %7 {offsets = [0, 0], sizes = [1, 32], strides = [1, 1]} : vector<6x32xf32> to vector<1x32xf32>
    %9 = vector.extract_strided_slice %7 {offsets = [1, 0], sizes = [1, 32], strides = [1, 1]} : vector<6x32xf32> to vector<1x32xf32>
    %10 = vector.extract_strided_slice %7 {offsets = [2, 0], sizes = [1, 32], strides = [1, 1]} : vector<6x32xf32> to vector<1x32xf32>
    %11 = vector.extract_strided_slice %7 {offsets = [3, 0], sizes = [1, 32], strides = [1, 1]} : vector<6x32xf32> to vector<1x32xf32>
    %12 = vector.extract_strided_slice %7 {offsets = [4, 0], sizes = [1, 32], strides = [1, 1]} : vector<6x32xf32> to vector<1x32xf32>
    %13 = vector.extract_strided_slice %7 {offsets = [5, 0], sizes = [1, 32], strides = [1, 1]} : vector<6x32xf32> to vector<1x32xf32>
    %14 = arith.addf %3, %5 : vector<16x32xf32>
    %15 = arith.truncf %14 : vector<16x32xf32> to vector<16x32xbf16>
    %c0_8 = arith.constant 0 : index
    %c0_9 = arith.constant 0 : index
    %c0_10 = arith.constant 0 : index
    %16 = vector.load %arg6[%c0_8, %c0_9, %c0_10] : memref<1x32x64xbf16, #tpu.memory_space<vmem>>, vector<1x32x64xbf16>
    %17 = vector.shape_cast %16 : vector<1x32x64xbf16> to vector<32x64xbf16>
    %cst = arith.constant dense<0.000000e+00> : vector<16x64xf32>
    %18 = tpu.matmul %15, %17, %cst {dimension_numbers = #tpu.dot_dimension_numbers<[1], [0], [0], [1], [0, 0, 1, 1], [], []>} : vector<16x32xbf16>, vector<32x64xbf16>, vector<16x64xf32> -> vector<16x64xf32>
    %c0_11 = arith.constant 0 : index
    %c0_12 = arith.constant 0 : index
    %c0_13 = arith.constant 0 : index
    %19 = vector.load %arg7[%c0_11, %c0_12, %c0_13] : memref<1x1x64xf32, #tpu.memory_space<vmem>>, vector<1x1x64xf32>
    %20 = vector.shape_cast %19 : vector<1x1x64xf32> to vector<1x64xf32>
    %21 = vector.broadcast %20 : vector<1x64xf32> to vector<16x64xf32>
    %22 = arith.addf %18, %21 : vector<16x64xf32>
    %23 = vector.extract_strided_slice %22 {offsets = [0, 0], sizes = [16, 32], strides = [1, 1]} : vector<16x64xf32> to vector<16x32xf32>
    %cst_14 = arith.constant 0.353553385 : f32
    %24 = vector.broadcast %cst_14 : f32 to vector<16x32xf32>
    %25 = arith.mulf %23, %24 : vector<16x32xf32>
    %26 = arith.truncf %25 : vector<16x32xf32> to vector<16x32xbf16>
    %27 = vector.extract_strided_slice %22 {offsets = [0, 32], sizes = [16, 32], strides = [1, 1]} : vector<16x64xf32> to vector<16x32xf32>
    %28 = arith.truncf %27 : vector<16x32xf32> to vector<16x32xbf16>
    %29 = arith.truncf %3 : vector<16x32xf32> to vector<16x32xbf16>
    %c0_15 = arith.constant 0 : index
    %c0_16 = arith.constant 0 : index
    %c0_17 = arith.constant 0 : index
    %30 = vector.load %arg8[%c0_15, %c0_16, %c0_17] : memref<1x32x32xbf16, #tpu.memory_space<vmem>>, vector<1x32x32xbf16>
    %31 = vector.shape_cast %30 : vector<1x32x32xbf16> to vector<32x32xbf16>
    %cst_18 = arith.constant dense<0.000000e+00> : vector<16x32xf32>
    %32 = tpu.matmul %29, %31, %cst_18 {dimension_numbers = #tpu.dot_dimension_numbers<[1], [0], [0], [1], [0, 0, 1, 1], [], []>} : vector<16x32xbf16>, vector<32x32xbf16>, vector<16x32xf32> -> vector<16x32xf32>
    %c0_19 = arith.constant 0 : index
    %c0_20 = arith.constant 0 : index
    %c0_21 = arith.constant 0 : index
    %33 = vector.load %arg9[%c0_19, %c0_20, %c0_21] : memref<1x1x32xf32, #tpu.memory_space<vmem>>, vector<1x1x32xf32>
    %34 = vector.shape_cast %33 : vector<1x1x32xf32> to vector<1x32xf32>
    %35 = vector.broadcast %34 : vector<1x32xf32> to vector<16x32xf32>
    %36 = arith.addf %32, %35 : vector<16x32xf32>
    %37 = arith.truncf %36 : vector<16x32xf32> to vector<16x32xbf16>
    %38 = vector.extract_strided_slice %26 {offsets = [0, 0], sizes = [8, 32], strides = [1, 1]} : vector<16x32xbf16> to vector<8x32xbf16>
    %39 = vector.extract_strided_slice %28 {offsets = [0, 0], sizes = [8, 32], strides = [1, 1]} : vector<16x32xbf16> to vector<8x32xbf16>
    %40 = vector.extract_strided_slice %37 {offsets = [0, 0], sizes = [8, 32], strides = [1, 1]} : vector<16x32xbf16> to vector<8x32xbf16>
    %41 = vector.extract_strided_slice %38 {offsets = [0, 0], sizes = [8, 8], strides = [1, 1]} : vector<8x32xbf16> to vector<8x8xbf16>
    %42 = vector.extract_strided_slice %39 {offsets = [0, 0], sizes = [8, 8], strides = [1, 1]} : vector<8x32xbf16> to vector<8x8xbf16>
    %cst_22 = arith.constant dense<0.000000e+00> : vector<8x8xf32>
    %43 = tpu.matmul %41, %42, %cst_22 {dimension_numbers = #tpu.dot_dimension_numbers<[1], [1], [0], [0], [0, 0, 1, 0], [], []>} : vector<8x8xbf16>, vector<8x8xbf16>, vector<8x8xf32> -> vector<8x8xf32>
    %cst_23 = arith.constant dense<0xFF800000> : vector<8xf32>
    %44 = vector.multi_reduction <maximumf>, %43, %cst_23 [1] : vector<8x8xf32> to vector<8xf32>
    %45 = vector.shape_cast %44 : vector<8xf32> to vector<8x1xf32>
    %46 = vector.broadcast %45 : vector<8x1xf32> to vector<8x8xf32>
    %47 = arith.subf %43, %46 : vector<8x8xf32>
    %48 = math.exp %47 : vector<8x8xf32>
    %cst_24 = arith.constant dense<0.000000e+00> : vector<8xf32>
    %49 = vector.multi_reduction <add>, %48, %cst_24 [1] : vector<8x8xf32> to vector<8xf32>
    %50 = vector.shape_cast %49 : vector<8xf32> to vector<8x1xf32>
    %51 = tpu.reciprocal %50 {approx = true} : vector<8x1xf32> -> vector<8x1xf32>
    %52 = vector.broadcast %51 : vector<8x1xf32> to vector<8x8xf32>
    %53 = arith.mulf %48, %52 : vector<8x8xf32>
    %54 = arith.truncf %53 : vector<8x8xf32> to vector<8x8xbf16>
    %55 = vector.extract_strided_slice %40 {offsets = [0, 0], sizes = [8, 8], strides = [1, 1]} : vector<8x32xbf16> to vector<8x8xbf16>
    %cst_25 = arith.constant dense<0.000000e+00> : vector<8x8xf32>
    %56 = tpu.matmul %54, %55, %cst_25 {dimension_numbers = #tpu.dot_dimension_numbers<[1], [0], [0], [1], [0, 0, 1, 1], [], []>} : vector<8x8xbf16>, vector<8x8xbf16>, vector<8x8xf32> -> vector<8x8xf32>
    %57 = vector.extract_strided_slice %38 {offsets = [0, 8], sizes = [8, 8], strides = [1, 1]} : vector<8x32xbf16> to vector<8x8xbf16>
    %58 = vector.extract_strided_slice %39 {offsets = [0, 8], sizes = [8, 8], strides = [1, 1]} : vector<8x32xbf16> to vector<8x8xbf16>
    %cst_26 = arith.constant dense<0.000000e+00> : vector<8x8xf32>
    %59 = tpu.matmul %57, %58, %cst_26 {dimension_numbers = #tpu.dot_dimension_numbers<[1], [1], [0], [0], [0, 0, 1, 0], [], []>} : vector<8x8xbf16>, vector<8x8xbf16>, vector<8x8xf32> -> vector<8x8xf32>
    %cst_27 = arith.constant dense<0xFF800000> : vector<8xf32>
    %60 = vector.multi_reduction <maximumf>, %59, %cst_27 [1] : vector<8x8xf32> to vector<8xf32>
    %61 = vector.shape_cast %60 : vector<8xf32> to vector<8x1xf32>
    %62 = vector.broadcast %61 : vector<8x1xf32> to vector<8x8xf32>
    %63 = arith.subf %59, %62 : vector<8x8xf32>
    %64 = math.exp %63 : vector<8x8xf32>
    %cst_28 = arith.constant dense<0.000000e+00> : vector<8xf32>
    %65 = vector.multi_reduction <add>, %64, %cst_28 [1] : vector<8x8xf32> to vector<8xf32>
    %66 = vector.shape_cast %65 : vector<8xf32> to vector<8x1xf32>
    %67 = tpu.reciprocal %66 {approx = true} : vector<8x1xf32> -> vector<8x1xf32>
    %68 = vector.broadcast %67 : vector<8x1xf32> to vector<8x8xf32>
    %69 = arith.mulf %64, %68 : vector<8x8xf32>
    %70 = arith.truncf %69 : vector<8x8xf32> to vector<8x8xbf16>
    %71 = vector.extract_strided_slice %40 {offsets = [0, 8], sizes = [8, 8], strides = [1, 1]} : vector<8x32xbf16> to vector<8x8xbf16>
    %cst_29 = arith.constant dense<0.000000e+00> : vector<8x8xf32>
    %72 = tpu.matmul %70, %71, %cst_29 {dimension_numbers = #tpu.dot_dimension_numbers<[1], [0], [0], [1], [0, 0, 1, 1], [], []>} : vector<8x8xbf16>, vector<8x8xbf16>, vector<8x8xf32> -> vector<8x8xf32>
    %73 = vector.extract_strided_slice %38 {offsets = [0, 16], sizes = [8, 8], strides = [1, 1]} : vector<8x32xbf16> to vector<8x8xbf16>
    %74 = vector.extract_strided_slice %39 {offsets = [0, 16], sizes = [8, 8], strides = [1, 1]} : vector<8x32xbf16> to vector<8x8xbf16>
    %cst_30 = arith.constant dense<0.000000e+00> : vector<8x8xf32>
    %75 = tpu.matmul %73, %74, %cst_30 {dimension_numbers = #tpu.dot_dimension_numbers<[1], [1], [0], [0], [0, 0, 1, 0], [], []>} : vector<8x8xbf16>, vector<8x8xbf16>, vector<8x8xf32> -> vector<8x8xf32>
    %cst_31 = arith.constant dense<0xFF800000> : vector<8xf32>
    %76 = vector.multi_reduction <maximumf>, %75, %cst_31 [1] : vector<8x8xf32> to vector<8xf32>
    %77 = vector.shape_cast %76 : vector<8xf32> to vector<8x1xf32>
    %78 = vector.broadcast %77 : vector<8x1xf32> to vector<8x8xf32>
    %79 = arith.subf %75, %78 : vector<8x8xf32>
    %80 = math.exp %79 : vector<8x8xf32>
    %cst_32 = arith.constant dense<0.000000e+00> : vector<8xf32>
    %81 = vector.multi_reduction <add>, %80, %cst_32 [1] : vector<8x8xf32> to vector<8xf32>
    %82 = vector.shape_cast %81 : vector<8xf32> to vector<8x1xf32>
    %83 = tpu.reciprocal %82 {approx = true} : vector<8x1xf32> -> vector<8x1xf32>
    %84 = vector.broadcast %83 : vector<8x1xf32> to vector<8x8xf32>
    %85 = arith.mulf %80, %84 : vector<8x8xf32>
    %86 = arith.truncf %85 : vector<8x8xf32> to vector<8x8xbf16>
    %87 = vector.extract_strided_slice %40 {offsets = [0, 16], sizes = [8, 8], strides = [1, 1]} : vector<8x32xbf16> to vector<8x8xbf16>
    %cst_33 = arith.constant dense<0.000000e+00> : vector<8x8xf32>
    %88 = tpu.matmul %86, %87, %cst_33 {dimension_numbers = #tpu.dot_dimension_numbers<[1], [0], [0], [1], [0, 0, 1, 1], [], []>} : vector<8x8xbf16>, vector<8x8xbf16>, vector<8x8xf32> -> vector<8x8xf32>
    %89 = vector.extract_strided_slice %38 {offsets = [0, 24], sizes = [8, 8], strides = [1, 1]} : vector<8x32xbf16> to vector<8x8xbf16>
    %90 = vector.extract_strided_slice %39 {offsets = [0, 24], sizes = [8, 8], strides = [1, 1]} : vector<8x32xbf16> to vector<8x8xbf16>
    %cst_34 = arith.constant dense<0.000000e+00> : vector<8x8xf32>
    %91 = tpu.matmul %89, %90, %cst_34 {dimension_numbers = #tpu.dot_dimension_numbers<[1], [1], [0], [0], [0, 0, 1, 0], [], []>} : vector<8x8xbf16>, vector<8x8xbf16>, vector<8x8xf32> -> vector<8x8xf32>
    %cst_35 = arith.constant dense<0xFF800000> : vector<8xf32>
    %92 = vector.multi_reduction <maximumf>, %91, %cst_35 [1] : vector<8x8xf32> to vector<8xf32>
    %93 = vector.shape_cast %92 : vector<8xf32> to vector<8x1xf32>
    %94 = vector.broadcast %93 : vector<8x1xf32> to vector<8x8xf32>
    %95 = arith.subf %91, %94 : vector<8x8xf32>
    %96 = math.exp %95 : vector<8x8xf32>
    %cst_36 = arith.constant dense<0.000000e+00> : vector<8xf32>
    %97 = vector.multi_reduction <add>, %96, %cst_36 [1] : vector<8x8xf32> to vector<8xf32>
    %98 = vector.shape_cast %97 : vector<8xf32> to vector<8x1xf32>
    %99 = tpu.reciprocal %98 {approx = true} : vector<8x1xf32> -> vector<8x1xf32>
    %100 = vector.broadcast %99 : vector<8x1xf32> to vector<8x8xf32>
    %101 = arith.mulf %96, %100 : vector<8x8xf32>
    %102 = arith.truncf %101 : vector<8x8xf32> to vector<8x8xbf16>
    %103 = vector.extract_strided_slice %40 {offsets = [0, 24], sizes = [8, 8], strides = [1, 1]} : vector<8x32xbf16> to vector<8x8xbf16>
    %cst_37 = arith.constant dense<0.000000e+00> : vector<8x8xf32>
    %104 = tpu.matmul %102, %103, %cst_37 {dimension_numbers = #tpu.dot_dimension_numbers<[1], [0], [0], [1], [0, 0, 1, 1], [], []>} : vector<8x8xbf16>, vector<8x8xbf16>, vector<8x8xf32> -> vector<8x8xf32>
    %105 = tpu.concatenate %56, %72, %88, %104 in 1 : vector<8x8xf32>, vector<8x8xf32>, vector<8x8xf32>, vector<8x8xf32> -> vector<8x32xf32>
    %106 = vector.extract_strided_slice %26 {offsets = [8, 0], sizes = [8, 32], strides = [1, 1]} : vector<16x32xbf16> to vector<8x32xbf16>
    %107 = vector.extract_strided_slice %28 {offsets = [8, 0], sizes = [8, 32], strides = [1, 1]} : vector<16x32xbf16> to vector<8x32xbf16>
    %108 = vector.extract_strided_slice %37 {offsets = [8, 0], sizes = [8, 32], strides = [1, 1]} : vector<16x32xbf16> to vector<8x32xbf16>
    %109 = vector.extract_strided_slice %106 {offsets = [0, 0], sizes = [8, 8], strides = [1, 1]} : vector<8x32xbf16> to vector<8x8xbf16>
    %110 = vector.extract_strided_slice %107 {offsets = [0, 0], sizes = [8, 8], strides = [1, 1]} : vector<8x32xbf16> to vector<8x8xbf16>
    %cst_38 = arith.constant dense<0.000000e+00> : vector<8x8xf32>
    %111 = tpu.matmul %109, %110, %cst_38 {dimension_numbers = #tpu.dot_dimension_numbers<[1], [1], [0], [0], [0, 0, 1, 0], [], []>} : vector<8x8xbf16>, vector<8x8xbf16>, vector<8x8xf32> -> vector<8x8xf32>
    %cst_39 = arith.constant dense<0xFF800000> : vector<8xf32>
    %112 = vector.multi_reduction <maximumf>, %111, %cst_39 [1] : vector<8x8xf32> to vector<8xf32>
    %113 = vector.shape_cast %112 : vector<8xf32> to vector<8x1xf32>
    %114 = vector.broadcast %113 : vector<8x1xf32> to vector<8x8xf32>
    %115 = arith.subf %111, %114 : vector<8x8xf32>
    %116 = math.exp %115 : vector<8x8xf32>
    %cst_40 = arith.constant dense<0.000000e+00> : vector<8xf32>
    %117 = vector.multi_reduction <add>, %116, %cst_40 [1] : vector<8x8xf32> to vector<8xf32>
    %118 = vector.shape_cast %117 : vector<8xf32> to vector<8x1xf32>
    %119 = tpu.reciprocal %118 {approx = true} : vector<8x1xf32> -> vector<8x1xf32>
    %120 = vector.broadcast %119 : vector<8x1xf32> to vector<8x8xf32>
    %121 = arith.mulf %116, %120 : vector<8x8xf32>
    %122 = arith.truncf %121 : vector<8x8xf32> to vector<8x8xbf16>
    %123 = vector.extract_strided_slice %108 {offsets = [0, 0], sizes = [8, 8], strides = [1, 1]} : vector<8x32xbf16> to vector<8x8xbf16>
    %cst_41 = arith.constant dense<0.000000e+00> : vector<8x8xf32>
    %124 = tpu.matmul %122, %123, %cst_41 {dimension_numbers = #tpu.dot_dimension_numbers<[1], [0], [0], [1], [0, 0, 1, 1], [], []>} : vector<8x8xbf16>, vector<8x8xbf16>, vector<8x8xf32> -> vector<8x8xf32>
    %125 = vector.extract_strided_slice %106 {offsets = [0, 8], sizes = [8, 8], strides = [1, 1]} : vector<8x32xbf16> to vector<8x8xbf16>
    %126 = vector.extract_strided_slice %107 {offsets = [0, 8], sizes = [8, 8], strides = [1, 1]} : vector<8x32xbf16> to vector<8x8xbf16>
    %cst_42 = arith.constant dense<0.000000e+00> : vector<8x8xf32>
    %127 = tpu.matmul %125, %126, %cst_42 {dimension_numbers = #tpu.dot_dimension_numbers<[1], [1], [0], [0], [0, 0, 1, 0], [], []>} : vector<8x8xbf16>, vector<8x8xbf16>, vector<8x8xf32> -> vector<8x8xf32>
    %cst_43 = arith.constant dense<0xFF800000> : vector<8xf32>
    %128 = vector.multi_reduction <maximumf>, %127, %cst_43 [1] : vector<8x8xf32> to vector<8xf32>
    %129 = vector.shape_cast %128 : vector<8xf32> to vector<8x1xf32>
    %130 = vector.broadcast %129 : vector<8x1xf32> to vector<8x8xf32>
    %131 = arith.subf %127, %130 : vector<8x8xf32>
    %132 = math.exp %131 : vector<8x8xf32>
    %cst_44 = arith.constant dense<0.000000e+00> : vector<8xf32>
    %133 = vector.multi_reduction <add>, %132, %cst_44 [1] : vector<8x8xf32> to vector<8xf32>
    %134 = vector.shape_cast %133 : vector<8xf32> to vector<8x1xf32>
    %135 = tpu.reciprocal %134 {approx = true} : vector<8x1xf32> -> vector<8x1xf32>
    %136 = vector.broadcast %135 : vector<8x1xf32> to vector<8x8xf32>
    %137 = arith.mulf %132, %136 : vector<8x8xf32>
    %138 = arith.truncf %137 : vector<8x8xf32> to vector<8x8xbf16>
    %139 = vector.extract_strided_slice %108 {offsets = [0, 8], sizes = [8, 8], strides = [1, 1]} : vector<8x32xbf16> to vector<8x8xbf16>
    %cst_45 = arith.constant dense<0.000000e+00> : vector<8x8xf32>
    %140 = tpu.matmul %138, %139, %cst_45 {dimension_numbers = #tpu.dot_dimension_numbers<[1], [0], [0], [1], [0, 0, 1, 1], [], []>} : vector<8x8xbf16>, vector<8x8xbf16>, vector<8x8xf32> -> vector<8x8xf32>
    %141 = vector.extract_strided_slice %106 {offsets = [0, 16], sizes = [8, 8], strides = [1, 1]} : vector<8x32xbf16> to vector<8x8xbf16>
    %142 = vector.extract_strided_slice %107 {offsets = [0, 16], sizes = [8, 8], strides = [1, 1]} : vector<8x32xbf16> to vector<8x8xbf16>
    %cst_46 = arith.constant dense<0.000000e+00> : vector<8x8xf32>
    %143 = tpu.matmul %141, %142, %cst_46 {dimension_numbers = #tpu.dot_dimension_numbers<[1], [1], [0], [0], [0, 0, 1, 0], [], []>} : vector<8x8xbf16>, vector<8x8xbf16>, vector<8x8xf32> -> vector<8x8xf32>
    %cst_47 = arith.constant dense<0xFF800000> : vector<8xf32>
    %144 = vector.multi_reduction <maximumf>, %143, %cst_47 [1] : vector<8x8xf32> to vector<8xf32>
    %145 = vector.shape_cast %144 : vector<8xf32> to vector<8x1xf32>
    %146 = vector.broadcast %145 : vector<8x1xf32> to vector<8x8xf32>
    %147 = arith.subf %143, %146 : vector<8x8xf32>
    %148 = math.exp %147 : vector<8x8xf32>
    %cst_48 = arith.constant dense<0.000000e+00> : vector<8xf32>
    %149 = vector.multi_reduction <add>, %148, %cst_48 [1] : vector<8x8xf32> to vector<8xf32>
    %150 = vector.shape_cast %149 : vector<8xf32> to vector<8x1xf32>
    %151 = tpu.reciprocal %150 {approx = true} : vector<8x1xf32> -> vector<8x1xf32>
    %152 = vector.broadcast %151 : vector<8x1xf32> to vector<8x8xf32>
    %153 = arith.mulf %148, %152 : vector<8x8xf32>
    %154 = arith.truncf %153 : vector<8x8xf32> to vector<8x8xbf16>
    %155 = vector.extract_strided_slice %108 {offsets = [0, 16], sizes = [8, 8], strides = [1, 1]} : vector<8x32xbf16> to vector<8x8xbf16>
    %cst_49 = arith.constant dense<0.000000e+00> : vector<8x8xf32>
    %156 = tpu.matmul %154, %155, %cst_49 {dimension_numbers = #tpu.dot_dimension_numbers<[1], [0], [0], [1], [0, 0, 1, 1], [], []>} : vector<8x8xbf16>, vector<8x8xbf16>, vector<8x8xf32> -> vector<8x8xf32>
    %157 = vector.extract_strided_slice %106 {offsets = [0, 24], sizes = [8, 8], strides = [1, 1]} : vector<8x32xbf16> to vector<8x8xbf16>
    %158 = vector.extract_strided_slice %107 {offsets = [0, 24], sizes = [8, 8], strides = [1, 1]} : vector<8x32xbf16> to vector<8x8xbf16>
    %cst_50 = arith.constant dense<0.000000e+00> : vector<8x8xf32>
    %159 = tpu.matmul %157, %158, %cst_50 {dimension_numbers = #tpu.dot_dimension_numbers<[1], [1], [0], [0], [0, 0, 1, 0], [], []>} : vector<8x8xbf16>, vector<8x8xbf16>, vector<8x8xf32> -> vector<8x8xf32>
    %cst_51 = arith.constant dense<0xFF800000> : vector<8xf32>
    %160 = vector.multi_reduction <maximumf>, %159, %cst_51 [1] : vector<8x8xf32> to vector<8xf32>
    %161 = vector.shape_cast %160 : vector<8xf32> to vector<8x1xf32>
    %162 = vector.broadcast %161 : vector<8x1xf32> to vector<8x8xf32>
    %163 = arith.subf %159, %162 : vector<8x8xf32>
    %164 = math.exp %163 : vector<8x8xf32>
    %cst_52 = arith.constant dense<0.000000e+00> : vector<8xf32>
    %165 = vector.multi_reduction <add>, %164, %cst_52 [1] : vector<8x8xf32> to vector<8xf32>
    %166 = vector.shape_cast %165 : vector<8xf32> to vector<8x1xf32>
    %167 = tpu.reciprocal %166 {approx = true} : vector<8x1xf32> -> vector<8x1xf32>
    %168 = vector.broadcast %167 : vector<8x1xf32> to vector<8x8xf32>
    %169 = arith.mulf %164, %168 : vector<8x8xf32>
    %170 = arith.truncf %169 : vector<8x8xf32> to vector<8x8xbf16>
    %171 = vector.extract_strided_slice %108 {offsets = [0, 24], sizes = [8, 8], strides = [1, 1]} : vector<8x32xbf16> to vector<8x8xbf16>
    %cst_53 = arith.constant dense<0.000000e+00> : vector<8x8xf32>
    %172 = tpu.matmul %170, %171, %cst_53 {dimension_numbers = #tpu.dot_dimension_numbers<[1], [0], [0], [1], [0, 0, 1, 1], [], []>} : vector<8x8xbf16>, vector<8x8xbf16>, vector<8x8xf32> -> vector<8x8xf32>
    %173 = tpu.concatenate %124, %140, %156, %172 in 1 : vector<8x8xf32>, vector<8x8xf32>, vector<8x8xf32>, vector<8x8xf32> -> vector<8x32xf32>
    %174 = tpu.concatenate %105, %173 in 0 : vector<8x32xf32>, vector<8x32xf32> -> vector<16x32xf32>
    %175 = arith.truncf %174 : vector<16x32xf32> to vector<16x32xbf16>
    %c0_54 = arith.constant 0 : index
    %c0_55 = arith.constant 0 : index
    %c0_56 = arith.constant 0 : index
    %176 = vector.load %arg10[%c0_54, %c0_55, %c0_56] : memref<1x32x32xbf16, #tpu.memory_space<vmem>>, vector<1x32x32xbf16>
    %177 = vector.shape_cast %176 : vector<1x32x32xbf16> to vector<32x32xbf16>
    %cst_57 = arith.constant dense<0.000000e+00> : vector<16x32xf32>
    %178 = tpu.matmul %175, %177, %cst_57 {dimension_numbers = #tpu.dot_dimension_numbers<[1], [0], [0], [1], [0, 0, 1, 1], [], []>} : vector<16x32xbf16>, vector<32x32xbf16>, vector<16x32xf32> -> vector<16x32xf32>
    %c0_58 = arith.constant 0 : index
    %c0_59 = arith.constant 0 : index
    %c0_60 = arith.constant 0 : index
    %179 = vector.load %arg11[%c0_58, %c0_59, %c0_60] : memref<1x1x32xf32, #tpu.memory_space<vmem>>, vector<1x1x32xf32>
    %180 = vector.shape_cast %179 : vector<1x1x32xf32> to vector<1x32xf32>
    %181 = vector.broadcast %180 : vector<1x32xf32> to vector<16x32xf32>
    %182 = arith.addf %178, %181 : vector<16x32xf32>
    %183 = arith.addf %3, %182 : vector<16x32xf32>
    %cst_61 = arith.constant dense<0.000000e+00> : vector<16xf32>
    %184 = vector.multi_reduction <add>, %183, %cst_61 [1] : vector<16x32xf32> to vector<16xf32>
    %185 = vector.shape_cast %184 : vector<16xf32> to vector<16x1xf32>
    %cst_62 = arith.constant 3.200000e+01 : f32
    %186 = vector.broadcast %cst_62 : f32 to vector<16x1xf32>
    %187 = arith.divf %185, %186 : vector<16x1xf32>
    %188 = vector.broadcast %187 : vector<16x1xf32> to vector<16x32xf32>
    %189 = arith.subf %183, %188 : vector<16x32xf32>
    %190 = arith.mulf %189, %189 : vector<16x32xf32>
    %cst_63 = arith.constant dense<0.000000e+00> : vector<16xf32>
    %191 = vector.multi_reduction <add>, %190, %cst_63 [1] : vector<16x32xf32> to vector<16xf32>
    %192 = vector.shape_cast %191 : vector<16xf32> to vector<16x1xf32>
    %cst_64 = arith.constant 3.200000e+01 : f32
    %193 = vector.broadcast %cst_64 : f32 to vector<16x1xf32>
    %194 = arith.divf %192, %193 : vector<16x1xf32>
    %195 = vector.broadcast %187 : vector<16x1xf32> to vector<16x32xf32>
    %196 = arith.subf %183, %195 : vector<16x32xf32>
    %cst_65 = arith.constant 9.99999974E-6 : f32
    %197 = vector.broadcast %cst_65 : f32 to vector<16x1xf32>
    %198 = arith.addf %194, %197 : vector<16x1xf32>
    %199 = math.rsqrt %198 : vector<16x1xf32>
    %200 = vector.broadcast %199 : vector<16x1xf32> to vector<16x32xf32>
    %201 = arith.mulf %196, %200 : vector<16x32xf32>
    %202 = vector.broadcast %8 : vector<1x32xf32> to vector<16x32xf32>
    %203 = arith.mulf %201, %202 : vector<16x32xf32>
    %204 = vector.broadcast %9 : vector<1x32xf32> to vector<16x32xf32>
    %205 = arith.addf %203, %204 : vector<16x32xf32>
    %206 = arith.addf %205, %5 : vector<16x32xf32>
    %207 = arith.truncf %206 : vector<16x32xf32> to vector<16x32xbf16>
    %c0_66 = arith.constant 0 : index
    %c0_67 = arith.constant 0 : index
    %c0_68 = arith.constant 0 : index
    %208 = vector.load %arg12[%c0_66, %c0_67, %c0_68] : memref<1x32x32xbf16, #tpu.memory_space<vmem>>, vector<1x32x32xbf16>
    %209 = vector.shape_cast %208 : vector<1x32x32xbf16> to vector<32x32xbf16>
    %cst_69 = arith.constant dense<0.000000e+00> : vector<16x32xf32>
    %210 = tpu.matmul %207, %209, %cst_69 {dimension_numbers = #tpu.dot_dimension_numbers<[1], [0], [0], [1], [0, 0, 1, 1], [], []>} : vector<16x32xbf16>, vector<32x32xbf16>, vector<16x32xf32> -> vector<16x32xf32>
    %c0_70 = arith.constant 0 : index
    %c0_71 = arith.constant 0 : index
    %c0_72 = arith.constant 0 : index
    %211 = vector.load %arg13[%c0_70, %c0_71, %c0_72] : memref<1x1x32xf32, #tpu.memory_space<vmem>>, vector<1x1x32xf32>
    %212 = vector.shape_cast %211 : vector<1x1x32xf32> to vector<1x32xf32>
    %213 = vector.broadcast %212 : vector<1x32xf32> to vector<16x32xf32>
    %214 = arith.addf %210, %213 : vector<16x32xf32>
    %cst_73 = arith.constant 0.353553385 : f32
    %215 = vector.broadcast %cst_73 : f32 to vector<16x32xf32>
    %216 = arith.mulf %214, %215 : vector<16x32xf32>
    %217 = arith.truncf %216 : vector<16x32xf32> to vector<16x32xbf16>
    %c0_74 = arith.constant 0 : index
    %c0_75 = arith.constant 0 : index
    %c0_76 = arith.constant 0 : index
    %c0_77 = arith.constant 0 : index
    %218 = vector.load %arg4[%c0_74, %c0_75, %c0_76, %c0_77] : memref<1x2x16x32xbf16, #tpu.memory_space<vmem>>, vector<1x2x16x32xbf16>
    %219 = vector.shape_cast %218 : vector<1x2x16x32xbf16> to vector<2x16x32xbf16>
    %c0_78 = arith.constant 0 : index
    %c0_79 = arith.constant 0 : index
    %c0_80 = arith.constant 0 : index
    %c0_81 = arith.constant 0 : index
    %220 = vector.load %arg5[%c0_78, %c0_79, %c0_80, %c0_81] : memref<1x2x16x32xbf16, #tpu.memory_space<vmem>>, vector<1x2x16x32xbf16>
    %221 = vector.shape_cast %220 : vector<1x2x16x32xbf16> to vector<2x16x32xbf16>
    %222 = vector.extract_strided_slice %217 {offsets = [0, 0], sizes = [8, 32], strides = [1, 1]} : vector<16x32xbf16> to vector<8x32xbf16>
    %223 = vector.extract_strided_slice %219 {offsets = [0, 0, 0], sizes = [1, 16, 32], strides = [1, 1, 1]} : vector<2x16x32xbf16> to vector<1x16x32xbf16>
    %224 = vector.shape_cast %223 : vector<1x16x32xbf16> to vector<16x32xbf16>
    %225 = vector.extract_strided_slice %221 {offsets = [0, 0, 0], sizes = [1, 16, 32], strides = [1, 1, 1]} : vector<2x16x32xbf16> to vector<1x16x32xbf16>
    %226 = vector.shape_cast %225 : vector<1x16x32xbf16> to vector<16x32xbf16>
    %227 = vector.extract_strided_slice %222 {offsets = [0, 0], sizes = [8, 8], strides = [1, 1]} : vector<8x32xbf16> to vector<8x8xbf16>
    %228 = vector.extract_strided_slice %224 {offsets = [0, 0], sizes = [16, 8], strides = [1, 1]} : vector<16x32xbf16> to vector<16x8xbf16>
    %cst_82 = arith.constant dense<0.000000e+00> : vector<8x16xf32>
    %229 = tpu.matmul %227, %228, %cst_82 {dimension_numbers = #tpu.dot_dimension_numbers<[1], [1], [0], [0], [0, 0, 1, 0], [], []>} : vector<8x8xbf16>, vector<16x8xbf16>, vector<8x16xf32> -> vector<8x16xf32>
    %cst_83 = arith.constant dense<0xFF800000> : vector<8xf32>
    %230 = vector.multi_reduction <maximumf>, %229, %cst_83 [1] : vector<8x16xf32> to vector<8xf32>
    %231 = vector.shape_cast %230 : vector<8xf32> to vector<8x1xf32>
    %232 = vector.broadcast %231 : vector<8x1xf32> to vector<8x16xf32>
    %233 = arith.subf %229, %232 : vector<8x16xf32>
    %234 = math.exp %233 : vector<8x16xf32>
    %cst_84 = arith.constant dense<0.000000e+00> : vector<8xf32>
    %235 = vector.multi_reduction <add>, %234, %cst_84 [1] : vector<8x16xf32> to vector<8xf32>
    %236 = vector.shape_cast %235 : vector<8xf32> to vector<8x1xf32>
    %237 = tpu.reciprocal %236 {approx = true} : vector<8x1xf32> -> vector<8x1xf32>
    %238 = vector.broadcast %237 : vector<8x1xf32> to vector<8x16xf32>
    %239 = arith.mulf %234, %238 : vector<8x16xf32>
    %240 = arith.truncf %239 : vector<8x16xf32> to vector<8x16xbf16>
    %241 = vector.extract_strided_slice %226 {offsets = [0, 0], sizes = [16, 8], strides = [1, 1]} : vector<16x32xbf16> to vector<16x8xbf16>
    %cst_85 = arith.constant dense<0.000000e+00> : vector<8x8xf32>
    %242 = tpu.matmul %240, %241, %cst_85 {dimension_numbers = #tpu.dot_dimension_numbers<[1], [0], [0], [1], [0, 0, 1, 1], [], []>} : vector<8x16xbf16>, vector<16x8xbf16>, vector<8x8xf32> -> vector<8x8xf32>
    %243 = vector.extract_strided_slice %222 {offsets = [0, 8], sizes = [8, 8], strides = [1, 1]} : vector<8x32xbf16> to vector<8x8xbf16>
    %244 = vector.extract_strided_slice %224 {offsets = [0, 8], sizes = [16, 8], strides = [1, 1]} : vector<16x32xbf16> to vector<16x8xbf16>
    %cst_86 = arith.constant dense<0.000000e+00> : vector<8x16xf32>
    %245 = tpu.matmul %243, %244, %cst_86 {dimension_numbers = #tpu.dot_dimension_numbers<[1], [1], [0], [0], [0, 0, 1, 0], [], []>} : vector<8x8xbf16>, vector<16x8xbf16>, vector<8x16xf32> -> vector<8x16xf32>
    %cst_87 = arith.constant dense<0xFF800000> : vector<8xf32>
    %246 = vector.multi_reduction <maximumf>, %245, %cst_87 [1] : vector<8x16xf32> to vector<8xf32>
    %247 = vector.shape_cast %246 : vector<8xf32> to vector<8x1xf32>
    %248 = vector.broadcast %247 : vector<8x1xf32> to vector<8x16xf32>
    %249 = arith.subf %245, %248 : vector<8x16xf32>
    %250 = math.exp %249 : vector<8x16xf32>
    %cst_88 = arith.constant dense<0.000000e+00> : vector<8xf32>
    %251 = vector.multi_reduction <add>, %250, %cst_88 [1] : vector<8x16xf32> to vector<8xf32>
    %252 = vector.shape_cast %251 : vector<8xf32> to vector<8x1xf32>
    %253 = tpu.reciprocal %252 {approx = true} : vector<8x1xf32> -> vector<8x1xf32>
    %254 = vector.broadcast %253 : vector<8x1xf32> to vector<8x16xf32>
    %255 = arith.mulf %250, %254 : vector<8x16xf32>
    %256 = arith.truncf %255 : vector<8x16xf32> to vector<8x16xbf16>
    %257 = vector.extract_strided_slice %226 {offsets = [0, 8], sizes = [16, 8], strides = [1, 1]} : vector<16x32xbf16> to vector<16x8xbf16>
    %cst_89 = arith.constant dense<0.000000e+00> : vector<8x8xf32>
    %258 = tpu.matmul %256, %257, %cst_89 {dimension_numbers = #tpu.dot_dimension_numbers<[1], [0], [0], [1], [0, 0, 1, 1], [], []>} : vector<8x16xbf16>, vector<16x8xbf16>, vector<8x8xf32> -> vector<8x8xf32>
    %259 = vector.extract_strided_slice %222 {offsets = [0, 16], sizes = [8, 8], strides = [1, 1]} : vector<8x32xbf16> to vector<8x8xbf16>
    %260 = vector.extract_strided_slice %224 {offsets = [0, 16], sizes = [16, 8], strides = [1, 1]} : vector<16x32xbf16> to vector<16x8xbf16>
    %cst_90 = arith.constant dense<0.000000e+00> : vector<8x16xf32>
    %261 = tpu.matmul %259, %260, %cst_90 {dimension_numbers = #tpu.dot_dimension_numbers<[1], [1], [0], [0], [0, 0, 1, 0], [], []>} : vector<8x8xbf16>, vector<16x8xbf16>, vector<8x16xf32> -> vector<8x16xf32>
    %cst_91 = arith.constant dense<0xFF800000> : vector<8xf32>
    %262 = vector.multi_reduction <maximumf>, %261, %cst_91 [1] : vector<8x16xf32> to vector<8xf32>
    %263 = vector.shape_cast %262 : vector<8xf32> to vector<8x1xf32>
    %264 = vector.broadcast %263 : vector<8x1xf32> to vector<8x16xf32>
    %265 = arith.subf %261, %264 : vector<8x16xf32>
    %266 = math.exp %265 : vector<8x16xf32>
    %cst_92 = arith.constant dense<0.000000e+00> : vector<8xf32>
    %267 = vector.multi_reduction <add>, %266, %cst_92 [1] : vector<8x16xf32> to vector<8xf32>
    %268 = vector.shape_cast %267 : vector<8xf32> to vector<8x1xf32>
    %269 = tpu.reciprocal %268 {approx = true} : vector<8x1xf32> -> vector<8x1xf32>
    %270 = vector.broadcast %269 : vector<8x1xf32> to vector<8x16xf32>
    %271 = arith.mulf %266, %270 : vector<8x16xf32>
    %272 = arith.truncf %271 : vector<8x16xf32> to vector<8x16xbf16>
    %273 = vector.extract_strided_slice %226 {offsets = [0, 16], sizes = [16, 8], strides = [1, 1]} : vector<16x32xbf16> to vector<16x8xbf16>
    %cst_93 = arith.constant dense<0.000000e+00> : vector<8x8xf32>
    %274 = tpu.matmul %272, %273, %cst_93 {dimension_numbers = #tpu.dot_dimension_numbers<[1], [0], [0], [1], [0, 0, 1, 1], [], []>} : vector<8x16xbf16>, vector<16x8xbf16>, vector<8x8xf32> -> vector<8x8xf32>
    %275 = vector.extract_strided_slice %222 {offsets = [0, 24], sizes = [8, 8], strides = [1, 1]} : vector<8x32xbf16> to vector<8x8xbf16>
    %276 = vector.extract_strided_slice %224 {offsets = [0, 24], sizes = [16, 8], strides = [1, 1]} : vector<16x32xbf16> to vector<16x8xbf16>
    %cst_94 = arith.constant dense<0.000000e+00> : vector<8x16xf32>
    %277 = tpu.matmul %275, %276, %cst_94 {dimension_numbers = #tpu.dot_dimension_numbers<[1], [1], [0], [0], [0, 0, 1, 0], [], []>} : vector<8x8xbf16>, vector<16x8xbf16>, vector<8x16xf32> -> vector<8x16xf32>
    %cst_95 = arith.constant dense<0xFF800000> : vector<8xf32>
    %278 = vector.multi_reduction <maximumf>, %277, %cst_95 [1] : vector<8x16xf32> to vector<8xf32>
    %279 = vector.shape_cast %278 : vector<8xf32> to vector<8x1xf32>
    %280 = vector.broadcast %279 : vector<8x1xf32> to vector<8x16xf32>
    %281 = arith.subf %277, %280 : vector<8x16xf32>
    %282 = math.exp %281 : vector<8x16xf32>
    %cst_96 = arith.constant dense<0.000000e+00> : vector<8xf32>
    %283 = vector.multi_reduction <add>, %282, %cst_96 [1] : vector<8x16xf32> to vector<8xf32>
    %284 = vector.shape_cast %283 : vector<8xf32> to vector<8x1xf32>
    %285 = tpu.reciprocal %284 {approx = true} : vector<8x1xf32> -> vector<8x1xf32>
    %286 = vector.broadcast %285 : vector<8x1xf32> to vector<8x16xf32>
    %287 = arith.mulf %282, %286 : vector<8x16xf32>
    %288 = arith.truncf %287 : vector<8x16xf32> to vector<8x16xbf16>
    %289 = vector.extract_strided_slice %226 {offsets = [0, 24], sizes = [16, 8], strides = [1, 1]} : vector<16x32xbf16> to vector<16x8xbf16>
    %cst_97 = arith.constant dense<0.000000e+00> : vector<8x8xf32>
    %290 = tpu.matmul %288, %289, %cst_97 {dimension_numbers = #tpu.dot_dimension_numbers<[1], [0], [0], [1], [0, 0, 1, 1], [], []>} : vector<8x16xbf16>, vector<16x8xbf16>, vector<8x8xf32> -> vector<8x8xf32>
    %291 = tpu.concatenate %242, %258, %274, %290 in 1 : vector<8x8xf32>, vector<8x8xf32>, vector<8x8xf32>, vector<8x8xf32> -> vector<8x32xf32>
    %292 = vector.extract_strided_slice %217 {offsets = [8, 0], sizes = [8, 32], strides = [1, 1]} : vector<16x32xbf16> to vector<8x32xbf16>
    %293 = vector.extract_strided_slice %219 {offsets = [1, 0, 0], sizes = [1, 16, 32], strides = [1, 1, 1]} : vector<2x16x32xbf16> to vector<1x16x32xbf16>
    %294 = vector.shape_cast %293 : vector<1x16x32xbf16> to vector<16x32xbf16>
    %295 = vector.extract_strided_slice %221 {offsets = [1, 0, 0], sizes = [1, 16, 32], strides = [1, 1, 1]} : vector<2x16x32xbf16> to vector<1x16x32xbf16>
    %296 = vector.shape_cast %295 : vector<1x16x32xbf16> to vector<16x32xbf16>
    %297 = vector.extract_strided_slice %292 {offsets = [0, 0], sizes = [8, 8], strides = [1, 1]} : vector<8x32xbf16> to vector<8x8xbf16>
    %298 = vector.extract_strided_slice %294 {offsets = [0, 0], sizes = [16, 8], strides = [1, 1]} : vector<16x32xbf16> to vector<16x8xbf16>
    %cst_98 = arith.constant dense<0.000000e+00> : vector<8x16xf32>
    %299 = tpu.matmul %297, %298, %cst_98 {dimension_numbers = #tpu.dot_dimension_numbers<[1], [1], [0], [0], [0, 0, 1, 0], [], []>} : vector<8x8xbf16>, vector<16x8xbf16>, vector<8x16xf32> -> vector<8x16xf32>
    %cst_99 = arith.constant dense<0xFF800000> : vector<8xf32>
    %300 = vector.multi_reduction <maximumf>, %299, %cst_99 [1] : vector<8x16xf32> to vector<8xf32>
    %301 = vector.shape_cast %300 : vector<8xf32> to vector<8x1xf32>
    %302 = vector.broadcast %301 : vector<8x1xf32> to vector<8x16xf32>
    %303 = arith.subf %299, %302 : vector<8x16xf32>
    %304 = math.exp %303 : vector<8x16xf32>
    %cst_100 = arith.constant dense<0.000000e+00> : vector<8xf32>
    %305 = vector.multi_reduction <add>, %304, %cst_100 [1] : vector<8x16xf32> to vector<8xf32>
    %306 = vector.shape_cast %305 : vector<8xf32> to vector<8x1xf32>
    %307 = tpu.reciprocal %306 {approx = true} : vector<8x1xf32> -> vector<8x1xf32>
    %308 = vector.broadcast %307 : vector<8x1xf32> to vector<8x16xf32>
    %309 = arith.mulf %304, %308 : vector<8x16xf32>
    %310 = arith.truncf %309 : vector<8x16xf32> to vector<8x16xbf16>
    %311 = vector.extract_strided_slice %296 {offsets = [0, 0], sizes = [16, 8], strides = [1, 1]} : vector<16x32xbf16> to vector<16x8xbf16>
    %cst_101 = arith.constant dense<0.000000e+00> : vector<8x8xf32>
    %312 = tpu.matmul %310, %311, %cst_101 {dimension_numbers = #tpu.dot_dimension_numbers<[1], [0], [0], [1], [0, 0, 1, 1], [], []>} : vector<8x16xbf16>, vector<16x8xbf16>, vector<8x8xf32> -> vector<8x8xf32>
    %313 = vector.extract_strided_slice %292 {offsets = [0, 8], sizes = [8, 8], strides = [1, 1]} : vector<8x32xbf16> to vector<8x8xbf16>
    %314 = vector.extract_strided_slice %294 {offsets = [0, 8], sizes = [16, 8], strides = [1, 1]} : vector<16x32xbf16> to vector<16x8xbf16>
    %cst_102 = arith.constant dense<0.000000e+00> : vector<8x16xf32>
    %315 = tpu.matmul %313, %314, %cst_102 {dimension_numbers = #tpu.dot_dimension_numbers<[1], [1], [0], [0], [0, 0, 1, 0], [], []>} : vector<8x8xbf16>, vector<16x8xbf16>, vector<8x16xf32> -> vector<8x16xf32>
    %cst_103 = arith.constant dense<0xFF800000> : vector<8xf32>
    %316 = vector.multi_reduction <maximumf>, %315, %cst_103 [1] : vector<8x16xf32> to vector<8xf32>
    %317 = vector.shape_cast %316 : vector<8xf32> to vector<8x1xf32>
    %318 = vector.broadcast %317 : vector<8x1xf32> to vector<8x16xf32>
    %319 = arith.subf %315, %318 : vector<8x16xf32>
    %320 = math.exp %319 : vector<8x16xf32>
    %cst_104 = arith.constant dense<0.000000e+00> : vector<8xf32>
    %321 = vector.multi_reduction <add>, %320, %cst_104 [1] : vector<8x16xf32> to vector<8xf32>
    %322 = vector.shape_cast %321 : vector<8xf32> to vector<8x1xf32>
    %323 = tpu.reciprocal %322 {approx = true} : vector<8x1xf32> -> vector<8x1xf32>
    %324 = vector.broadcast %323 : vector<8x1xf32> to vector<8x16xf32>
    %325 = arith.mulf %320, %324 : vector<8x16xf32>
    %326 = arith.truncf %325 : vector<8x16xf32> to vector<8x16xbf16>
    %327 = vector.extract_strided_slice %296 {offsets = [0, 8], sizes = [16, 8], strides = [1, 1]} : vector<16x32xbf16> to vector<16x8xbf16>
    %cst_105 = arith.constant dense<0.000000e+00> : vector<8x8xf32>
    %328 = tpu.matmul %326, %327, %cst_105 {dimension_numbers = #tpu.dot_dimension_numbers<[1], [0], [0], [1], [0, 0, 1, 1], [], []>} : vector<8x16xbf16>, vector<16x8xbf16>, vector<8x8xf32> -> vector<8x8xf32>
    %329 = vector.extract_strided_slice %292 {offsets = [0, 16], sizes = [8, 8], strides = [1, 1]} : vector<8x32xbf16> to vector<8x8xbf16>
    %330 = vector.extract_strided_slice %294 {offsets = [0, 16], sizes = [16, 8], strides = [1, 1]} : vector<16x32xbf16> to vector<16x8xbf16>
    %cst_106 = arith.constant dense<0.000000e+00> : vector<8x16xf32>
    %331 = tpu.matmul %329, %330, %cst_106 {dimension_numbers = #tpu.dot_dimension_numbers<[1], [1], [0], [0], [0, 0, 1, 0], [], []>} : vector<8x8xbf16>, vector<16x8xbf16>, vector<8x16xf32> -> vector<8x16xf32>
    %cst_107 = arith.constant dense<0xFF800000> : vector<8xf32>
    %332 = vector.multi_reduction <maximumf>, %331, %cst_107 [1] : vector<8x16xf32> to vector<8xf32>
    %333 = vector.shape_cast %332 : vector<8xf32> to vector<8x1xf32>
    %334 = vector.broadcast %333 : vector<8x1xf32> to vector<8x16xf32>
    %335 = arith.subf %331, %334 : vector<8x16xf32>
    %336 = math.exp %335 : vector<8x16xf32>
    %cst_108 = arith.constant dense<0.000000e+00> : vector<8xf32>
    %337 = vector.multi_reduction <add>, %336, %cst_108 [1] : vector<8x16xf32> to vector<8xf32>
    %338 = vector.shape_cast %337 : vector<8xf32> to vector<8x1xf32>
    %339 = tpu.reciprocal %338 {approx = true} : vector<8x1xf32> -> vector<8x1xf32>
    %340 = vector.broadcast %339 : vector<8x1xf32> to vector<8x16xf32>
    %341 = arith.mulf %336, %340 : vector<8x16xf32>
    %342 = arith.truncf %341 : vector<8x16xf32> to vector<8x16xbf16>
    %343 = vector.extract_strided_slice %296 {offsets = [0, 16], sizes = [16, 8], strides = [1, 1]} : vector<16x32xbf16> to vector<16x8xbf16>
    %cst_109 = arith.constant dense<0.000000e+00> : vector<8x8xf32>
    %344 = tpu.matmul %342, %343, %cst_109 {dimension_numbers = #tpu.dot_dimension_numbers<[1], [0], [0], [1], [0, 0, 1, 1], [], []>} : vector<8x16xbf16>, vector<16x8xbf16>, vector<8x8xf32> -> vector<8x8xf32>
    %345 = vector.extract_strided_slice %292 {offsets = [0, 24], sizes = [8, 8], strides = [1, 1]} : vector<8x32xbf16> to vector<8x8xbf16>
    %346 = vector.extract_strided_slice %294 {offsets = [0, 24], sizes = [16, 8], strides = [1, 1]} : vector<16x32xbf16> to vector<16x8xbf16>
    %cst_110 = arith.constant dense<0.000000e+00> : vector<8x16xf32>
    %347 = tpu.matmul %345, %346, %cst_110 {dimension_numbers = #tpu.dot_dimension_numbers<[1], [1], [0], [0], [0, 0, 1, 0], [], []>} : vector<8x8xbf16>, vector<16x8xbf16>, vector<8x16xf32> -> vector<8x16xf32>
    %cst_111 = arith.constant dense<0xFF800000> : vector<8xf32>
    %348 = vector.multi_reduction <maximumf>, %347, %cst_111 [1] : vector<8x16xf32> to vector<8xf32>
    %349 = vector.shape_cast %348 : vector<8xf32> to vector<8x1xf32>
    %350 = vector.broadcast %349 : vector<8x1xf32> to vector<8x16xf32>
    %351 = arith.subf %347, %350 : vector<8x16xf32>
    %352 = math.exp %351 : vector<8x16xf32>
    %cst_112 = arith.constant dense<0.000000e+00> : vector<8xf32>
    %353 = vector.multi_reduction <add>, %352, %cst_112 [1] : vector<8x16xf32> to vector<8xf32>
    %354 = vector.shape_cast %353 : vector<8xf32> to vector<8x1xf32>
    %355 = tpu.reciprocal %354 {approx = true} : vector<8x1xf32> -> vector<8x1xf32>
    %356 = vector.broadcast %355 : vector<8x1xf32> to vector<8x16xf32>
    %357 = arith.mulf %352, %356 : vector<8x16xf32>
    %358 = arith.truncf %357 : vector<8x16xf32> to vector<8x16xbf16>
    %359 = vector.extract_strided_slice %296 {offsets = [0, 24], sizes = [16, 8], strides = [1, 1]} : vector<16x32xbf16> to vector<16x8xbf16>
    %cst_113 = arith.constant dense<0.000000e+00> : vector<8x8xf32>
    %360 = tpu.matmul %358, %359, %cst_113 {dimension_numbers = #tpu.dot_dimension_numbers<[1], [0], [0], [1], [0, 0, 1, 1], [], []>} : vector<8x16xbf16>, vector<16x8xbf16>, vector<8x8xf32> -> vector<8x8xf32>
    %361 = tpu.concatenate %312, %328, %344, %360 in 1 : vector<8x8xf32>, vector<8x8xf32>, vector<8x8xf32>, vector<8x8xf32> -> vector<8x32xf32>
    %362 = tpu.concatenate %291, %361 in 0 : vector<8x32xf32>, vector<8x32xf32> -> vector<16x32xf32>
    %363 = arith.truncf %362 : vector<16x32xf32> to vector<16x32xbf16>
    %c0_114 = arith.constant 0 : index
    %c0_115 = arith.constant 0 : index
    %c0_116 = arith.constant 0 : index
    %364 = vector.load %arg14[%c0_114, %c0_115, %c0_116] : memref<1x32x32xbf16, #tpu.memory_space<vmem>>, vector<1x32x32xbf16>
    %365 = vector.shape_cast %364 : vector<1x32x32xbf16> to vector<32x32xbf16>
    %cst_117 = arith.constant dense<0.000000e+00> : vector<16x32xf32>
    %366 = tpu.matmul %363, %365, %cst_117 {dimension_numbers = #tpu.dot_dimension_numbers<[1], [0], [0], [1], [0, 0, 1, 1], [], []>} : vector<16x32xbf16>, vector<32x32xbf16>, vector<16x32xf32> -> vector<16x32xf32>
    %c0_118 = arith.constant 0 : index
    %c0_119 = arith.constant 0 : index
    %c0_120 = arith.constant 0 : index
    %367 = vector.load %arg15[%c0_118, %c0_119, %c0_120] : memref<1x1x32xf32, #tpu.memory_space<vmem>>, vector<1x1x32xf32>
    %368 = vector.shape_cast %367 : vector<1x1x32xf32> to vector<1x32xf32>
    %369 = vector.broadcast %368 : vector<1x32xf32> to vector<16x32xf32>
    %370 = arith.addf %366, %369 : vector<16x32xf32>
    %371 = arith.addf %205, %370 : vector<16x32xf32>
    %cst_121 = arith.constant dense<0.000000e+00> : vector<16xf32>
    %372 = vector.multi_reduction <add>, %371, %cst_121 [1] : vector<16x32xf32> to vector<16xf32>
    %373 = vector.shape_cast %372 : vector<16xf32> to vector<16x1xf32>
    %cst_122 = arith.constant 3.200000e+01 : f32
    %374 = vector.broadcast %cst_122 : f32 to vector<16x1xf32>
    %375 = arith.divf %373, %374 : vector<16x1xf32>
    %376 = vector.broadcast %375 : vector<16x1xf32> to vector<16x32xf32>
    %377 = arith.subf %371, %376 : vector<16x32xf32>
    %378 = arith.mulf %377, %377 : vector<16x32xf32>
    %cst_123 = arith.constant dense<0.000000e+00> : vector<16xf32>
    %379 = vector.multi_reduction <add>, %378, %cst_123 [1] : vector<16x32xf32> to vector<16xf32>
    %380 = vector.shape_cast %379 : vector<16xf32> to vector<16x1xf32>
    %cst_124 = arith.constant 3.200000e+01 : f32
    %381 = vector.broadcast %cst_124 : f32 to vector<16x1xf32>
    %382 = arith.divf %380, %381 : vector<16x1xf32>
    %383 = vector.broadcast %375 : vector<16x1xf32> to vector<16x32xf32>
    %384 = arith.subf %371, %383 : vector<16x32xf32>
    %cst_125 = arith.constant 9.99999974E-6 : f32
    %385 = vector.broadcast %cst_125 : f32 to vector<16x1xf32>
    %386 = arith.addf %382, %385 : vector<16x1xf32>
    %387 = math.rsqrt %386 : vector<16x1xf32>
    %388 = vector.broadcast %387 : vector<16x1xf32> to vector<16x32xf32>
    %389 = arith.mulf %384, %388 : vector<16x32xf32>
    %390 = vector.broadcast %10 : vector<1x32xf32> to vector<16x32xf32>
    %391 = arith.mulf %389, %390 : vector<16x32xf32>
    %392 = vector.broadcast %11 : vector<1x32xf32> to vector<16x32xf32>
    %393 = arith.addf %391, %392 : vector<16x32xf32>
    %394 = arith.truncf %393 : vector<16x32xf32> to vector<16x32xbf16>
    %c0_126 = arith.constant 0 : index
    %c0_127 = arith.constant 0 : index
    %c0_128 = arith.constant 0 : index
    %395 = vector.load %arg16[%c0_126, %c0_127, %c0_128] : memref<1x32x64xbf16, #tpu.memory_space<vmem>>, vector<1x32x64xbf16>
    %396 = vector.shape_cast %395 : vector<1x32x64xbf16> to vector<32x64xbf16>
    %cst_129 = arith.constant dense<0.000000e+00> : vector<16x64xf32>
    %397 = tpu.matmul %394, %396, %cst_129 {dimension_numbers = #tpu.dot_dimension_numbers<[1], [0], [0], [1], [0, 0, 1, 1], [], []>} : vector<16x32xbf16>, vector<32x64xbf16>, vector<16x64xf32> -> vector<16x64xf32>
    %c0_130 = arith.constant 0 : index
    %c0_131 = arith.constant 0 : index
    %c0_132 = arith.constant 0 : index
    %398 = vector.load %arg17[%c0_130, %c0_131, %c0_132] : memref<1x1x64xf32, #tpu.memory_space<vmem>>, vector<1x1x64xf32>
    %399 = vector.shape_cast %398 : vector<1x1x64xf32> to vector<1x64xf32>
    %400 = vector.broadcast %399 : vector<1x64xf32> to vector<16x64xf32>
    %401 = arith.addf %397, %400 : vector<16x64xf32>
    %cst_133 = arith.constant 0.000000e+00 : f32
    %402 = vector.broadcast %cst_133 : f32 to vector<16x64xf32>
    %403 = arith.maximumf %401, %402 : vector<16x64xf32>
    %404 = arith.truncf %403 : vector<16x64xf32> to vector<16x64xbf16>
    %c0_134 = arith.constant 0 : index
    %c0_135 = arith.constant 0 : index
    %c0_136 = arith.constant 0 : index
    %405 = vector.load %arg18[%c0_134, %c0_135, %c0_136] : memref<1x64x32xbf16, #tpu.memory_space<vmem>>, vector<1x64x32xbf16>
    %406 = vector.shape_cast %405 : vector<1x64x32xbf16> to vector<64x32xbf16>
    %cst_137 = arith.constant dense<0.000000e+00> : vector<16x32xf32>
    %407 = tpu.matmul %404, %406, %cst_137 {dimension_numbers = #tpu.dot_dimension_numbers<[1], [0], [0], [1], [0, 0, 1, 1], [], []>} : vector<16x64xbf16>, vector<64x32xbf16>, vector<16x32xf32> -> vector<16x32xf32>
    %c0_138 = arith.constant 0 : index
    %c0_139 = arith.constant 0 : index
    %c0_140 = arith.constant 0 : index
    %408 = vector.load %arg19[%c0_138, %c0_139, %c0_140] : memref<1x1x32xf32, #tpu.memory_space<vmem>>, vector<1x1x32xf32>
    %409 = vector.shape_cast %408 : vector<1x1x32xf32> to vector<1x32xf32>
    %410 = vector.broadcast %409 : vector<1x32xf32> to vector<16x32xf32>
    %411 = arith.addf %407, %410 : vector<16x32xf32>
    %412 = arith.addf %393, %411 : vector<16x32xf32>
    %cst_141 = arith.constant dense<0.000000e+00> : vector<16xf32>
    %413 = vector.multi_reduction <add>, %412, %cst_141 [1] : vector<16x32xf32> to vector<16xf32>
    %414 = vector.shape_cast %413 : vector<16xf32> to vector<16x1xf32>
    %cst_142 = arith.constant 3.200000e+01 : f32
    %415 = vector.broadcast %cst_142 : f32 to vector<16x1xf32>
    %416 = arith.divf %414, %415 : vector<16x1xf32>
    %417 = vector.broadcast %416 : vector<16x1xf32> to vector<16x32xf32>
    %418 = arith.subf %412, %417 : vector<16x32xf32>
    %419 = arith.mulf %418, %418 : vector<16x32xf32>
    %cst_143 = arith.constant dense<0.000000e+00> : vector<16xf32>
    %420 = vector.multi_reduction <add>, %419, %cst_143 [1] : vector<16x32xf32> to vector<16xf32>
    %421 = vector.shape_cast %420 : vector<16xf32> to vector<16x1xf32>
    %cst_144 = arith.constant 3.200000e+01 : f32
    %422 = vector.broadcast %cst_144 : f32 to vector<16x1xf32>
    %423 = arith.divf %421, %422 : vector<16x1xf32>
    %424 = vector.broadcast %416 : vector<16x1xf32> to vector<16x32xf32>
    %425 = arith.subf %412, %424 : vector<16x32xf32>
    %cst_145 = arith.constant 9.99999974E-6 : f32
    %426 = vector.broadcast %cst_145 : f32 to vector<16x1xf32>
    %427 = arith.addf %423, %426 : vector<16x1xf32>
    %428 = math.rsqrt %427 : vector<16x1xf32>
    %429 = vector.broadcast %428 : vector<16x1xf32> to vector<16x32xf32>
    %430 = arith.mulf %425, %429 : vector<16x32xf32>
    %431 = vector.broadcast %12 : vector<1x32xf32> to vector<16x32xf32>
    %432 = arith.mulf %430, %431 : vector<16x32xf32>
    %433 = vector.broadcast %13 : vector<1x32xf32> to vector<16x32xf32>
    %434 = arith.addf %432, %433 : vector<16x32xf32>
    %c0_146 = arith.constant 0 : index
    %c0_147 = arith.constant 0 : index
    %435 = vector.load %arg22[%c0_146, %c0_147] : memref<16x32xf32, #tpu.memory_space<vmem>>, vector<16x32xf32>
    tpu.vector_store %arg22[%c0_146, %c0_147], %434 {strides = array<i32>} : memref<16x32xf32, #tpu.memory_space<vmem>>, vector<16x32xf32>,
    %c0_148 = arith.constant 0 : index
    %c0_149 = arith.constant 0 : index
    %c0_150 = arith.constant 0 : index
    %c0_151 = arith.constant 0 : index
    %436 = vector.load %arg21[%c0_148, %c0_149, %c0_150, %c0_151] : memref<1x1x16x32xf32, #tpu.memory_space<vmem>>, vector<1x1x16x32xf32>
    %437 = vector.shape_cast %436 : vector<1x1x16x32xf32> to vector<16x32xf32>
    %438 = vector.shape_cast %434 : vector<16x32xf32> to vector<1x1x16x32xf32>
    tpu.vector_store %arg21[%c0_148, %c0_149, %c0_150, %c0_151], %438 {strides = array<i32>} : memref<1x1x16x32xf32, #tpu.memory_space<vmem>>, vector<1x1x16x32xf32>,
    return
  }
  func.func @transform_0(%arg0: i32, %arg1: i32) -> (i32, i32, i32) {
    %c0_i32 = arith.constant 0 : i32
    %c0_i32_0 = arith.constant 0 : i32
    %c0_i32_1 = arith.constant 0 : i32
    return %arg0, %c0_i32, %c0_i32_0 : i32, i32, i32
  }
  func.func @transform_1(%arg0: i32, %arg1: i32) -> (i32, i32, i32) {
    %c0_i32 = arith.constant 0 : i32
    %c0_i32_0 = arith.constant 0 : i32
    %c0_i32_1 = arith.constant 0 : i32
    return %arg0, %c0_i32, %c0_i32_0 : i32, i32, i32
  }
  func.func @transform_2(%arg0: i32, %arg1: i32) -> (i32, i32, i32, i32) {
    %c0_i32 = arith.constant 0 : i32
    %c0_i32_0 = arith.constant 0 : i32
    %c0_i32_1 = arith.constant 0 : i32
    return %arg1, %arg0, %c0_i32, %c0_i32_0 : i32, i32, i32, i32
  }
  func.func @transform_3(%arg0: i32, %arg1: i32) -> (i32, i32, i32, i32) {
    %c0_i32 = arith.constant 0 : i32
    %c0_i32_0 = arith.constant 0 : i32
    %c0_i32_1 = arith.constant 0 : i32
    return %arg1, %arg0, %c0_i32, %c0_i32_0 : i32, i32, i32, i32
  }
  func.func @transform_4(%arg0: i32, %arg1: i32) -> (i32, i32, i32) {
    %c0_i32 = arith.constant 0 : i32
    %c0_i32_0 = arith.constant 0 : i32
    %c0_i32_1 = arith.constant 0 : i32
    return %arg1, %c0_i32, %c0_i32_0 : i32, i32, i32
  }
  func.func @transform_5(%arg0: i32, %arg1: i32) -> (i32, i32, i32) {
    %c0_i32 = arith.constant 0 : i32
    %c0_i32_0 = arith.constant 0 : i32
    %c0_i32_1 = arith.constant 0 : i32
    return %arg1, %c0_i32, %c0_i32_0 : i32, i32, i32
  }
  func.func @transform_6(%arg0: i32, %arg1: i32) -> (i32, i32, i32) {
    %c0_i32 = arith.constant 0 : i32
    %c0_i32_0 = arith.constant 0 : i32
    %c0_i32_1 = arith.constant 0 : i32
    return %arg1, %c0_i32, %c0_i32_0 : i32, i32, i32
  }
  func.func @transform_7(%arg0: i32, %arg1: i32) -> (i32, i32, i32) {
    %c0_i32 = arith.constant 0 : i32
    %c0_i32_0 = arith.constant 0 : i32
    %c0_i32_1 = arith.constant 0 : i32
    return %arg1, %c0_i32, %c0_i32_0 : i32, i32, i32
  }
  func.func @transform_8(%arg0: i32, %arg1: i32) -> (i32, i32, i32) {
    %c0_i32 = arith.constant 0 : i32
    %c0_i32_0 = arith.constant 0 : i32
    %c0_i32_1 = arith.constant 0 : i32
    return %arg1, %c0_i32, %c0_i32_0 : i32, i32, i32
  }
  func.func @transform_9(%arg0: i32, %arg1: i32) -> (i32, i32, i32) {
    %c0_i32 = arith.constant 0 : i32
    %c0_i32_0 = arith.constant 0 : i32
    %c0_i32_1 = arith.constant 0 : i32
    return %arg1, %c0_i32, %c0_i32_0 : i32, i32, i32
  }
  func.func @transform_10(%arg0: i32, %arg1: i32) -> (i32, i32, i32) {
    %c0_i32 = arith.constant 0 : i32
    %c0_i32_0 = arith.constant 0 : i32
    %c0_i32_1 = arith.constant 0 : i32
    return %arg1, %c0_i32, %c0_i32_0 : i32, i32, i32
  }
  func.func @transform_11(%arg0: i32, %arg1: i32) -> (i32, i32, i32) {
    %c0_i32 = arith.constant 0 : i32
    %c0_i32_0 = arith.constant 0 : i32
    %c0_i32_1 = arith.constant 0 : i32
    return %arg1, %c0_i32, %c0_i32_0 : i32, i32, i32
  }
  func.func @transform_12(%arg0: i32, %arg1: i32) -> (i32, i32, i32) {
    %c0_i32 = arith.constant 0 : i32
    %c0_i32_0 = arith.constant 0 : i32
    %c0_i32_1 = arith.constant 0 : i32
    return %arg1, %c0_i32, %c0_i32_0 : i32, i32, i32
  }
  func.func @transform_13(%arg0: i32, %arg1: i32) -> (i32, i32, i32) {
    %c0_i32 = arith.constant 0 : i32
    %c0_i32_0 = arith.constant 0 : i32
    %c0_i32_1 = arith.constant 0 : i32
    return %arg1, %c0_i32, %c0_i32_0 : i32, i32, i32
  }
  func.func @transform_14(%arg0: i32, %arg1: i32) -> (i32, i32, i32) {
    %c0_i32 = arith.constant 0 : i32
    %c0_i32_0 = arith.constant 0 : i32
    %c0_i32_1 = arith.constant 0 : i32
    return %arg1, %c0_i32, %c0_i32_0 : i32, i32, i32
  }
  func.func @transform_15(%arg0: i32, %arg1: i32) -> (i32, i32, i32) {
    %c0_i32 = arith.constant 0 : i32
    %c0_i32_0 = arith.constant 0 : i32
    %c0_i32_1 = arith.constant 0 : i32
    return %arg1, %c0_i32, %c0_i32_0 : i32, i32, i32
  }
  func.func @transform_16(%arg0: i32, %arg1: i32) -> (i32, i32, i32) {
    %c0_i32 = arith.constant 0 : i32
    %c0_i32_0 = arith.constant 0 : i32
    %c0_i32_1 = arith.constant 0 : i32
    return %arg1, %c0_i32, %c0_i32_0 : i32, i32, i32
  }
  func.func @transform_17(%arg0: i32, %arg1: i32) -> (i32, i32, i32) {
    %c0_i32 = arith.constant 0 : i32
    %c0_i32_0 = arith.constant 0 : i32
    %c0_i32_1 = arith.constant 0 : i32
    return %arg1, %c0_i32, %c0_i32_0 : i32, i32, i32
  }
  func.func @transform_18(%arg0: i32, %arg1: i32) -> (i32, i32, i32) {
    %c0_i32 = arith.constant 0 : i32
    %c0_i32_0 = arith.constant 0 : i32
    %c0_i32_1 = arith.constant 0 : i32
    return %arg1, %c0_i32, %c0_i32_0 : i32, i32, i32
  }
  func.func @transform_19(%arg0: i32, %arg1: i32) -> (i32, i32, i32, i32) {
    %c0_i32 = arith.constant 0 : i32
    %c0_i32_0 = arith.constant 0 : i32
    %c0_i32_1 = arith.constant 0 : i32
    return %arg1, %arg0, %c0_i32, %c0_i32_0 : i32, i32, i32, i32
  }
}

</mosaic_0001>

<bundles_post_ra>
// kernel: transformer_decoder.2
= control target key start
LH: loop header
LB: loop body
LE: loop exit
PB: predicated region body
PF: predicated region fallthrough
CT: control target
= control target key end

     0   :  { %s1074_s24 = smov 0   ;;  %s1076_s25 = smov 0   ;;  %s1153_s0 = inlined_call_operand.vmem [shape: bf16[2,16,32], index: 0, kind: input, shape index: {}]   ;;  %s1154_s1 = inlined_call_operand.vmem [shape: bf16[2,16,32], index: 1, kind: input, shape index: {}]   ;;  %s1155_s2 = inlined_call_operand.vmem [shape: bf16[2,32,32], index: 2, kind: input, shape index: {}]   ;;  %s1156_s3 = inlined_call_operand.vmem [shape: f32[2,1,32], index: 3, kind: input, shape index: {}]   ;;  %s1157_s4 = inlined_call_operand.vmem [shape: bf16[2,32,32], index: 4, kind: input, shape index: {}]   ;;  %s1158_s5 = inlined_call_operand.vmem [shape: f32[2,1,32], index: 5, kind: input, shape index: {}]   ;;  %s1159_s6 = inlined_call_operand.vmem [shape: bf16[2,2,16,32], index: 6, kind: output, shape index: {0}]   ;;  %s1160_s7 = inlined_call_operand.vmem [shape: bf16[2,2,16,32], index: 7, kind: output, shape index: {1}]  }
   0x1   :  { %s1078_s26 = smov 0   ;;  %s1080_s27 = smov 0  }
   0x2   :  { %s1082_s28 = smov 0  }
   0x3 LB: > { %s30_s29 = sadd.s32 1, %s1022_s26  ;;  %s37_s30 = sadd.s32 1, %s1026_s27  ;;  %s1030_s28 = sphi %s1082_s28, %s18_s28   ;;  %s1026_s27 = sphi %s1080_s27, %s1164_s27   ;;  %s1022_s26 = sphi %s1078_s26, %s1163_s26   ;;  %s1018_s25 = sphi %s1076_s25, %s1162_s25   ;;  %s1014_s24 = sphi %s1074_s24, %s1161_s24  }
   0x4   : > { %p31_p0 = scmp.ge.s32.totalorder %s30_s29, 2  ;;  %p883_p1 = scmp.ge.s32.totalorder %s1030_s28, 1 }
   0x5   : > { %p327_p2 = scmp.lt.s32.totalorder %s1030_s28, 5 }
   0x6   : > { %s1166_s29 = smov (%p31_p0, %s30_s29), 0  ;;  %s1168_s30 = smov (!%p31_p0, %s37_s30), %s1026_s27 }
   0x7   : > { %p328_p3 = pnand %p883_p1, %p327_p2  ;;  %p39_p4 = scmp.ge.s32.totalorder %s1168_s30, 2 }
   0x8   : > { %p429_p5 = scmp.lt.s32.totalorder (!%p328_p3), %s1014_s24, 1  ;;  %p410_p6 = scmp.lt.s32.totalorder (!%p328_p3), %s1018_s25, 1  ;;  %v1032_v0 = vmov (!%p328_p3), 0.0   ;;  %vm1033_vm0 = vmmov (!%p328_p3), 0   ;;  %vm504_vm1 = vcmask (!%p328_p3), 261120   ;;  %vm631_vm2 = vcmask (!%p328_p3), 257024  }
   0x9   : > { %s1170_s30 = smov (%p39_p4, %s1168_s30), 0  ;;  %331 = sbr.rel (%p328_p3) target bundleno = 247 (0xf7), region = 44 }
   0xa   : > { %928 = vmatprep.subr.bf16.mxu0 (!%p328_p3), %v1032_v0  ;;  %936 = vmatprep.subr.bf16.mxu1 (!%p328_p3), %v1032_v0 }
   0xb   : > { %932 = vmatprep.mubr.msk.bf16.mxu0 (!%p328_p3), %vm1033_vm0, %v1032_v0  ;;  %940 = vmatprep.mubr.msk.bf16.mxu1 (!%p328_p3), %vm1033_vm0, %v1032_v0 }
  0x10   : > { %s1172_s24 = smov (!%p429_p5, %s1014_s24), 1  ;;  %s1174_s25 = smov (!%p410_p6, %s1018_s25), 1 }
  0x11   : > { %s916_s8 = sshll.u32 %s1172_s24, 4  ;;  %s914_s15 = sshll.u32 %s1174_s25, 3 }
  0x12   : > { %s433_s11 = scalar_lea.vmem %s1155_s2, %s916_s8  ;;  %s441_s14 = scalar_lea.vmem %s1157_s4, %s916_s8 }
  0x13   : > { %v986_v1 = vld [vmem:[%s433_s11] sm:$0xff]   ;;  %v988_v3 = vld [vmem:[%s433_s11 + $0x8] sm:$0xff]   ;;  %s417_s18 = scalar_lea.vmem %s1153_s0, %s914_s15  ;;  %s427_s21 = scalar_lea.vmem %s1154_s1, %s914_s15 }
  0x14   : > { %v987_v2 = vld [vmem:[%s441_s14] sm:$0xff]   ;;  %929 = vmatpush3.bf16.msra.mxu0 %v986_v1  ;;  %v989_v4 = vld [vmem:[%s441_s14 + $0x8] sm:$0xff]   ;;  %s892_s22 = sshll.u32 %s1174_s25, 1  ;;  %s893_s23 = sshll.u32 %s1172_s24, 2 }
  0x15   : > { %937 = vmatpush3.bf16.msra.mxu1 %v987_v2  ;;  %930 = vmatprep.subr.bf16.mxu0 %v1032_v0  ;;  %v990_v5 = vld [vmem:[%s417_s18] sm:$0xff]   ;;  %s436_s10 = scalar_lea.vmem %s1156_s3, %s1172_s24  ;;  %s455_s11 = sadd.s32 %s893_s23, %s892_s22 }
  0x16   : > { %938 = vmatprep.subr.bf16.mxu1 %v1032_v0  ;;  %v991_v6 = vld [vmem:[%s427_s21] sm:$0xff]   ;;  %s444_s14 = scalar_lea.vmem %s1158_s5, %s1172_s24  ;;  %s894_s15 = sshll.u32 %s455_s11, 2 }
  0x17   : > { %v898_v7 = vld [vmem:[%s436_s10] ss:$0 sm:$0xff]  ;;  %s457_s25 = scalar_lea.vmem %s1159_s6, %s894_s15  ;;  %s471_s24 = scalar_lea.vmem %s1160_s7, %s894_s15 }
  0x18   : > { %931 = vmatpush3.bf16.msra.mxu0 %v988_v3  ;;  %v903_v8 = vld [vmem:[%s444_s14] ss:$0 sm:$0xff] }
  0x19   : > { %939 = vmatpush3.bf16.msra.mxu1 %v989_v4 }
  0x1b   : > { %933 = vmatmul.mubr.msk.bf16.vlgmr.msra.gmra.mrb[0].mxu0 %vm504_vm1, %v990_v5 }
  0x1c   : > { %941 = vmatmul.mubr.msk.bf16.vlgmr.msra.gmra.mrb[0].mxu1 %vm504_vm1, %v991_v6 }
  0xee   : > { %v542_v9 = vpop.f32.mrb[0].mxu0 }
  0xef   : > { %v543_v10 = vadd.f32 %v898_v7, %v542_v9  ;;  %v616_v11 = vpop.f32.mrb[0].mxu1  ;;  %v934_v12 = vpop.f32.mrb[1].mxu0 }
  0xf0   : > { %v617_v13 = vadd.f32 %v903_v8, %v616_v11  ;;  %v942_v14 = vpop.f32.mrb[1].mxu1  ;;  %v545_v15 = vpop.f32.mrb[2].mxu0 }
  0xf1   : > { %v918_v16 = vpack.c.bf16 %v543_v10, %v543_v10  ;;  %v546_v17 = vadd.f32 %v898_v7, %v545_v15  ;;  %v619_v18 = vpop.f32.mrb[2].mxu1  ;;  %v935_v19 = vpop.f32.mrb[3].mxu0 }
  0xf2   : > { %v920_v20 = vpack.c.bf16 %v617_v13, %v617_v13  ;;  %v620_v21 = vadd.f32 %v903_v8, %v619_v18  ;;  %v943_v22 = vpop.f32.mrb[3].mxu1 }
  0xf3   : > { %632 = vst.msk [vmem:[%s457_s25] sm:$0xf] %vm631_vm2, %v918_v16  ;;  %v919_v23 = vpack.c.bf16 %v546_v17, %v546_v17 }
  0xf4   : > { %642 = vst.msk [vmem:[%s471_s24] sm:$0xf] %vm631_vm2, %v920_v20  ;;  %v921_v24 = vpack.c.bf16 %v620_v21, %v620_v21 }
  0xf5   : > { %633 = vst.msk [vmem:[%s457_s25 + $0x4] sm:$0xf] %vm631_vm2, %v919_v23 }
  0xf6   : > { %643 = vst.msk [vmem:[%s471_s24 + $0x4] sm:$0xf] %vm631_vm2, %v921_v24 }
  0xf7 PF: > { %s18_s28 = sadd.s32 1, %s1030_s28   ;;  %s1161_s24 = smov %s1022_s26 }
  0xf8   : > { %p15_p7 = scmp.ge.s32.totalorder %s18_s28, 6   ;;  %s1162_s25 = smov %s1026_s27 }
  0xf9   : > { %s1163_s26 = smov %s1166_s29  ;;  %s1164_s27 = smov %s1170_s30 }
  0xfa   :  { %17 = sbr.rel (!%p15_p7) target bundleno = 3 (0x3), region = 101 }

// kernel: transformer_decoder.3
= control target key start
LH: loop header
LB: loop body
LE: loop exit
PB: predicated region body
PF: predicated region fallthrough
CT: control target
= control target key end

     0   :  { %s4499_s30 = smov 0   ;;  %s4501_s20 = smov 0   ;;  %s5082_s0 = inlined_call_operand.vmem [shape: f32[1,16,32], index: 0, kind: input, shape index: {}]   ;;  %s5083_s1 = inlined_call_operand.vmem [shape: f32[1,16,32], index: 1, kind: input, shape index: {}]   ;;  %s5084_s2 = inlined_call_operand.vmem [shape: bf16[2,2,16,32], index: 2, kind: input, shape index: {}]   ;;  %s5085_s3 = inlined_call_operand.vmem [shape: bf16[2,2,16,32], index: 3, kind: input, shape index: {}]   ;;  %s5086_s4 = inlined_call_operand.vmem [shape: bf16[2,32,64], index: 4, kind: input, shape index: {}]   ;;  %s5087_s5 = inlined_call_operand.vmem [shape: f32[2,1,64], index: 5, kind: input, shape index: {}]   ;;  %s5088_s6 = inlined_call_operand.vmem [shape: bf16[2,32,32], index: 6, kind: input, shape index: {}]   ;;  %s5089_s7 = inlined_call_operand.vmem [shape: f32[2,1,32], index: 7, kind: input, shape index: {}]   ;;  %s5090_s8 = inlined_call_operand.vmem [shape: bf16[2,32,32], index: 8, kind: input, shape index: {}]   ;;  %s5091_s9 = inlined_call_operand.vmem [shape: f32[2,1,32], index: 9, kind: input, shape index: {}]   ;;  %s5092_s10 = inlined_call_operand.vmem [shape: bf16[2,32,32], index: 10, kind: input, shape index: {}]   ;;  %s5093_s11 = inlined_call_operand.vmem [shape: f32[2,1,32], index: 11, kind: input, shape index: {}]   ;;  %s5094_s12 = inlined_call_operand.vmem [shape: bf16[2,32,32], index: 12, kind: input, shape index: {}]   ;;  %s5095_s13 = inlined_call_operand.vmem [shape: f32[2,1,32], index: 13, kind: input, shape index: {}]   ;;  %s5096_s14 = inlined_call_operand.vmem [shape: bf16[2,32,64], index: 14, kind: input, shape index: {}]   ;;  %s5097_s15 = inlined_call_operand.vmem [shape: f32[2,1,64], index: 15, kind: input, shape index: {}]   ;;  %s5098_s16 = inlined_call_operand.vmem [shape: bf16[2,64,32], index: 16, kind: input, shape index: {}]   ;;  %s5099_s17 = inlined_call_operand.vmem [shape: f32[2,1,32], index: 17, kind: input, shape index: {}]   ;;  %s5100_s18 = inlined_call_operand.vmem [shape: f32[2,6,32], index: 18, kind: input, shape index: {}]   ;;  %s5101_s19 = inlined_call_operand.vmem [shape: f32[2,1,16,32], index: 19, kind: output, shape index: {}]  }
   0x1   :  { %5110 = sst [smem:[#allocation10_spill]] %s5082_s0  ;;  %s4497_s0 = smov 0  }
   0x2   :  { %5111 = sst [smem:[#allocation11_spill]] %s5083_s1 }
   0x3   :  { %5112 = sst [smem:[#allocation12_spill]] %s5084_s2 }
   0x4   :  { %5113 = sst [smem:[#allocation13_spill]] %s5085_s3 }
   0x5   :  { %5114 = sst [smem:[#allocation14_spill]] %s5086_s4 }
   0x6   :  { %5115 = sst [smem:[#allocation15_spill]] %s5088_s6 }
   0x7   :  { %5116 = sst [smem:[#allocation16_spill]] %s5090_s8 }
   0x8   :  { %5117 = sst [smem:[#allocation17_spill]] %s5092_s10 }
   0x9   :  { %5118 = sst [smem:[#allocation18_spill]] %s5094_s12 }
   0xa   :  { %5119 = sst [smem:[#allocation19_spill]] %s5095_s13 }
   0xb   :  { %5120 = sst [smem:[#allocation20_spill]] %s5096_s14 }
   0xc   :  { %5121 = sst [smem:[#allocation21_spill]] %s5099_s17 }
   0xd   :  { %5122 = sst [smem:[#allocation22_spill]] %s5100_s18 }
   0xe   :  { %5123 = sst [smem:[#allocation23_spill]] %s5101_s19 }
   0xf LB: > { %5124 = sst [smem:[#allocation3_spill]] %s4375_s0  ;;  %s38_s21 = sadd.s32 1, %s4379_s30  ;;  %s4383_s20 = sphi %s4501_s20, %s29_s20   ;;  %s4379_s30 = sphi %s4499_s30, %s5159_s30   ;;  %s4375_s0 = sphi %s4497_s0, %s5158_s0  }
  0x10   : > { %5125 = sst [smem:[#allocation4_spill]] %s4379_s30  ;;  %p3759_p0 = scmp.ge.s32.totalorder %s4383_s20, 1 }
  0x11   : > { %5126 = sst [smem:[#allocation5_spill]] %s4383_s20  ;;  %p39_p1 = scmp.ge.s32.totalorder %s38_s21, 2 }
  0x12   : > { %p732_p2 = scmp.lt.s32.totalorder %s4383_s20, 3 }
  0x13   : > { %s5161_s21 = smov (%p39_p1, %s38_s21), 0 }
  0x14   : > { %5127 = sst [smem:[#allocation6_spill]] %s5161_s21  ;;  %p733_p3 = pnand %p3759_p0, %p732_p2 }
  0x16   : > { %736 = sbr.rel (%p733_p3) target bundleno = 4486 (0x1186), region = 96 }
  0x1d   : > { %p888_p4 = scmp.lt.s32.totalorder %s4375_s0, 1  ;;  %s5128_s26 = sld [smem:[#allocation12_spill]] }
  0x1e   : > { %s5129_s21 = sld [smem:[#allocation13_spill]]  ;;  %s5131_s4 = sld [smem:[#allocation14_spill]] }
  0x1f   : > { %s4519_s1 = scalar_select %p888_p4, %s4375_s0, 1 }
  0x20   : > { %s5132_s6 = sld [smem:[#allocation15_spill]]  ;;  %s5133_s8 = sld [smem:[#allocation16_spill]] }
  0x21   : > { %s3850_s22 = sshll.u32 %s4519_s1, 4  ;;  %s5134_s10 = sld [smem:[#allocation17_spill]] }
  0x22   : > { %s5135_s12 = sld [smem:[#allocation18_spill]]  ;;  %s5138_s14 = sld [smem:[#allocation20_spill]] }
  0x23   : > { %s4529_s27 = scalar_lea.vmem %s5128_s26, %s3850_s22  ;;  %s3858_s17 = sshll.u32 %s4519_s1, 5 }
  0x24   : > { %s4534_s30 = scalar_lea.vmem %s5129_s21, %s3850_s22  ;;  %s913_s18 = scalar_lea.vmem %s5131_s4, %s3850_s22 }
  0x25   : > { %5130 = sst [smem:[#allocation7_spill]] %s4534_s30  ;;  %s4588_s23 = scalar_lea.vmem %s5098_s16, %s3858_s17 }
  0x26   : > { %s4542_s2 = scalar_lea.vmem %s5132_s6, %s3850_s22  ;;  %s4551_s28 = scalar_lea.vmem %s5133_s8, %s3850_s22 }
  0x27   : > { %s4560_s4 = scalar_lea.vmem %s5134_s10, %s3850_s22  ;;  %s3778_s26 = sshll.u32 %s4519_s1, 3 }
  0x28   : > { %s4569_s3 = scalar_lea.vmem %s5135_s12, %s3850_s22  ;;  %s4578_s30 = scalar_lea.vmem %s5138_s14, %s3850_s22 }
  0x29   : > { %5136 = sst [smem:[#allocation8_spill]] %s4569_s3  ;;  %s5140_s3 = sld [smem:[#allocation21_spill]] }
  0x2a   : > { %5139 = sst [smem:[#allocation9_spill]] %s4578_s30  ;;  %s5141_s21 = sld [smem:[#allocation23_spill]] }
  0x2b   : > { %s5142_s0 = sld [smem:[#allocation22_spill]]  ;;  %s5143_s10 = sld [smem:[#allocation3_spill]] }
  0x2f   : > { %s964_s24 = scalar_lea.vmem %s5140_s3, %s4519_s1 }
  0x30   : > { %s4598_s29 = scalar_lea.vmem %s5141_s21, %s3850_s22 }
  0x31   : > { %s4603_s20 = scalar_lea.vmem %s5142_s0, %s3778_s26  ;;  %p3781_p5 = scmp.ne.s32.totalorder %s5143_s10, 0 }
  0x32   : > { %s5144_s19 = sld [smem:[#allocation10_spill]] (!%p3781_p5)  ;;  %vm985_vm0 = vcmask (!%p3781_p5), 261120  }
  0x33   : > { %982 = sbr.rel (%p3781_p5) target bundleno = 58 (0x3a), region = 100 }
  0x38   : > { %v983_v0 = vld [vmem:[%s5144_s19] sm:$0xff] (!%p3781_p5)  ;;  %v984_v1 = vld [vmem:[%s5144_s19 + $0x8] sm:$0xff] (!%p3781_p5) }
  0x39   : > { %986 = vst.msk [vmem:[#allocation2] sm:$0xff] (!%p3781_p5), %vm985_vm0, %v983_v0  ;;  %987 = vst.msk [vmem:[#allocation2 + $0x8] sm:$0xff] (!%p3781_p5), %vm985_vm0, %v984_v1 }
  0x3a PF: > { %v4265_v2 = vld [vmem:[%s913_s18] sm:$0xff]   ;;  %v4385_v3 = vmov 0.0   ;;  %v4266_v4 = vld [vmem:[%s913_s18 + $0x8] sm:$0xff]   ;;  %vm4386_vm1 = vmmov 0   ;;  %s5145_s13 = sld [smem:[#allocation11_spill]]  ;;  %vm1019_vm2 = vcmask 261120   ;;  %s5146_s25 = scalar_lea.vmem %s5087_s5, %s4519_s1 }
  0x3b   : > { %3947 = vmatprep.subr.bf16.mxu1 %v4385_v3  ;;  %3963 = vmatprep.subr.bf16.mxu0 %v4385_v3  ;;  %v3782_v12 = vld [vmem:[%s5146_s25] ss:$0 sm:$0xff]  ;;  %s4387_s26 = smov 96   ;;  %s4388_s21 = smov 120   ;;  %v4268_v26 = vld [vmem:[%s4542_s2 + $0x8] sm:$0xff]   ;;  %vm1140_vm3 = vcmask 64512  }
  0x3c   : > { %3948 = vmatpush3.bf16.msra.mxu1 %v4265_v2  ;;  %3951 = vmatprep.mubr.msk.bf16.mxu1 %vm4386_vm1, %v4385_v3  ;;  %s4389_s0 = smov 88   ;;  %s4390_s6 = smov 80   ;;  %v4267_v25 = vld [vmem:[%s4542_s2] sm:$0xff]   ;;  %vm1202_vm4 = vcmask 1043456   ;;  %vm1591_vm5 = vcmask 130048   ;;  %vm1593_vm6 = vcmask 195584  }
  0x3d   : > { %3949 = vmatprep.subr.bf16.mxu1 %v4385_v3  ;;  %3965 = vmatprep.mubr.msk.bf16.mxu0 %vm4386_vm1, %v4385_v3  ;;  %s4391_s17 = smov 112   ;;  %s4392_s12 = smov 72   ;;  %vm3361_vm7 = vcmask 523264  }
  0x3e   : > { %s4393_s3 = smov 104   ;;  %s5147_s10 = scalar_lea.vmem %s5089_s7, %s4519_s1 }
  0x3f   : > { %s4394_s14 = smov 8   ;;  %s4395_s18 = smov 16  }
  0x40   : > { %v4616_v5 = vld [vmem:[#allocation2] sm:$0xff]  ;;  %v4618_v6 = vld [vmem:[#allocation2 + $0x8] sm:$0xff]  ;;  %3950 = vmatpush3.bf16.msra.mxu1 %v4266_v4  ;;  %s4396_s30 = smov 24   ;;  %s5148_s25 = scalar_lea.vmem %s5091_s9, %s4519_s1 }
  0x41   : > { %v4623_v7 = vld [vmem:[%s5145_s13] sm:$0xff]  ;;  %v4629_v8 = vld [vmem:[%s5145_s13 + $0x8] sm:$0xff]  ;;  %3955 = vmatprep.subr.bf16.mxu1 %v4385_v3  ;;  %v1068_v27 = vpack.c.bf16 %v4618_v6, %v4616_v5 }
  0x42   : > { %v993_v9 = vadd.f32 %v4623_v7, %v4616_v5  ;;  %v994_v10 = vadd.f32 %v4629_v8, %v4618_v6 }
  0x44   : > { %v995_v11 = vpack.c.bf16 %v994_v10, %v993_v9 }
  0x46   : > { %3952 = vmatmul.mubr.msk.bf16.vlgmr.msra.gmra.mrb[0].mxu1 %vm1019_vm2, %v995_v11 }
  0x47   : > { %3959 = vmatprep.mubr.msk.bf16.mxu1 %vm4386_vm1, %v4385_v3  ;;  %3956 = vmatpush3.bf16.msra.mxu1 %v4267_v25 }
  0x48   : > { %3957 = vmatprep.subr.bf16.mxu1 %v4385_v3 }
  0x4b   : > { %3958 = vmatpush3.bf16.msra.mxu1 %v4268_v26 }
  0x4c   : > { %3969 = vmatprep.subr.bf16.mxu1 %v4385_v3 }
  0x4e   : > { %3960 = vmatmul.mubr.msk.bf16.vlgmr.msra.gmra.mrb[4].mxu1 %vm1019_vm2, %v1068_v27 }
  0x4f   : > { %3971 = vmatprep.mubr.msk.bf16.mxu1 %vm4386_vm1, %v4385_v3 }
 0x119   : > { %v1057_v13 = vpop.f32.mrb[0].mxu1 }
 0x11a   : > { %v1058_v14 = vadd.f32 %v3782_v12, %v1057_v13  ;;  %v3953_v15 = vpop.f32.mrb[1].mxu1 }
 0x11b   : > { %v1060_v16 = vpop.f32.mrb[2].mxu1 }
 0x11c   : > { %v1061_v17 = vadd.f32 %v3782_v12, %v1060_v16  ;;  %v3954_v18 = vpop.f32.mrb[3].mxu1  ;;  %v1064_v19 = vmul.f32 0.35355338, %v1058_v14 }
 0x11e   : > { %v1065_v20 = vmul.f32 0.35355338, %v1061_v17  ;;  %v1067_v21 = vpack.c.bf16 %v1061_v17, %v1058_v14 }
 0x120   : > { %v1066_v22 = vpack.c.bf16 %v1065_v20, %v1064_v19  ;;  %1138 = vrot.lane.b32.xlu0 %v1067_v21, %s4387_s26  ;;  %v1596_v23 = vrot.slane %v1067_v21, 4 }
 0x121   : > { %v1129_v26 = vpop.f32.mrb[4].mxu1 }
 0x122   : > { %1247 = vrot.lane.b32.xlu1 %v1066_v22, %s4388_s21  ;;  %v1595_v24 = vrot.slane %v1066_v22, 4 }
 0x124   : > { %1249 = vrot.lane.b32.xlu0 %v1067_v21, %s4389_s0 }
 0x126   : > { %1360 = vrot.lane.b32.xlu1 %v1067_v21, %s4390_s6 }
 0x128   : > { %1358 = vrot.lane.b32.xlu0 %v1066_v22, %s4391_s17 }
 0x12a   : > { %1470 = vrot.lane.b32.xlu1 %v1067_v21, %s4392_s12 }
 0x12c   : > { %1468 = vrot.lane.b32.xlu0 %v1066_v22, %s4393_s3 }
 0x12e   : > { %1597 = vrot.lane.b32.xlu1 %v1596_v23, %s4387_s26  ;;  %s5149_s26 = scalar_lea.vmem %s5093_s11, %s4519_s1 }
 0x130   : > { %1706 = vrot.lane.b32.xlu0 %v1596_v23, %s4389_s0 }
 0x132   : > { %1704 = vrot.lane.b32.xlu1 %v1595_v24, %s4388_s21 }
 0x134   : > { %1816 = vrot.lane.b32.xlu0 %v1596_v23, %s4390_s6 }
 0x136   : > { %1814 = vrot.lane.b32.xlu1 %v1595_v24, %s4391_s17 }
 0x138   : > { %1926 = vrot.lane.b32.xlu0 %v1596_v23, %s4392_s12 }
 0x13a   : > { %1924 = vrot.lane.b32.xlu1 %v1595_v24, %s4393_s3 }
 0x192   : > { %v1139_v28 = vpop.permute.xlu0 %1138 }
 0x193   : > { %v1145_v29 = vsel %vm1140_vm3, %v1139_v28, 0  ;;  %v3961_v28 = vpop.f32.mrb[5].mxu1 }
 0x194   : > { %3964 = vmatpush3.bf16.xpose.msra.mxu0 %v1145_v29  ;;  %v1248_v31 = vpop.permute.xlu1 %1247 }
 0x195   : > { %3975 = vmatprep.subr.bf16.mxu0 %v4385_v3 }
 0x196   : > { %v1250_v30 = vpop.permute.xlu0 %1249 }
 0x197   : > { %v1255_v32 = vsel %vm1140_vm3, %v1250_v30, 0 }
 0x198   : > { %v1361_v33 = vpop.permute.xlu1 %1360 }
 0x199   : > { %v1366_v34 = vsel %vm1140_vm3, %v1361_v33, 0  ;;  %v3786_v33 = vld [vmem:[%s5147_s10] ss:$0 sm:$0xff]  ;;  %s5155_s10 = scalar_lea.vmem %s5097_s15, %s4519_s1 }
 0x19a   : > { %v1359_v36 = vpop.permute.xlu0 %1358 }
 0x19b   : > { %3966 = vmatmul.mubr.msk.bf16.vlgmr.msra.gmra.mrb[0].mxu0 %vm1140_vm3, %v1066_v22 }
 0x19c   : > { %3976 = vmatpush3.bf16.xpose.msra.mxu0 %v1255_v32  ;;  %3977 = vmatprep.mubr.msk.bf16.mxu0 %vm4386_vm1, %v4385_v3  ;;  %v1471_v35 = vpop.permute.xlu1 %1470 }
 0x19d   : > { %3987 = vmatprep.subr.bf16.mxu0 %v4385_v3  ;;  %v1476_v37 = vsel %vm1140_vm3, %v1471_v35, 0 }
 0x19e   : > { %v1469_v39 = vpop.permute.xlu0 %1468 }
 0x1a0   : > { %v1598_v38 = vpop.permute.xlu1 %1597 }
 0x1a1   : > { %v1603_v40 = vsel %vm1140_vm3, %v1598_v38, 0 }
 0x1a2   : > { %v1707_v41 = vpop.permute.xlu0 %1706 }
 0x1a3   : > { %3978 = vmatmul.mubr.msk.bf16.vlgmr.msra.gmra.mrb[4].mxu0 %vm1140_vm3, %v1248_v31  ;;  %v1712_v42 = vsel %vm1140_vm3, %v1707_v41, 0  ;;  %v1132_v31 = vpop.f32.mrb[6].mxu1 }
 0x1a4   : > { %3988 = vmatpush3.bf16.xpose.msra.mxu0 %v1366_v34  ;;  %3989 = vmatprep.mubr.msk.bf16.mxu0 %vm4386_vm1, %v4385_v3  ;;  %v1705_v44 = vpop.permute.xlu1 %1704  ;;  %v3962_v34 = vpop.f32.mrb[7].mxu1 }
 0x1a5   : > { %3999 = vmatprep.subr.bf16.mxu0 %v4385_v3 }
 0x1a6   : > { %v1817_v43 = vpop.permute.xlu0 %1816 }
 0x1a7   : > { %v1822_v45 = vsel %vm1140_vm3, %v1817_v43, 0 }
 0x1a8   : > { %v1815_v47 = vpop.permute.xlu1 %1814 }
 0x1aa   : > { %v1927_v46 = vpop.permute.xlu0 %1926 }
 0x1ab   : > { %3990 = vmatmul.mubr.msk.bf16.vlgmr.msra.gmra.mrb[8].mxu0 %vm1140_vm3, %v1359_v36  ;;  %v1932_v48 = vsel %vm1140_vm3, %v1927_v46, 0  ;;  %v1130_v36 = vadd.f32 %v3786_v33, %v1129_v26 }
 0x1ac   : > { %4000 = vmatpush3.bf16.xpose.msra.mxu0 %v1476_v37  ;;  %4001 = vmatprep.mubr.msk.bf16.mxu0 %vm4386_vm1, %v4385_v3  ;;  %v1925_v49 = vpop.permute.xlu1 %1924  ;;  %v1133_v37 = vadd.f32 %v3786_v33, %v1132_v31 }
 0x1ad   : > { %4011 = vmatprep.subr.bf16.mxu0 %v4385_v3 }
 0x1ae   : > { %v4723_v38 = vpack.c.bf16 %v1133_v37, %v1130_v36 }
 0x1b3   : > { %4002 = vmatmul.mubr.msk.bf16.vlgmr.msra.gmra.mrb[12].mxu0 %vm1140_vm3, %v1469_v39  ;;  %v1204_v39 = vsel %vm1202_vm4, %v4723_v38, 0 }
 0x1b4   : > { %4012 = vmatpush3.bf16.xpose.msra.mxu0 %v1603_v40  ;;  %4013 = vmatprep.mubr.msk.bf16.mxu0 %vm4386_vm1, %v4385_v3 }
 0x1b5   : > { %4023 = vmatprep.subr.bf16.mxu0 %v4385_v3  ;;  %3970 = vmatpush3.bf16.msra.mxu1 %v1204_v39 }
 0x1b6   : > { %3981 = vmatprep.subr.bf16.mxu1 %v4385_v3 }
 0x1bb   : > { %4014 = vmatmul.mubr.msk.bf16.vlgmr.msra.gmra.mrb[16].mxu0 %vm1140_vm3, %v1595_v24 }
 0x1bc   : > { %4024 = vmatpush3.bf16.xpose.msra.mxu0 %v1712_v42  ;;  %4025 = vmatprep.mubr.msk.bf16.mxu0 %vm4386_vm1, %v4385_v3 }
 0x1bd   : > { %4035 = vmatprep.subr.bf16.mxu0 %v4385_v3 }
 0x1c3   : > { %4026 = vmatmul.mubr.msk.bf16.vlgmr.msra.gmra.mrb[20].mxu0 %vm1140_vm3, %v1705_v44 }
 0x1c4   : > { %4036 = vmatpush3.bf16.xpose.msra.mxu0 %v1822_v45  ;;  %4037 = vmatprep.mubr.msk.bf16.mxu0 %vm4386_vm1, %v4385_v3 }
 0x1c5   : > { %4047 = vmatprep.subr.bf16.mxu0 %v4385_v3 }
 0x1cb   : > { %4038 = vmatmul.mubr.msk.bf16.vlgmr.msra.gmra.mrb[24].mxu0 %vm1140_vm3, %v1815_v47 }
 0x1cc   : > { %4048 = vmatpush3.bf16.xpose.msra.mxu0 %v1932_v48  ;;  %4049 = vmatprep.mubr.msk.bf16.mxu0 %vm4386_vm1, %v4385_v3 }
 0x1cd   : > { %4059 = vmatprep.subr.bf16.mxu0 %v4385_v3 }
 0x1d3   : > { %4050 = vmatmul.mubr.msk.bf16.vlgmr.msra.gmra.mrb[28].mxu0 %vm1140_vm3, %v1925_v49 }
 0x1d4   : > { %4063 = vmatprep.mubr.msk.bf16.mxu0 %vm4386_vm1, %v4385_v3 }
 0x26e   : > { %v1181_v50 = vpop.f32.mrb[0].mxu0 }
 0x26f   : > { %v3967_v51 = vpop.f32.mrb[1].mxu0  ;;  %v1187_v52 = vsel %vm1140_vm3, %v1181_v50, -inf }
 0x270   : > { %1188 = vmax.xlane.f32.xlu0 %v1187_v52  ;;  %v1184_v53 = vpop.f32.mrb[2].mxu0 }
 0x271   : > { %v3968_v54 = vpop.f32.mrb[3].mxu0 }
 0x276   : > { %v1291_v55 = vpop.f32.mrb[4].mxu0 }
 0x277   : > { %v3979_v56 = vpop.f32.mrb[5].mxu0  ;;  %v1297_v57 = vsel %vm1140_vm3, %v1291_v55, -inf }
 0x278   : > { %1298 = vmax.xlane.f32.xlu1 %v1297_v57  ;;  %v1294_v58 = vpop.f32.mrb[6].mxu0 }
 0x279   : > { %v3980_v59 = vpop.f32.mrb[7].mxu0 }
 0x27e   : > { %v1402_v60 = vpop.f32.mrb[8].mxu0 }
 0x27f   : > { %v3991_v61 = vpop.f32.mrb[9].mxu0  ;;  %v1408_v62 = vsel %vm1140_vm3, %v1402_v60, -inf }
 0x280   : > { %1409 = vmax.xlane.f32.xlu0 %v1408_v62  ;;  %v1405_v63 = vpop.f32.mrb[10].mxu0 }
 0x281   : > { %v3992_v0 = vpop.f32.mrb[11].mxu0 }
 0x286   : > { %v1512_v1 = vpop.f32.mrb[12].mxu0 }
 0x287   : > { %v4003_v2 = vpop.f32.mrb[13].mxu0  ;;  %v1518_v4 = vsel %vm1140_vm3, %v1512_v1, -inf }
 0x288   : > { %1519 = vmax.xlane.f32.xlu0 %v1518_v4  ;;  %v1515_v9 = vpop.f32.mrb[14].mxu0 }
 0x289   : > { %v4004_v10 = vpop.f32.mrb[15].mxu0 }
 0x28e   : > { %v4705_v11 = vpop.f32.mrb[16].mxu0 }
 0x28f   : > { %v4015_v12 = vpop.f32.mrb[17].mxu0  ;;  %v1645_v13 = vsel %vm1140_vm3, %v4705_v11, -inf }
 0x290   : > { %1646 = vmax.xlane.f32.xlu1 %v1645_v13  ;;  %v1642_v14 = vpop.f32.mrb[18].mxu0 }
 0x291   : > { %v4016_v15 = vpop.f32.mrb[19].mxu0 }
 0x296   : > { %v4709_v16 = vpop.f32.mrb[20].mxu0 }
 0x297   : > { %v4027_v17 = vpop.f32.mrb[21].mxu0  ;;  %v1754_v18 = vsel %vm1140_vm3, %v4709_v16, -inf }
 0x298   : > { %1755 = vmax.xlane.f32.xlu0 %v1754_v18  ;;  %v1751_v19 = vpop.f32.mrb[22].mxu0 }
 0x299   : > { %v4028_v20 = vpop.f32.mrb[23].mxu0 }
 0x29e   : > { %v4713_v21 = vpop.f32.mrb[24].mxu0 }
 0x29f   : > { %v4039_v22 = vpop.f32.mrb[25].mxu0  ;;  %v1864_v23 = vsel %vm1140_vm3, %v4713_v21, -inf }
 0x2a0   : > { %1865 = vmax.xlane.f32.xlu1 %v1864_v23  ;;  %v1861_v24 = vpop.f32.mrb[26].mxu0 }
 0x2a1   : > { %v4040_v25 = vpop.f32.mrb[27].mxu0 }
 0x2a6   : > { %v1968_v27 = vpop.f32.mrb[28].mxu0 }
 0x2a7   : > { %v4051_v29 = vpop.f32.mrb[29].mxu0  ;;  %v1974_v30 = vsel %vm1140_vm3, %v1968_v27, -inf }
 0x2a8   : > { %1975 = vmax.xlane.f32.xlu0 %v1974_v30  ;;  %v1971_v32 = vpop.f32.mrb[30].mxu0 }
 0x2a9   : > { %v4052_v35 = vpop.f32.mrb[31].mxu0 }
 0x2fd   : > { %v1189_v40 = vpop.xlane.xlu0 %1188 }
 0x2fe   : > { %v1190_v41 = vsub.f32 %v1181_v50, %v1189_v40 }
 0x300   : > { %v1191_v42 = vmul.f32 1.442695, %v1190_v41 }
 0x302   : > { %4285 = vpow2.f32 %v1191_v42 }
 0x305   : > { %v1299_v43 = vpop.xlane.xlu1 %1298 }
 0x306   : > { %v1300_v44 = vsub.f32 %v1291_v55, %v1299_v43 }
 0x308   : > { %v1301_v45 = vmul.f32 1.442695, %v1300_v44 }
 0x30a   : > { %4287 = vpow2.f32 %v1301_v45 }
 0x30c   : > { %v4286_v46 = vpop.eup %4285 }
 0x30d   : > { %v1410_v47 = vpop.xlane.xlu0 %1409  ;;  %v1193_v48 = vsel %vm1140_vm3, %v4286_v46, 0.0 }
 0x30e   : > { %v1411_v49 = vsub.f32 %v1402_v60, %v1410_v47  ;;  %1194 = vadd.xlane.f32.xlu1 %v1193_v48 }
 0x310   : > { %v1412_v51 = vmul.f32 1.442695, %v1411_v49 }
 0x312   : > { %4289 = vpow2.f32 %v1412_v51 }
 0x314   : > { %v4288_v52 = vpop.eup %4287 }
 0x315   : > { %v1520_v53 = vpop.xlane.xlu0 %1519  ;;  %v1303_v54 = vsel %vm1140_vm3, %v4288_v52, 0.0 }
 0x316   : > { %v1521_v56 = vsub.f32 %v1512_v1, %v1520_v53  ;;  %1304 = vadd.xlane.f32.xlu0 %v1303_v54 }
 0x318   : > { %v1522_v50 = vmul.f32 1.442695, %v1521_v56 }
 0x31a   : > { %4291 = vpow2.f32 %v1522_v50 }
 0x31c   : > { %v4730_v57 = vpop.eup %4289 }
 0x31d   : > { %v1414_v55 = vsel %vm1140_vm3, %v4730_v57, 0.0  ;;  %v1647_v60 = vpop.xlane.xlu1 %1646 }
 0x31e   : > { %1415 = vadd.xlane.f32.xlu1 %v1414_v55  ;;  %v1648_v61 = vsub.f32 %v4705_v11, %v1647_v60 }
 0x320   : > { %v1649_v1 = vmul.f32 1.442695, %v1648_v61 }
 0x322   : > { %4293 = vpow2.f32 %v1649_v1 }
 0x324   : > { %v4734_v58 = vpop.eup %4291 }
 0x325   : > { %v1524_v59 = vsel %vm1140_vm3, %v4734_v58, 0.0  ;;  %v1756_v62 = vpop.xlane.xlu0 %1755 }
 0x326   : > { %1525 = vadd.xlane.f32.xlu0 %v1524_v59  ;;  %v1757_v0 = vsub.f32 %v4709_v16, %v1756_v62 }
 0x328   : > { %v1758_v9 = vmul.f32 1.442695, %v1757_v0 }
 0x32a   : > { %4295 = vpow2.f32 %v1758_v9 }
 0x32c   : > { %v4747_v14 = vpop.eup %4293 }
 0x32d   : > { %v1866_v63 = vpop.xlane.xlu1 %1865  ;;  %v1651_v11 = vsel %vm1140_vm3, %v4747_v14, 0.0 }
 0x32e   : > { %v1867_v2 = vsub.f32 %v4713_v21, %v1866_v63  ;;  %v1657_v21 = vrot.slane %v4723_v38, 4 }
 0x32f   : > { %1420 = vrot.lane.b32.xlu1 %v4723_v38, %s4391_s17 }
 0x330   : > { %v1868_v10 = vmul.f32 1.442695, %v1867_v2  ;;  %v1662_v44 = vsel %vm1202_vm4, %v1657_v21, 0 }
 0x332   : > { %4297 = vpow2.f32 %v1868_v10 }
 0x333   : > { %1530 = vrot.lane.b32.xlu1 %v4723_v38, %s4393_s3 }
 0x334   : > { %v4749_v15 = vpop.eup %4295 }
 0x335   : > { %v1976_v4 = vpop.xlane.xlu0 %1975  ;;  %v1760_v17 = vsel %vm1140_vm3, %v4749_v15, 0.0 }
 0x336   : > { %v1977_v12 = vsub.f32 %v1968_v27, %v1976_v4 }
 0x338   : > { %v1978_v13 = vmul.f32 1.442695, %v1977_v12 }
 0x33a   : > { %4299 = vpow2.f32 %v1978_v13 }
 0x33c   : > { %1310 = vrot.lane.b32.xlu0 %v4723_v38, %s4388_s21  ;;  %v4753_v16 = vpop.eup %4297 }
 0x33d   : > { %v1870_v18 = vsel %vm1140_vm3, %v4753_v16, 0.0 }
 0x344   : > { %v4759_v19 = vpop.eup %4299 }
 0x345   : > { %v1980_v20 = vsel %vm1140_vm3, %v4759_v19, 0.0 }
 0x357   : > { %1652 = vadd.xlane.f32.xlu1 %v1651_v11 }
 0x35b   : > { %1761 = vadd.xlane.f32.xlu1 %v1760_v17  ;;  %1871 = vadd.xlane.f32.xlu0 %v1870_v18 }
 0x35f   : > { %1981 = vadd.xlane.f32.xlu1 %v1980_v20 }
 0x370   : > { %1876 = vrot.lane.b32.xlu1 %v1657_v21, %s4391_s17 }
 0x371   : > { %1766 = vrot.lane.b32.xlu0 %v1657_v21, %s4388_s21 }
 0x375   : > { %1986 = vrot.lane.b32.xlu0 %v1657_v21, %s4393_s3 }
 0x39b   : > { %v1195_v22 = vpop.xlane.xlu1 %1194 }
 0x39c   : > { %4301 = vrcp.f32 %v1195_v22 }
 0x3a3   : > { %v1305_v24 = vpop.xlane.xlu0 %1304 }
 0x3a4   : > { %4303 = vrcp.f32 %v1305_v24 }
 0x3a6   : > { %v4302_v23 = vpop.eup %4301 }
 0x3a7   : > { %v1197_v25 = vmul.f32 %v4302_v23, %v4286_v46 }
 0x3a9   : > { %v1198_v26 = vpack.c.bf16 %v1197_v25, %v1197_v25 }
 0x3ab   : > { %3972 = vmatmul.mubr.msk.bf16.vlgmr.msra.gmra.mrb[8].mxu1 %vm1140_vm3, %v1198_v26  ;;  %v1416_v27 = vpop.xlane.xlu1 %1415 }
 0x3ac   : > { %3983 = vmatprep.mubr.msk.bf16.mxu1 %vm4386_vm1, %v4385_v3  ;;  %4305 = vrcp.f32 %v1416_v27 }
 0x3ae   : > { %v4304_v28 = vpop.eup %4303 }
 0x3af   : > { %v1307_v30 = vmul.f32 %v4304_v28, %v4288_v52  ;;  %v1421_v33 = vpop.permute.xlu1 %1420 }
 0x3b0   : > { %v1426_v36 = vsel %vm1202_vm4, %v1421_v33, 0 }
 0x3b1   : > { %v1308_v34 = vpack.c.bf16 %v1307_v30, %v1307_v30 }
 0x3b3   : > { %v1526_v29 = vpop.xlane.xlu0 %1525  ;;  %v1531_v38 = vpop.permute.xlu1 %1530 }
 0x3b4   : > { %4307 = vrcp.f32 %v1526_v29  ;;  %v1536_v41 = vsel %vm1202_vm4, %v1531_v38, 0  ;;  %v4269_v29 = vld [vmem:[%s4551_s28] sm:$0xff]  }
 0x3b5   : > { %4060 = vmatpush3.bf16.msra.mxu0 %v4269_v29 }
 0x3b6   : > { %v4306_v35 = vpop.eup %4305  ;;  %4061 = vmatprep.subr.bf16.mxu0 %v4385_v3 }
 0x3b7   : > { %v1311_v31 = vpop.permute.xlu0 %1310  ;;  %v1418_v37 = vmul.f32 %v4306_v35, %v4730_v57 }
 0x3b8   : > { %v1316_v32 = vsel %vm1202_vm4, %v1311_v31, 0 }
 0x3b9   : > { %3982 = vmatpush3.bf16.msra.mxu1 %v1316_v32  ;;  %v1419_v39 = vpack.c.bf16 %v1418_v37, %v1418_v37 }
 0x3ba   : > { %3993 = vmatprep.subr.bf16.mxu1 %v4385_v3 }
 0x3bc   : > { %3984 = vmatmul.mubr.msk.bf16.vlgmr.msra.gmra.mrb[12].mxu1 %vm1140_vm3, %v1308_v34  ;;  %v4270_v34 = vld [vmem:[%s4551_s28 + $0x8] sm:$0xff]  }
 0x3bd   : > { %3994 = vmatpush3.bf16.msra.mxu1 %v1426_v36  ;;  %3995 = vmatprep.mubr.msk.bf16.mxu1 %vm4386_vm1, %v4385_v3 }
 0x3be   : > { %4005 = vmatprep.subr.bf16.mxu1 %v4385_v3  ;;  %v4308_v40 = vpop.eup %4307  ;;  %4062 = vmatpush3.bf16.msra.mxu0 %v4270_v34 }
 0x3bf   : > { %v1528_v42 = vmul.f32 %v4308_v40, %v4734_v58  ;;  %4075 = vmatprep.subr.bf16.mxu0 %v4385_v3 }
 0x3c1   : > { %v1529_v43 = vpack.c.bf16 %v1528_v42, %v1528_v42 }
 0x3c4   : > { %3996 = vmatmul.mubr.msk.bf16.vlgmr.msra.gmra.mrb[16].mxu1 %vm1140_vm3, %v1419_v39 }
 0x3c5   : > { %4006 = vmatpush3.bf16.msra.mxu1 %v1536_v41  ;;  %4007 = vmatprep.mubr.msk.bf16.mxu1 %vm4386_vm1, %v4385_v3 }
 0x3c6   : > { %4017 = vmatprep.subr.bf16.mxu1 %v4385_v3 }
 0x3cc   : > { %4008 = vmatmul.mubr.msk.bf16.vlgmr.msra.gmra.mrb[20].mxu1 %vm1140_vm3, %v1529_v43 }
 0x3cd   : > { %4018 = vmatpush3.bf16.msra.mxu1 %v1662_v44  ;;  %4019 = vmatprep.mubr.msk.bf16.mxu1 %vm4386_vm1, %v4385_v3 }
 0x3ce   : > { %4029 = vmatprep.subr.bf16.mxu1 %v4385_v3 }
 0x3e4   : > { %v1653_v45 = vpop.xlane.xlu1 %1652 }
 0x3e5   : > { %4309 = vrcp.f32 %v1653_v45 }
 0x3e8   : > { %v1762_v46 = vpop.xlane.xlu1 %1761  ;;  %v1872_v47 = vpop.xlane.xlu0 %1871 }
 0x3e9   : > { %4311 = vrcp.f32 %v1762_v46 }
 0x3ea   : > { %4313 = vrcp.f32 %v1872_v47 }
 0x3ec   : > { %v1767_v51 = vpop.permute.xlu0 %1766  ;;  %v1982_v54 = vpop.xlane.xlu1 %1981 }
 0x3ed   : > { %v1772_v56 = vsel %vm1202_vm4, %v1767_v51, 0  ;;  %4315 = vrcp.f32 %v1982_v54 }
 0x3ef   : > { %v4310_v48 = vpop.eup %4309 }
 0x3f0   : > { %v1655_v49 = vmul.f32 %v4310_v48, %v4747_v14  ;;  %v1877_v57 = vpop.permute.xlu1 %1876  ;;  %v1987_v61 = vpop.permute.xlu0 %1986 }
 0x3f1   : > { %v1882_v59 = vsel %vm1202_vm4, %v1877_v57, 0  ;;  %v1992_v0 = vsel %vm1202_vm4, %v1987_v61, 0  ;;  %v3806_v61 = vld [vmem:[%s5148_s25] ss:$0 sm:$0xff] }
 0x3f2   : > { %v1656_v52 = vpack.c.bf16 %v1655_v49, %v1655_v49 }
 0x3f3   : > { %v4312_v53 = vpop.eup %4311 }
 0x3f4   : > { %4020 = vmatmul.mubr.msk.bf16.vlgmr.msra.gmra.mrb[24].mxu1 %vm1140_vm3, %v1656_v52  ;;  %v1764_v50 = vmul.f32 %v4312_v53, %v4749_v15  ;;  %v4314_v58 = vpop.eup %4313 }
 0x3f5   : > { %4030 = vmatpush3.bf16.msra.mxu1 %v1772_v56  ;;  %4031 = vmatprep.mubr.msk.bf16.mxu1 %vm4386_vm1, %v4385_v3  ;;  %v1874_v60 = vmul.f32 %v4314_v58, %v4753_v16 }
 0x3f6   : > { %4041 = vmatprep.subr.bf16.mxu1 %v4385_v3  ;;  %v1765_v55 = vpack.c.bf16 %v1764_v50, %v1764_v50 }
 0x3f7   : > { %v1875_v62 = vpack.c.bf16 %v1874_v60, %v1874_v60  ;;  %v4316_v63 = vpop.eup %4315 }
 0x3f8   : > { %v1984_v1 = vmul.f32 %v4316_v63, %v4759_v19 }
 0x3fa   : > { %v1985_v2 = vpack.c.bf16 %v1984_v1, %v1984_v1 }
 0x3fc   : > { %4032 = vmatmul.mubr.msk.bf16.vlgmr.msra.gmra.mrb[28].mxu1 %vm1140_vm3, %v1765_v55 }
 0x3fd   : > { %4042 = vmatpush3.bf16.msra.mxu1 %v1882_v59  ;;  %4043 = vmatprep.mubr.msk.bf16.mxu1 %vm4386_vm1, %v4385_v3 }
 0x3fe   : > { %4053 = vmatprep.subr.bf16.mxu1 %v4385_v3 }
 0x404   : > { %4044 = vmatmul.mubr.msk.bf16.vlgmr.msra.gmra.mrb[32].mxu1 %vm1140_vm3, %v1875_v62 }
 0x405   : > { %4054 = vmatpush3.bf16.msra.mxu1 %v1992_v0  ;;  %4055 = vmatprep.mubr.msk.bf16.mxu1 %vm4386_vm1, %v4385_v3 }
 0x406   : > { %4067 = vmatprep.subr.bf16.mxu1 %v4385_v3 }
 0x40c   : > { %4056 = vmatmul.mubr.msk.bf16.vlgmr.msra.gmra.mrb[36].mxu1 %vm1140_vm3, %v1985_v2 }
 0x40d   : > { %4071 = vmatprep.mubr.msk.bf16.mxu1 %vm4386_vm1, %v4385_v3 }
 0x47e   : > { %v1240_v4 = vpop.f32.mrb[8].mxu1 }
 0x47f   : > { %v3973_v9 = vpop.f32.mrb[9].mxu1 }
 0x480   : > { %v1243_v10 = vpop.f32.mrb[10].mxu1 }
 0x481   : > { %v3974_v12 = vpop.f32.mrb[11].mxu1 }
 0x48f   : > { %v1352_v13 = vpop.f32.mrb[12].mxu1 }
 0x490   : > { %v3985_v14 = vpop.f32.mrb[13].mxu1 }
 0x491   : > { %v1355_v15 = vpop.f32.mrb[14].mxu1 }
 0x492   : > { %v3986_v11 = vpop.f32.mrb[15].mxu1 }
 0x497   : > { %v1462_v16 = vpop.f32.mrb[16].mxu1 }
 0x498   : > { %v3997_v17 = vpop.f32.mrb[17].mxu1 }
 0x499   : > { %v1465_v18 = vpop.f32.mrb[18].mxu1 }
 0x49a   : > { %v3998_v19 = vpop.f32.mrb[19].mxu1 }
 0x49f   : > { %v1572_v20 = vpop.f32.mrb[20].mxu1 }
 0x4a0   : > { %v4009_v21 = vpop.f32.mrb[21].mxu1 }
 0x4a1   : > { %v1575_v22 = vpop.f32.mrb[22].mxu1 }
 0x4a2   : > { %v4010_v23 = vpop.f32.mrb[23].mxu1  ;;  %v4272_v22 = vld [vmem:[%s4560_s4 + $0x8] sm:$0xff]  }
 0x4c7   : > { %v1698_v24 = vpop.f32.mrb[24].mxu1 }
 0x4c8   : > { %v4021_v25 = vpop.f32.mrb[25].mxu1 }
 0x4c9   : > { %v1701_v26 = vpop.f32.mrb[26].mxu1  ;;  %v2146_v25 = vlaneseq }
 0x4ca   : > { %v4022_v27 = vpop.f32.mrb[27].mxu1 }
 0x4cf   : > { %v1808_v28 = vpop.f32.mrb[28].mxu1 }
 0x4d0   : > { %v4235_v30 = vpack.i.bf16 %v1808_v28, %v1352_v13  ;;  %v4033_v31 = vpop.f32.mrb[29].mxu1 }
 0x4d1   : > { %v1811_v32 = vpop.f32.mrb[30].mxu1 }
 0x4d2   : > { %4236 = vrot.lane.b32.xlu0 %v4235_v30, %s4394_s14  ;;  %v4034_v33 = vpop.f32.mrb[31].mxu1  ;;  %v4842_v30 = vshrl.u32 %v2146_v25, 7  ;;  %v4846_v32 = vld [vmem:[%s4603_s20] sm:$0x3f] }
 0x4d4   : > { %v2148_v31 = vsub.s32 0, %v4842_v30  ;;  %v2154_v33 = vsub.s32 1, %v4842_v30 }
 0x4d6   : > { %v2149_v34 = vrot.slane %v4846_v32, %v2148_v31 }
 0x4d7   : > { %v1918_v35 = vpop.f32.mrb[32].mxu1 }
 0x4d8   : > { %v4240_v36 = vpack.i.bf16 %v1918_v35, %v1462_v16  ;;  %v4045_v37 = vpop.f32.mrb[33].mxu1 }
 0x4d9   : > { %v1921_v38 = vpop.f32.mrb[34].mxu1  ;;  %v2155_v37 = vrot.slane %v4846_v32, %v2154_v33 }
 0x4da   : > { %4241 = vrot.lane.b32.xlu1 %v4240_v36, %s4395_s18  ;;  %v4046_v39 = vpop.f32.mrb[35].mxu1 }
 0x4df   : > { %v2028_v40 = vpop.f32.mrb[36].mxu1 }
 0x4e0   : > { %v4245_v41 = vpack.i.bf16 %v2028_v40, %v1572_v20  ;;  %v4057_v42 = vpop.f32.mrb[37].mxu1 }
 0x4e1   : > { %v2031_v43 = vpop.f32.mrb[38].mxu1 }
 0x4e2   : > { %4246 = vrot.lane.b32.xlu0 %v4245_v41, %s4396_s30  ;;  %v4058_v44 = vpop.f32.mrb[39].mxu1 }
 0x544   : > { %v4237_v45 = vpop.permute.xlu0 %4236 }
 0x545   : > { %v4239_v47 = vunpack.i.h.bf16 %v4237_v45  ;;  %v4238_v48 = vunpack.i.l.bf16 %v4237_v45 }
 0x547   : > { %v2046_v53 = vsel %vm1140_vm3, %v1698_v24, %v4239_v47  ;;  %v1590_v54 = vsel %vm1140_vm3, %v1240_v4, %v4238_v48  ;;  %v4273_v47 = vld [vmem:[%s4529_s27] sm:$0xff]  }
 0x548   : > { %v2248_v48 = vsel %vm1140_vm3, %v4273_v47, 0 }
 0x54c   : > { %v4242_v46 = vpop.permute.xlu1 %4241 }
 0x54d   : > { %v4244_v49 = vunpack.i.h.bf16 %v4242_v46  ;;  %v4243_v51 = vunpack.i.l.bf16 %v4242_v46 }
 0x54f   : > { %v2047_v57 = vsel %vm1591_vm5, %v2046_v53, %v4244_v49  ;;  %v1592_v55 = vsel %vm1591_vm5, %v1590_v54, %v4243_v51 }
 0x554   : > { %v4247_v52 = vpop.permute.xlu0 %4246 }
 0x555   : > { %v4249_v56 = vunpack.i.h.bf16 %v4247_v52  ;;  %v4248_v50 = vunpack.i.l.bf16 %v4247_v52 }
 0x557   : > { %v2048_v58 = vsel %vm1593_vm6, %v2047_v57, %v4249_v56  ;;  %v1594_v59 = vsel %vm1593_vm6, %v1592_v55, %v4248_v50 }
 0x558   : > { %v2049_v60 = vpack.c.bf16 %v2048_v58, %v1594_v59 }
 0x55a   : > { %4064 = vmatmul.mubr.msk.bf16.vlgmr.msra.gmra.mrb[32].mxu0 %vm1019_vm2, %v2049_v60  ;;  %v4274_v60 = vld [vmem:[%s4529_s27 + $0x8] sm:$0xff]   ;;  %s5150_s27 = sld [smem:[#allocation7_spill]] }
 0x55b   : > { %4077 = vmatprep.mubr.msk.bf16.mxu0 %vm4386_vm1, %v4385_v3  ;;  %4076 = vmatpush3.bf16.xpose.msra.mxu0 %v2248_v48 }
 0x55c   : > { %4087 = vmatprep.subr.bf16.mxu0 %v4385_v3 }
 0x62d   : > { %v2110_v62 = vpop.f32.mrb[32].mxu0 }
 0x62e   : > { %v2111_v63 = vadd.f32 %v3806_v61, %v2110_v62  ;;  %v4065_v0 = vpop.f32.mrb[33].mxu0 }
 0x62f   : > { %v2113_v1 = vpop.f32.mrb[34].mxu0 }
 0x630   : > { %v2114_v2 = vadd.f32 %v3806_v61, %v2113_v1  ;;  %v4066_v4 = vpop.f32.mrb[35].mxu0  ;;  %v2117_v9 = vadd.f32 %v2111_v63, %v4616_v5 }
 0x631   : > { %v2701_v4 = vsel %vm1140_vm3, %v4274_v60, 0 }
 0x632   : > { %v2119_v10 = vsel %vm1019_vm2, %v2117_v9, 0.0  ;;  %v2118_v12 = vadd.f32 %v2114_v2, %v4618_v6  ;;  %v4271_v6 = vld [vmem:[%s4560_s4] sm:$0xff]  }
 0x633   : > { %2120 = vadd.xlane.f32.xlu1 %v2119_v10  ;;  %4068 = vmatpush3.bf16.msra.mxu1 %v4271_v6 }
 0x634   : > { %v2122_v13 = vsel %vm1019_vm2, %v2118_v12, 0.0  ;;  %4069 = vmatprep.subr.bf16.mxu1 %v4385_v3 }
 0x635   : > { %2123 = vadd.xlane.f32.xlu0 %v2122_v13 }
 0x637   : > { %4070 = vmatpush3.bf16.msra.mxu1 %v4272_v22  ;;  %v4923_v22 = vld [vmem:[%s5150_s27] sm:$0xff]  }
 0x638   : > { %4081 = vmatprep.subr.bf16.mxu1 %v4385_v3 }
 0x6c0   : > { %v2121_v14 = vpop.xlane.xlu1 %2120 }
 0x6c1   : > { %v2126_v15 = vmul.f32 0.03125, %v2121_v14 }
 0x6c2   : > { %v2124_v11 = vpop.xlane.xlu0 %2123 }
 0x6c3   : > { %v2128_v16 = vsub.f32 %v2117_v9, %v2126_v15  ;;  %v2127_v17 = vmul.f32 0.03125, %v2124_v11 }
 0x6c5   : > { %v2129_v18 = vsub.f32 %v2118_v12, %v2127_v17  ;;  %v2130_v19 = vmul.f32 %v2128_v16, %v2128_v16 }
 0x6c7   : > { %v2132_v20 = vsel %vm1019_vm2, %v2130_v19, 0.0  ;;  %v2131_v5 = vmul.f32 %v2129_v18, %v2129_v18 }
 0x6c8   : > { %2133 = vadd.xlane.f32.xlu0 %v2132_v20 }
 0x6c9   : > { %v2135_v21 = vsel %vm1019_vm2, %v2131_v5, 0.0 }
 0x6ca   : > { %2136 = vadd.xlane.f32.xlu1 %v2135_v21 }
 0x6de   : > { %2354 = vrot.lane.b32.xlu0 %v4273_v47, %s4388_s21 }
 0x755   : > { %v2134_v23 = vpop.xlane.xlu0 %2133 }
 0x756   : > { %v2138_v24 = vmul.f32 0.03125, %v2134_v23 }
 0x757   : > { %v2137_v26 = vpop.xlane.xlu1 %2136 }
 0x758   : > { %v2140_v27 = vadd.f32 1e-05, %v2138_v24  ;;  %v2139_v28 = vmul.f32 0.03125, %v2137_v26 }
 0x759   : > { %v2355_v57 = vpop.permute.xlu0 %2354 }
 0x75a   : > { %4317 = vrsqrt.f32 %v2140_v27  ;;  %v2141_v29 = vadd.f32 1e-05, %v2139_v28  ;;  %v2360_v58 = vsel %vm1140_vm3, %v2355_v57, 0 }
 0x75c   : > { %4319 = vrsqrt.f32 %v2141_v29 }
 0x764   : > { %v4318_v35 = vpop.eup %4317 }
 0x765   : > { %v2144_v36 = vmul.f32 %v4318_v35, %v2128_v16 }
 0x766   : > { %v4320_v38 = vpop.eup %4319 }
 0x767   : > { %v2150_v39 = vmul.f32 %v2149_v34, %v2144_v36  ;;  %v2145_v40 = vmul.f32 %v4320_v38, %v2129_v18 }
 0x769   : > { %v2151_v41 = vmul.f32 %v2149_v34, %v2145_v40  ;;  %v4851_v42 = vadd.f32 %v2155_v37, %v2150_v39 }
 0x76b   : > { %v4853_v43 = vadd.f32 %v2155_v37, %v2151_v41  ;;  %v2158_v44 = vadd.f32 %v4851_v42, %v4623_v7  ;;  %v3810_v7 = vld [vmem:[%s5149_s26] ss:$0 sm:$0xff] }
 0x76d   : > { %v2159_v45 = vadd.f32 %v4853_v43, %v4629_v8 }
 0x76f   : > { %v2160_v46 = vpack.c.bf16 %v2159_v45, %v2158_v44 }
 0x771   : > { %4072 = vmatmul.mubr.msk.bf16.vlgmr.msra.gmra.mrb[40].mxu1 %vm1019_vm2, %v2160_v46 }
 0x772   : > { %4083 = vmatprep.mubr.msk.bf16.mxu1 %vm4386_vm1, %v4385_v3  ;;  %4082 = vmatpush3.bf16.msra.mxu1 %v4923_v22 }
 0x773   : > { %4093 = vmatprep.subr.bf16.mxu1 %v4385_v3 }
 0x844   : > { %v2221_v8 = vpop.f32.mrb[40].mxu1 }
 0x845   : > { %v2222_v49 = vadd.f32 %v3810_v7, %v2221_v8  ;;  %v4073_v51 = vpop.f32.mrb[41].mxu1 }
 0x846   : > { %v2224_v52 = vpop.f32.mrb[42].mxu1 }
 0x847   : > { %v2225_v53 = vadd.f32 %v3810_v7, %v2224_v52  ;;  %v4074_v54 = vpop.f32.mrb[43].mxu1  ;;  %v2228_v56 = vmul.f32 0.35355338, %v2222_v49 }
 0x849   : > { %v2229_v50 = vmul.f32 0.35355338, %v2225_v53 }
 0x84b   : > { %v2230_v55 = vpack.c.bf16 %v2229_v50, %v2228_v56 }
 0x84d   : > { %2460 = vrot.lane.b32.xlu0 %v2230_v55, %s4391_s17  ;;  %2352 = vrot.lane.b32.xlu1 %v2230_v55, %s4388_s21  ;;  %v2691_v59 = vrot.slane %v2230_v55, 4 }
 0x84e   : > { %4078 = vmatmul.mubr.msk.bf16.vlgmr.msra.gmra.mrb[36].mxu0 %vm1140_vm3, %v2230_v55 }
 0x84f   : > { %4088 = vmatpush3.bf16.xpose.msra.mxu0 %v2360_v58  ;;  %4089 = vmatprep.mubr.msk.bf16.mxu0 %vm4386_vm1, %v4385_v3 }
 0x850   : > { %4099 = vmatprep.subr.bf16.mxu0 %v4385_v3 }
 0x851   : > { %2568 = vrot.lane.b32.xlu0 %v2230_v55, %s4393_s3  ;;  %2462 = vrot.lane.b32.xlu1 %v4273_v47, %s4391_s17 }
 0x855   : > { %2804 = vrot.lane.b32.xlu0 %v2691_v59, %s4388_s21  ;;  %2570 = vrot.lane.b32.xlu1 %v4273_v47, %s4393_s3 }
 0x859   : > { %2912 = vrot.lane.b32.xlu0 %v2691_v59, %s4391_s17  ;;  %2806 = vrot.lane.b32.xlu1 %v4274_v60, %s4388_s21 }
 0x85d   : > { %3020 = vrot.lane.b32.xlu0 %v2691_v59, %s4393_s3  ;;  %2914 = vrot.lane.b32.xlu1 %v4274_v60, %s4391_s17 }
 0x861   : > { %3022 = vrot.lane.b32.xlu1 %v4274_v60, %s4393_s3 }
 0x8bf   : > { %v2353_v61 = vpop.permute.xlu1 %2352  ;;  %v2461_v2 = vpop.permute.xlu0 %2460 }
 0x8c0   : > { %4090 = vmatmul.mubr.msk.bf16.vlgmr.msra.gmra.mrb[40].mxu0 %vm1140_vm3, %v2353_v61 }
 0x8c1   : > { %4101 = vmatprep.mubr.msk.bf16.mxu0 %vm4386_vm1, %v4385_v3 }
 0x8c3   : > { %v2463_v62 = vpop.permute.xlu1 %2462  ;;  %v2569_v9 = vpop.permute.xlu0 %2568 }
 0x8c4   : > { %v2468_v63 = vsel %vm1140_vm3, %v2463_v62, 0 }
 0x8c5   : > { %4100 = vmatpush3.bf16.xpose.msra.mxu0 %v2468_v63 }
 0x8c6   : > { %4111 = vmatprep.subr.bf16.mxu0 %v4385_v3 }
 0x8c7   : > { %v2571_v0 = vpop.permute.xlu1 %2570  ;;  %v2805_v15 = vpop.permute.xlu0 %2804 }
 0x8c8   : > { %v2576_v1 = vsel %vm1140_vm3, %v2571_v0, 0 }
 0x8cb   : > { %v2807_v10 = vpop.permute.xlu1 %2806  ;;  %v2913_v17 = vpop.permute.xlu0 %2912 }
 0x8cc   : > { %4102 = vmatmul.mubr.msk.bf16.vlgmr.msra.gmra.mrb[44].mxu0 %vm1140_vm3, %v2461_v2  ;;  %v2812_v12 = vsel %vm1140_vm3, %v2807_v10, 0 }
 0x8cd   : > { %4112 = vmatpush3.bf16.xpose.msra.mxu0 %v2576_v1  ;;  %4113 = vmatprep.mubr.msk.bf16.mxu0 %vm4386_vm1, %v4385_v3 }
 0x8ce   : > { %4123 = vmatprep.subr.bf16.mxu0 %v4385_v3 }
 0x8cf   : > { %v2915_v13 = vpop.permute.xlu1 %2914  ;;  %v3021_v18 = vpop.permute.xlu0 %3020 }
 0x8d0   : > { %v2920_v14 = vsel %vm1140_vm3, %v2915_v13, 0 }
 0x8d3   : > { %v3023_v11 = vpop.permute.xlu1 %3022 }
 0x8d4   : > { %4114 = vmatmul.mubr.msk.bf16.vlgmr.msra.gmra.mrb[48].mxu0 %vm1140_vm3, %v2569_v9  ;;  %v3028_v16 = vsel %vm1140_vm3, %v3023_v11, 0 }
 0x8d5   : > { %4124 = vmatpush3.bf16.xpose.msra.mxu0 %v2701_v4  ;;  %4125 = vmatprep.mubr.msk.bf16.mxu0 %vm4386_vm1, %v4385_v3 }
 0x8d6   : > { %4135 = vmatprep.subr.bf16.mxu0 %v4385_v3 }
 0x8dc   : > { %4126 = vmatmul.mubr.msk.bf16.vlgmr.msra.gmra.mrb[52].mxu0 %vm1140_vm3, %v2691_v59 }
 0x8dd   : > { %4136 = vmatpush3.bf16.xpose.msra.mxu0 %v2812_v12  ;;  %4137 = vmatprep.mubr.msk.bf16.mxu0 %vm4386_vm1, %v4385_v3 }
 0x8de   : > { %4147 = vmatprep.subr.bf16.mxu0 %v4385_v3 }
 0x8e4   : > { %4138 = vmatmul.mubr.msk.bf16.vlgmr.msra.gmra.mrb[56].mxu0 %vm1140_vm3, %v2805_v15 }
 0x8e5   : > { %4148 = vmatpush3.bf16.xpose.msra.mxu0 %v2920_v14  ;;  %4149 = vmatprep.mubr.msk.bf16.mxu0 %vm4386_vm1, %v4385_v3 }
 0x8e6   : > { %4159 = vmatprep.subr.bf16.mxu0 %v4385_v3 }
 0x8ec   : > { %4150 = vmatmul.mubr.msk.bf16.vlgmr.msra.gmra.mrb[60].mxu0 %vm1140_vm3, %v2913_v17 }
 0x8ed   : > { %4160 = vmatpush3.bf16.xpose.msra.mxu0 %v3028_v16  ;;  %4161 = vmatprep.mubr.msk.bf16.mxu0 %vm4386_vm1, %v4385_v3 }
 0x8ee   : > { %4171 = vmatprep.subr.bf16.mxu0 %v4385_v3 }
 0x8f4   : > { %4162 = vmatmul.mubr.msk.bf16.vlgmr.msra.gmra.mrb[64].mxu0 %vm1140_vm3, %v3021_v18 }
 0x8f5   : > { %4175 = vmatprep.mubr.msk.bf16.mxu0 %vm4386_vm1, %v4385_v3 }
 0x921   : > { %v2284_v19 = vpop.f32.mrb[36].mxu0 }
 0x922   : > { %v4079_v20 = vpop.f32.mrb[37].mxu0  ;;  %v2290_v5 = vsel %vm1591_vm5, %v2284_v19, -inf }
 0x923   : > { %2291 = vmax.xlane.f32.xlu1 %v2290_v5  ;;  %v2287_v21 = vpop.f32.mrb[38].mxu0 }
 0x924   : > { %v4080_v6 = vpop.f32.mrb[39].mxu0 }
 0x993   : > { %v2396_v23 = vpop.f32.mrb[40].mxu0 }
 0x994   : > { %v4091_v24 = vpop.f32.mrb[41].mxu0  ;;  %v2402_v25 = vsel %vm1591_vm5, %v2396_v23, -inf }
 0x995   : > { %2403 = vmax.xlane.f32.xlu0 %v2402_v25  ;;  %v2399_v26 = vpop.f32.mrb[42].mxu0 }
 0x996   : > { %v4092_v27 = vpop.f32.mrb[43].mxu0 }
 0x997   : > { %v4276_v27 = vld [vmem:[%s5150_s27 + $0x8] sm:$0xff]  }
 0x99f   : > { %v2504_v28 = vpop.f32.mrb[44].mxu0 }
 0x9a0   : > { %v4103_v29 = vpop.f32.mrb[45].mxu0  ;;  %v2510_v31 = vsel %vm1591_vm5, %v2504_v28, -inf }
 0x9a1   : > { %2511 = vmax.xlane.f32.xlu0 %v2510_v31  ;;  %v2507_v33 = vpop.f32.mrb[46].mxu0 }
 0x9a2   : > { %v4104_v34 = vpop.f32.mrb[47].mxu0 }
 0x9a7   : > { %v2612_v35 = vpop.f32.mrb[48].mxu0 }
 0x9a8   : > { %v4115_v36 = vpop.f32.mrb[49].mxu0  ;;  %v2618_v37 = vsel %vm1591_vm5, %v2612_v35, -inf }
 0x9a9   : > { %2619 = vmax.xlane.f32.xlu1 %v2618_v37  ;;  %v2615_v38 = vpop.f32.mrb[50].mxu0 }
 0x9aa   : > { %v4116_v39 = vpop.f32.mrb[51].mxu0 }
 0x9af   : > { %v2737_v40 = vpop.f32.mrb[52].mxu0 }
 0x9b0   : > { %v2292_v41 = vpop.xlane.xlu1 %2291  ;;  %v4127_v44 = vpop.f32.mrb[53].mxu0  ;;  %v2743_v45 = vsel %vm1591_vm5, %v2737_v40, -inf }
 0x9b1   : > { %v2293_v46 = vsub.f32 %v2284_v19, %v2292_v41  ;;  %2744 = vmax.xlane.f32.xlu0 %v2743_v45  ;;  %v2740_v47 = vpop.f32.mrb[54].mxu0 }
 0x9b2   : > { %v4128_v48 = vpop.f32.mrb[55].mxu0 }
 0x9b3   : > { %v2294_v7 = vmul.f32 1.442695, %v2293_v46 }
 0x9b5   : > { %4321 = vpow2.f32 %v2294_v7 }
 0x9b7   : > { %v4931_v8 = vpop.f32.mrb[56].mxu0 }
 0x9b8   : > { %v4139_v49 = vpop.f32.mrb[57].mxu0  ;;  %v2854_v51 = vsel %vm1591_vm5, %v4931_v8, -inf }
 0x9b9   : > { %2855 = vmax.xlane.f32.xlu1 %v2854_v51  ;;  %v2851_v52 = vpop.f32.mrb[58].mxu0 }
 0x9ba   : > { %v4140_v53 = vpop.f32.mrb[59].mxu0 }
 0x9bf   : > { %v2956_v54 = vpop.f32.mrb[60].mxu0  ;;  %v4322_v57 = vpop.eup %4321 }
 0x9c0   : > { %v4151_v56 = vpop.f32.mrb[61].mxu0  ;;  %v2962_v50 = vsel %vm1591_vm5, %v2956_v54, -inf  ;;  %v2296_v59 = vsel %vm1591_vm5, %v4322_v57, 0.0 }
 0x9c1   : > { %2963 = vmax.xlane.f32.xlu0 %v2962_v50  ;;  %v2959_v55 = vpop.f32.mrb[62].mxu0 }
 0x9c2   : > { %v4152_v58 = vpop.f32.mrb[63].mxu0 }
 0x9c5   : > { %2297 = vadd.xlane.f32.xlu0 %v2296_v59 }
 0x9c7   : > { %v3064_v60 = vpop.f32.mrb[64].mxu0 }
 0x9c8   : > { %v4163_v61 = vpop.f32.mrb[65].mxu0  ;;  %v3070_v62 = vsel %vm1591_vm5, %v3064_v60, -inf }
 0x9c9   : > { %3071 = vmax.xlane.f32.xlu1 %v3070_v62  ;;  %v3067_v63 = vpop.f32.mrb[66].mxu0 }
 0x9ca   : > { %v4164_v0 = vpop.f32.mrb[67].mxu0 }
 0x9da   : > { %2414 = vrot.lane.b32.xlu1 %v4923_v22, %s4388_s21 }
 0x9db   : > { %2522 = vrot.lane.b32.xlu0 %v4923_v22, %s4391_s17 }
 0xa22   : > { %v2404_v1 = vpop.xlane.xlu0 %2403 }
 0xa23   : > { %v2405_v2 = vsub.f32 %v2396_v23, %v2404_v1 }
 0xa25   : > { %v2406_v4 = vmul.f32 1.442695, %v2405_v2 }
 0xa27   : > { %4323 = vpow2.f32 %v2406_v4 }
 0xa2e   : > { %v2512_v9 = vpop.xlane.xlu0 %2511 }
 0xa2f   : > { %v2513_v10 = vsub.f32 %v2504_v28, %v2512_v9 }
 0xa31   : > { %v4324_v12 = vpop.eup %4323  ;;  %v2514_v13 = vmul.f32 1.442695, %v2513_v10 }
 0xa32   : > { %v2408_v14 = vsel %vm1591_vm5, %v4324_v12, 0.0 }
 0xa33   : > { %4325 = vpow2.f32 %v2514_v13  ;;  %2409 = vadd.xlane.f32.xlu1 %v2408_v14 }
 0xa36   : > { %v2620_v15 = vpop.xlane.xlu1 %2619 }
 0xa37   : > { %v2621_v11 = vsub.f32 %v2612_v35, %v2620_v15 }
 0xa39   : > { %v2622_v16 = vmul.f32 1.442695, %v2621_v11 }
 0xa3b   : > { %4327 = vpow2.f32 %v2622_v16 }
 0xa3d   : > { %v4943_v17 = vpop.eup %4325 }
 0xa3e   : > { %v2745_v18 = vpop.xlane.xlu0 %2744  ;;  %v2516_v19 = vsel %vm1591_vm5, %v4943_v17, 0.0 }
 0xa3f   : > { %v2746_v20 = vsub.f32 %v2737_v40, %v2745_v18  ;;  %2517 = vadd.xlane.f32.xlu0 %v2516_v19 }
 0xa41   : > { %v2747_v5 = vmul.f32 1.442695, %v2746_v20 }
 0xa43   : > { %4329 = vpow2.f32 %v2747_v5 }
 0xa45   : > { %v4947_v21 = vpop.eup %4327 }
 0xa46   : > { %v2624_v6 = vsel %vm1591_vm5, %v4947_v21, 0.0  ;;  %v2856_v28 = vpop.xlane.xlu1 %2855 }
 0xa47   : > { %2625 = vadd.xlane.f32.xlu1 %v2624_v6  ;;  %v2857_v38 = vsub.f32 %v4931_v8, %v2856_v28 }
 0xa49   : > { %v2858_v39 = vmul.f32 1.442695, %v2857_v38 }
 0xa4d   : > { %v4951_v23 = vpop.eup %4329 }
 0xa4e   : > { %v2964_v24 = vpop.xlane.xlu0 %2963  ;;  %v2749_v25 = vsel %vm1591_vm5, %v4951_v23, 0.0 }
 0xa4f   : > { %2750 = vadd.xlane.f32.xlu0 %v2749_v25  ;;  %v2965_v36 = vsub.f32 %v2956_v54, %v2964_v24 }
 0xa51   : > { %v2966_v37 = vmul.f32 1.442695, %v2965_v36 }
 0xa52   : > { %v2298_v26 = vpop.xlane.xlu0 %2297 }
 0xa53   : > { %4331 = vrcp.f32 %v2298_v26 }
 0xa54   : > { %4333 = vpow2.f32 %v2966_v37 }
 0xa55   : > { %4335 = vpow2.f32 %v2858_v39 }
 0xa56   : > { %v3072_v29 = vpop.xlane.xlu1 %3071  ;;  %v2523_v8 = vpop.permute.xlu0 %2522 }
 0xa57   : > { %v3073_v40 = vsub.f32 %v3064_v60, %v3072_v29 }
 0xa58   : > { %2866 = vrot.lane.b32.xlu1 %v4276_v27, %s4388_s21  ;;  %s5151_s21 = sld [smem:[#allocation8_spill]] }
 0xa59   : > { %v3074_v41 = vmul.f32 1.442695, %v3073_v40 }
 0xa5a   : > { %v2415_v35 = vpop.permute.xlu1 %2414 }
 0xa5b   : > { %4337 = vpow2.f32 %v3074_v41 }
 0xa5d   : > { %v4332_v31 = vpop.eup %4331 }
 0xa5e   : > { %v2300_v33 = vmul.f32 %v4332_v31, %v4322_v57  ;;  %v4964_v44 = vpop.eup %4333 }
 0xa5f   : > { %v2968_v45 = vsel %vm1591_vm5, %v4964_v44, 0.0  ;;  %v4336_v46 = vpop.eup %4335 }
 0xa60   : > { %v2301_v34 = vpack.c.bf16 %v2300_v33, %v2300_v33 }
 0xa62   : > { %4084 = vmatmul.mubr.msk.bf16.vlgmr.msra.gmra.mrb[44].mxu1 %vm1591_vm5, %v2301_v34 }
 0xa63   : > { %4094 = vmatpush3.bf16.msra.mxu1 %v2415_v35  ;;  %4095 = vmatprep.mubr.msk.bf16.mxu1 %vm4386_vm1, %v4385_v3 }
 0xa64   : > { %4105 = vmatprep.subr.bf16.mxu1 %v4385_v3 }
 0xa65   : > { %2630 = vrot.lane.b32.xlu0 %v4923_v22, %s4393_s3  ;;  %v2860_v22 = vsel %vm1591_vm5, %v4336_v46, 0.0  ;;  %v4969_v47 = vpop.eup %4337 }
 0xa66   : > { %v3076_v48 = vsel %vm1591_vm5, %v4969_v47, 0.0 }
 0xa7c   : > { %2969 = vadd.xlane.f32.xlu1 %v2968_v45  ;;  %v4277_v45 = vld [vmem:[%s5151_s21] sm:$0xff]  }
 0xa7d   : > { %4172 = vmatpush3.bf16.msra.mxu0 %v4277_v45 }
 0xa7e   : > { %4173 = vmatprep.subr.bf16.mxu0 %v4385_v3 }
 0xa84   : > { %2861 = vadd.xlane.f32.xlu0 %v2860_v22 }
 0xa88   : > { %3077 = vadd.xlane.f32.xlu0 %v3076_v48 }
 0xa8d   : > { %3082 = vrot.lane.b32.xlu1 %v4276_v27, %s4393_s3  ;;  %s5154_s3 = sld [smem:[#allocation9_spill]] }
 0xa9e   : > { %2974 = vrot.lane.b32.xlu0 %v4276_v27, %s4391_s17  ;;  %s5152_s17 = sld [smem:[#allocation19_spill]] }
 0xaa4   : > { %s5153_s12 = scalar_lea.vmem %s5152_s17, %s4519_s1 }
 0xac0   : > { %v2410_v7 = vpop.xlane.xlu1 %2409 }
 0xac1   : > { %4339 = vrcp.f32 %v2410_v7  ;;  %v4278_v7 = vld [vmem:[%s5151_s21 + $0x8] sm:$0xff]  }
 0xac2   : > { %4174 = vmatpush3.bf16.msra.mxu0 %v4278_v7 }
 0xac3   : > { %4187 = vmatprep.subr.bf16.mxu0 %v4385_v3 }
 0xacb   : > { %v4340_v49 = vpop.eup %4339 }
 0xacc   : > { %v2412_v51 = vmul.f32 %v4340_v49, %v4324_v12  ;;  %v2518_v52 = vpop.xlane.xlu0 %2517 }
 0xacd   : > { %4341 = vrcp.f32 %v2518_v52 }
 0xace   : > { %v2413_v53 = vpack.c.bf16 %v2412_v51, %v2412_v51 }
 0xad0   : > { %4096 = vmatmul.mubr.msk.bf16.vlgmr.msra.gmra.mrb[48].mxu1 %vm1591_vm5, %v2413_v53 }
 0xad1   : > { %4106 = vmatpush3.bf16.msra.mxu1 %v2523_v8  ;;  %4107 = vmatprep.mubr.msk.bf16.mxu1 %vm4386_vm1, %v4385_v3 }
 0xad2   : > { %4117 = vmatprep.subr.bf16.mxu1 %v4385_v3 }
 0xad4   : > { %v2626_v54 = vpop.xlane.xlu1 %2625 }
 0xad5   : > { %4343 = vrcp.f32 %v2626_v54 }
 0xad7   : > { %v4342_v56 = vpop.eup %4341 }
 0xad8   : > { %v2520_v50 = vmul.f32 %v4342_v56, %v4943_v17  ;;  %v2867_v1 = vpop.permute.xlu1 %2866 }
 0xada   : > { %v2521_v57 = vpack.c.bf16 %v2520_v50, %v2520_v50 }
 0xadc   : > { %v2751_v55 = vpop.xlane.xlu0 %2750  ;;  %4108 = vmatmul.mubr.msk.bf16.vlgmr.msra.gmra.mrb[52].mxu1 %vm1591_vm5, %v2521_v57 }
 0xadd   : > { %4345 = vrcp.f32 %v2751_v55  ;;  %4119 = vmatprep.mubr.msk.bf16.mxu1 %vm4386_vm1, %v4385_v3 }
 0xadf   : > { %v4344_v58 = vpop.eup %4343 }
 0xae0   : > { %v2628_v59 = vmul.f32 %v4344_v58, %v4947_v21  ;;  %v2631_v60 = vpop.permute.xlu0 %2630 }
 0xae1   : > { %4118 = vmatpush3.bf16.msra.mxu1 %v2631_v60 }
 0xae2   : > { %v2629_v61 = vpack.c.bf16 %v2628_v59, %v2628_v59  ;;  %4129 = vmatprep.subr.bf16.mxu1 %v4385_v3 }
 0xae4   : > { %4120 = vmatmul.mubr.msk.bf16.vlgmr.msra.gmra.mrb[56].mxu1 %vm1591_vm5, %v2629_v61 }
 0xae5   : > { %4130 = vmatpush3.bf16.msra.mxu1 %v4276_v27  ;;  %4131 = vmatprep.mubr.msk.bf16.mxu1 %vm4386_vm1, %v4385_v3 }
 0xae6   : > { %4141 = vmatprep.subr.bf16.mxu1 %v4385_v3 }
 0xae7   : > { %v4346_v62 = vpop.eup %4345 }
 0xae8   : > { %v2753_v63 = vmul.f32 %v4346_v62, %v4951_v23 }
 0xaea   : > { %v2754_v0 = vpack.c.bf16 %v2753_v63, %v2753_v63 }
 0xaec   : > { %4132 = vmatmul.mubr.msk.bf16.vlgmr.msra.gmra.mrb[60].mxu1 %vm1591_vm5, %v2754_v0 }
 0xaed   : > { %4142 = vmatpush3.bf16.msra.mxu1 %v2867_v1  ;;  %4143 = vmatprep.mubr.msk.bf16.mxu1 %vm4386_vm1, %v4385_v3 }
 0xaee   : > { %4153 = vmatprep.subr.bf16.mxu1 %v4385_v3 }
 0xb09   : > { %v2970_v4 = vpop.xlane.xlu1 %2969 }
 0xb0d   : > { %v3083_v17 = vpop.permute.xlu1 %3082 }
 0xb11   : > { %v2862_v2 = vpop.xlane.xlu0 %2861 }
 0xb12   : > { %4347 = vrcp.f32 %v2862_v2 }
 0xb13   : > { %4349 = vrcp.f32 %v2970_v4 }
 0xb15   : > { %v3078_v9 = vpop.xlane.xlu0 %3077 }
 0xb16   : > { %4351 = vrcp.f32 %v3078_v9 }
 0xb19   : > { %v2975_v13 = vpop.permute.xlu0 %2974 }
 0xb1c   : > { %v4348_v10 = vpop.eup %4347 }
 0xb1d   : > { %v2864_v12 = vmul.f32 %v4348_v10, %v4336_v46  ;;  %v4350_v15 = vpop.eup %4349 }
 0xb1e   : > { %v2972_v11 = vmul.f32 %v4350_v15, %v4964_v44 }
 0xb1f   : > { %v2865_v14 = vpack.c.bf16 %v2864_v12, %v2864_v12 }
 0xb20   : > { %v2973_v16 = vpack.c.bf16 %v2972_v11, %v2972_v11  ;;  %v4352_v18 = vpop.eup %4351  ;;  %v3834_v11 = vld [vmem:[%s5153_s12] ss:$0 sm:$0xff] }
 0xb21   : > { %4144 = vmatmul.mubr.msk.bf16.vlgmr.msra.gmra.mrb[64].mxu1 %vm1591_vm5, %v2865_v14  ;;  %v3080_v19 = vmul.f32 %v4352_v18, %v4969_v47 }
 0xb22   : > { %4154 = vmatpush3.bf16.msra.mxu1 %v2975_v13  ;;  %4155 = vmatprep.mubr.msk.bf16.mxu1 %vm4386_vm1, %v4385_v3 }
 0xb23   : > { %4165 = vmatprep.subr.bf16.mxu1 %v4385_v3  ;;  %v3081_v20 = vpack.c.bf16 %v3080_v19, %v3080_v19 }
 0xb29   : > { %4156 = vmatmul.mubr.msk.bf16.vlgmr.msra.gmra.mrb[68].mxu1 %vm1591_vm5, %v2973_v16 }
 0xb2a   : > { %4166 = vmatpush3.bf16.msra.mxu1 %v3083_v17  ;;  %4167 = vmatprep.mubr.msk.bf16.mxu1 %vm4386_vm1, %v4385_v3 }
 0xb2b   : > { %4179 = vmatprep.subr.bf16.mxu1 %v4385_v3 }
 0xb31   : > { %4168 = vmatmul.mubr.msk.bf16.vlgmr.msra.gmra.mrb[72].mxu1 %vm1591_vm5, %v3081_v20 }
 0xb32   : > { %4183 = vmatprep.mubr.msk.bf16.mxu1 %vm4386_vm1, %v4385_v3 }
 0xb35   : > { %v2345_v5 = vpop.f32.mrb[44].mxu1 }
 0xb36   : > { %v4085_v21 = vpop.f32.mrb[45].mxu1 }
 0xb37   : > { %v2348_v6 = vpop.f32.mrb[46].mxu1 }
 0xb38   : > { %v4086_v23 = vpop.f32.mrb[47].mxu1 }
 0xba3   : > { %v2454_v24 = vpop.f32.mrb[48].mxu1 }
 0xba4   : > { %v4097_v25 = vpop.f32.mrb[49].mxu1 }
 0xba5   : > { %v2457_v26 = vpop.f32.mrb[50].mxu1 }
 0xba6   : > { %v4098_v27 = vpop.f32.mrb[51].mxu1 }
 0xbaf   : > { %v2562_v28 = vpop.f32.mrb[52].mxu1 }
 0xbb0   : > { %v4109_v29 = vpop.f32.mrb[53].mxu1 }
 0xbb1   : > { %v2565_v31 = vpop.f32.mrb[54].mxu1 }
 0xbb2   : > { %v4110_v33 = vpop.f32.mrb[55].mxu1 }
 0xbb7   : > { %v2670_v34 = vpop.f32.mrb[56].mxu1 }
 0xbb8   : > { %v4121_v35 = vpop.f32.mrb[57].mxu1 }
 0xbb9   : > { %v2673_v36 = vpop.f32.mrb[58].mxu1  ;;  %v4279_v35 = vld [vmem:[%s5154_s3] sm:$0xff]  }
 0xbba   : > { %v4122_v37 = vpop.f32.mrb[59].mxu1  ;;  %4180 = vmatpush3.bf16.msra.mxu1 %v4279_v35  ;;  %v4280_v36 = vld [vmem:[%s5154_s3 + $0x8] sm:$0xff]   ;;  %v3436_v35 = vsub.s32 4, %v4842_v30 }
 0xbbb   : > { %4181 = vmatprep.subr.bf16.mxu1 %v4385_v3  ;;  %v4281_v37 = vld [vmem:[%s4588_s23] sm:$0xff]  }
 0xbbe   : > { %4182 = vmatpush3.bf16.msra.mxu1 %v4280_v36  ;;  %v3442_v36 = vsub.s32 5, %v4842_v30 }
 0xbbf   : > { %v2798_v38 = vpop.f32.mrb[60].mxu1 }
 0xbc0   : > { %v4133_v39 = vpop.f32.mrb[61].mxu1 }
 0xbc1   : > { %v2801_v40 = vpop.f32.mrb[62].mxu1 }
 0xbc2   : > { %v4134_v41 = vpop.f32.mrb[63].mxu1 }
 0xbf4   : > { %v2906_v44 = vpop.f32.mrb[64].mxu1 }
 0xbf5   : > { %v4250_v46 = vpack.i.bf16 %v2906_v44, %v2454_v24  ;;  %v4145_v22 = vpop.f32.mrb[65].mxu1 }
 0xbf6   : > { %v2909_v47 = vpop.f32.mrb[66].mxu1  ;;  %v3241_v22 = vsub.s32 2, %v4842_v30 }
 0xbf7   : > { %4251 = vrot.lane.b32.xlu1 %v4250_v46, %s4394_s14  ;;  %v4146_v48 = vpop.f32.mrb[67].mxu1 }
 0xbf8   : > { %v3242_v48 = vrot.slane %v4846_v32, %v3241_v22 }
 0xbfc   : > { %v3014_v8 = vpop.f32.mrb[68].mxu1 }
 0xbfd   : > { %v4255_v49 = vpack.i.bf16 %v3014_v8, %v2562_v28  ;;  %v4157_v51 = vpop.f32.mrb[69].mxu1  ;;  %v3247_v8 = vsub.s32 3, %v4842_v30 }
 0xbfe   : > { %v3017_v52 = vpop.f32.mrb[70].mxu1 }
 0xbff   : > { %4256 = vrot.lane.b32.xlu1 %v4255_v49, %s4395_s18  ;;  %v4158_v53 = vpop.f32.mrb[71].mxu1 }
 0xc00   : > { %v3248_v53 = vrot.slane %v4846_v32, %v3247_v8 }
 0xc04   : > { %v3122_v54 = vpop.f32.mrb[72].mxu1 }
 0xc05   : > { %v4260_v56 = vpack.i.bf16 %v3122_v54, %v2670_v34  ;;  %v4169_v50 = vpop.f32.mrb[73].mxu1 }
 0xc06   : > { %v3125_v57 = vpop.f32.mrb[74].mxu1 }
 0xc07   : > { %4261 = vrot.lane.b32.xlu1 %v4260_v56, %s4396_s30  ;;  %v4170_v55 = vpop.f32.mrb[75].mxu1 }
 0xc08   : > { %v4283_v55 = vld [vmem:[%s4588_s23 + $0x10] sm:$0xff]  }
 0xc69   : > { %v4252_v58 = vpop.permute.xlu1 %4251 }
 0xc6a   : > { %v4254_v60 = vunpack.i.h.bf16 %v4252_v58  ;;  %v4253_v61 = vunpack.i.l.bf16 %v4252_v58  ;;  %v4284_v58 = vld [vmem:[%s4588_s23 + $0x18] sm:$0xff]  }
 0xc6c   : > { %v3140_v1 = vsel %vm1140_vm3, %v2798_v38, %v4254_v60  ;;  %v2688_v2 = vsel %vm1140_vm3, %v2345_v5, %v4253_v61  ;;  %v4282_v38 = vld [vmem:[%s4588_s23 + $0x8] sm:$0xff]  }
 0xc71   : > { %v4257_v59 = vpop.permute.xlu1 %4256 }
 0xc72   : > { %v4259_v62 = vunpack.i.h.bf16 %v4257_v59  ;;  %v4258_v63 = vunpack.i.l.bf16 %v4257_v59  ;;  %v3838_v59 = vld [vmem:[%s5155_s10] ss:$0 sm:$0xff] }
 0xc74   : > { %v3141_v10 = vsel %vm1591_vm5, %v3140_v1, %v4259_v62  ;;  %v2689_v12 = vsel %vm1591_vm5, %v2688_v2, %v4258_v63 }
 0xc79   : > { %v4262_v0 = vpop.permute.xlu1 %4261 }
 0xc7a   : > { %v4264_v4 = vunpack.i.h.bf16 %v4262_v0  ;;  %v4263_v9 = vunpack.i.l.bf16 %v4262_v0 }
 0xc7c   : > { %v3142_v13 = vsel %vm1593_vm6, %v3141_v10, %v4264_v4  ;;  %v2690_v14 = vsel %vm1593_vm6, %v2689_v12, %v4263_v9 }
 0xc7d   : > { %v3143_v15 = vpack.c.bf16 %v3142_v13, %v2690_v14 }
 0xc7f   : > { %4176 = vmatmul.mubr.msk.bf16.vlgmr.msra.gmra.mrb[68].mxu0 %vm1019_vm2, %v3143_v15 }
 0xc80   : > { %4195 = vmatprep.mubr.msk.bf16.mxu0 %vm4386_vm1, %v4385_v3  ;;  %4188 = vmatpush3.bf16.msra.mxu0 %v4281_v37  ;;  %v3437_v37 = vrot.slane %v4846_v32, %v3436_v35 }
 0xc81   : > { %4189 = vmatprep.subr.bf16.mxu0 %v4385_v3 }
 0xc84   : > { %4190 = vmatpush3.bf16.msra.mxu0 %v4282_v38 }
 0xc85   : > { %4191 = vmatprep.subr.bf16.mxu0 %v4385_v3 }
 0xc88   : > { %4192 = vmatpush3.bf16.msra.mxu0 %v4283_v55 }
 0xc89   : > { %4193 = vmatprep.subr.bf16.mxu0 %v4385_v3  ;;  %v3842_v3 = vld [vmem:[%s964_s24] ss:$0 sm:$0xff] }
 0xc8c   : > { %4194 = vmatpush3.bf16.msra.mxu0 %v4284_v58 }
 0xd52   : > { %v3204_v16 = vpop.f32.mrb[68].mxu0 }
 0xd53   : > { %v3205_v17 = vadd.f32 %v3834_v11, %v3204_v16  ;;  %v4177_v18 = vpop.f32.mrb[69].mxu0 }
 0xd54   : > { %v3207_v19 = vpop.f32.mrb[70].mxu0 }
 0xd55   : > { %v3208_v20 = vadd.f32 %v3834_v11, %v3207_v19  ;;  %v4178_v5 = vpop.f32.mrb[71].mxu0  ;;  %v3211_v21 = vadd.f32 %v3205_v17, %v4851_v42 }
 0xd57   : > { %v3213_v6 = vsel %vm1019_vm2, %v3211_v21, 0.0  ;;  %v3212_v23 = vadd.f32 %v3208_v20, %v4853_v43 }
 0xd58   : > { %3214 = vadd.xlane.f32.xlu0 %v3213_v6 }
 0xd59   : > { %v3216_v24 = vsel %vm1019_vm2, %v3212_v23, 0.0 }
 0xd5a   : > { %3217 = vadd.xlane.f32.xlu1 %v3216_v24 }
 0xde5   : > { %v3215_v25 = vpop.xlane.xlu0 %3214 }
 0xde6   : > { %v3219_v26 = vmul.f32 0.03125, %v3215_v25 }
 0xde7   : > { %v3218_v27 = vpop.xlane.xlu1 %3217 }
 0xde8   : > { %v3221_v28 = vsub.f32 %v3211_v21, %v3219_v26  ;;  %v3220_v29 = vmul.f32 0.03125, %v3218_v27 }
 0xdea   : > { %v3222_v31 = vsub.f32 %v3212_v23, %v3220_v29  ;;  %v3223_v33 = vmul.f32 %v3221_v28, %v3221_v28 }
 0xdec   : > { %v3225_v42 = vsel %vm1019_vm2, %v3223_v33, 0.0  ;;  %v3224_v34 = vmul.f32 %v3222_v31, %v3222_v31 }
 0xded   : > { %3226 = vadd.xlane.f32.xlu0 %v3225_v42 }
 0xdee   : > { %v3228_v43 = vsel %vm1019_vm2, %v3224_v34, 0.0 }
 0xdf1   : > { %3229 = vadd.xlane.f32.xlu0 %v3228_v43 }
 0xe7a   : > { %v3227_v39 = vpop.xlane.xlu0 %3226 }
 0xe7b   : > { %v3231_v40 = vmul.f32 0.03125, %v3227_v39  ;;  %v3443_v39 = vrot.slane %v4846_v32, %v3442_v36 }
 0xe7d   : > { %v3233_v41 = vadd.f32 1e-05, %v3231_v40 }
 0xe7e   : > { %v3230_v44 = vpop.xlane.xlu0 %3229 }
 0xe7f   : > { %4353 = vrsqrt.f32 %v3233_v41  ;;  %v3232_v45 = vmul.f32 0.03125, %v3230_v44 }
 0xe81   : > { %v3234_v46 = vadd.f32 1e-05, %v3232_v45 }
 0xe83   : > { %4355 = vrsqrt.f32 %v3234_v46 }
 0xe89   : > { %v4354_v47 = vpop.eup %4353 }
 0xe8a   : > { %v3237_v7 = vmul.f32 %v4354_v47, %v3221_v28 }
 0xe8c   : > { %v3243_v51 = vmul.f32 %v3242_v48, %v3237_v7 }
 0xe8d   : > { %v4356_v49 = vpop.eup %4355 }
 0xe8e   : > { %v3238_v52 = vmul.f32 %v4356_v49, %v3222_v31  ;;  %v3249_v56 = vadd.f32 %v3248_v53, %v3243_v51 }
 0xe90   : > { %v3244_v54 = vmul.f32 %v3242_v48, %v3238_v52 }
 0xe92   : > { %v3250_v50 = vadd.f32 %v3248_v53, %v3244_v54 }
 0xe94   : > { %v3251_v57 = vpack.c.bf16 %v3250_v50, %v3249_v56 }
 0xe96   : > { %4184 = vmatmul.mubr.msk.bf16.vlgmr.msra.gmra.mrb[76].mxu1 %vm1019_vm2, %v3251_v57 }
 0xf69   : > { %v3312_v60 = vpop.f32.mrb[76].mxu1 }
 0xf6a   : > { %v3313_v61 = vadd.f32 %v3838_v59, %v3312_v60  ;;  %v4185_v62 = vpop.f32.mrb[77].mxu1 }
 0xf6b   : > { %v3315_v63 = vpop.f32.mrb[78].mxu1 }
 0xf6c   : > { %v3316_v0 = vadd.f32 %v3838_v59, %v3315_v63  ;;  %v4186_v1 = vpop.f32.mrb[79].mxu1  ;;  %v3319_v2 = vmax.f32 %v3313_v61, 0.0 }
 0xf6e   : > { %v3320_v4 = vmax.f32 %v3316_v0, 0.0 }
 0xf70   : > { %v3321_v9 = vpack.c.bf16 %v3320_v4, %v3319_v2 }
 0xf72   : > { %4196 = vmatmul.mubr.msk.bf16.vlgmr.msra.gmra.mrb[72].mxu0 %vm3361_vm7, %v3321_v9 }
0x1045   : > { %v3399_v10 = vpop.f32.mrb[72].mxu0 }
0x1046   : > { %v3400_v12 = vadd.f32 %v3842_v3, %v3399_v10  ;;  %v4197_v13 = vpop.f32.mrb[73].mxu0 }
0x1047   : > { %v3402_v14 = vpop.f32.mrb[74].mxu0 }
0x1048   : > { %v3403_v15 = vadd.f32 %v3842_v3, %v3402_v14  ;;  %v4198_v11 = vpop.f32.mrb[75].mxu0  ;;  %v3406_v16 = vadd.f32 %v3400_v12, %v3249_v56 }
0x104a   : > { %v3408_v17 = vsel %vm1019_vm2, %v3406_v16, 0.0  ;;  %v3407_v18 = vadd.f32 %v3403_v15, %v3250_v50 }
0x104b   : > { %3409 = vadd.xlane.f32.xlu1 %v3408_v17 }
0x104c   : > { %v3411_v19 = vsel %vm1019_vm2, %v3407_v18, 0.0 }
0x104d   : > { %3412 = vadd.xlane.f32.xlu0 %v3411_v19 }
0x10d8   : > { %v3410_v20 = vpop.xlane.xlu1 %3409 }
0x10d9   : > { %v3414_v5 = vmul.f32 0.03125, %v3410_v20 }
0x10da   : > { %v3413_v21 = vpop.xlane.xlu0 %3412 }
0x10db   : > { %v3416_v6 = vsub.f32 %v3406_v16, %v3414_v5  ;;  %v3415_v23 = vmul.f32 0.03125, %v3413_v21 }
0x10dd   : > { %v3417_v24 = vsub.f32 %v3407_v18, %v3415_v23  ;;  %v3418_v25 = vmul.f32 %v3416_v6, %v3416_v6 }
0x10df   : > { %v3420_v26 = vsel %vm1019_vm2, %v3418_v25, 0.0  ;;  %v3419_v27 = vmul.f32 %v3417_v24, %v3417_v24 }
0x10e0   : > { %3421 = vadd.xlane.f32.xlu1 %v3420_v26 }
0x10e1   : > { %v3423_v28 = vsel %vm1019_vm2, %v3419_v27, 0.0 }
0x10e2   : > { %3424 = vadd.xlane.f32.xlu0 %v3423_v28 }
0x116d   : > { %v3422_v29 = vpop.xlane.xlu1 %3421 }
0x116e   : > { %v3426_v31 = vmul.f32 0.03125, %v3422_v29 }
0x116f   : > { %v3425_v33 = vpop.xlane.xlu0 %3424 }
0x1170   : > { %v3428_v42 = vadd.f32 1e-05, %v3426_v31  ;;  %v3427_v34 = vmul.f32 0.03125, %v3425_v33 }
0x1172   : > { %4357 = vrsqrt.f32 %v3428_v42  ;;  %v3429_v43 = vadd.f32 1e-05, %v3427_v34 }
0x1174   : > { %4359 = vrsqrt.f32 %v3429_v43 }
0x117c   : > { %v4358_v38 = vpop.eup %4357 }
0x117d   : > { %v3432_v40 = vmul.f32 %v4358_v38, %v3416_v6 }
0x117e   : > { %v4360_v41 = vpop.eup %4359 }
0x117f   : > { %v3438_v44 = vmul.f32 %v3437_v37, %v3432_v40  ;;  %v3433_v45 = vmul.f32 %v4360_v41, %v3417_v24 }
0x1181   : > { %v3444_v46 = vadd.f32 %v3443_v39, %v3438_v44  ;;  %v3439_v22 = vmul.f32 %v3437_v37, %v3433_v45 }
0x1183   : > { %3446 = vst.msk [vmem:[#allocation2] sm:$0xff] %vm1019_vm2, %v3444_v46  ;;  %3448 = vst.msk [vmem:[%s4598_s29] sm:$0xff] %vm1019_vm2, %v3444_v46  ;;  %v3445_v47 = vadd.f32 %v3443_v39, %v3439_v22 }
0x1185   : > { %3447 = vst.msk [vmem:[#allocation2 + $0x8] sm:$0xff] %vm1019_vm2, %v3445_v47  ;;  %3449 = vst.msk [vmem:[%s4598_s29 + $0x8] sm:$0xff] %vm1019_vm2, %v3445_v47 }
0x1186 PF: > { %s5157_s1 = sld [smem:[#allocation5_spill]]  ;;  %s5158_s0 = sld [smem:[#allocation4_spill]] }
0x1187   : > { %s5159_s30 = sld [smem:[#allocation6_spill]] }
0x118c   : > { %s29_s20 = sadd.s32 1, %s5157_s1  }
0x118d   : > { %p26_p6 = scmp.ge.s32.totalorder %s29_s20, 4  }
0x118f   :  { %28 = sbr.rel (!%p26_p6) target bundleno = 15 (0xf), region = 184 }

</bundles_post_ra>
